<compile_context>
chip_gen: v6e
topology: v6e:2x2x1
jax: 0.10.0
libtpu: 0.0.40
codegen_flags: <defaults>
</compile_context>

<pallas_src>
import jax
import jax.numpy as jnp
from jax import lax
from jax.experimental import pallas as pl
from jax.experimental.pallas import tpu as pltpu

D_MODEL = 256
N_HEADS = 4
HEAD_DIM = D_MODEL // N_HEADS
D_FF = 1024
N_LAYERS = 6
VOCAB = 512
NUM_ACTIONS = 18
NUM_GAMES = 6
MAX_POS = 1024
LN_EPS = 1e-5


# ------------------------------ kernel helpers ------------------------------

def _layer_norm(x, w, b):
    # One-pass LN: var = E[x^2] - mean^2 — removes a full elementwise pass and a
    # second lane (XLU) reduction at every LN site vs. the two-pass form.
    m1 = jnp.mean(x, axis=-1, keepdims=True)
    m2 = jnp.mean(x * x, axis=-1, keepdims=True)
    inv = lax.rsqrt(jnp.maximum(m2 - m1 * m1, 0.0) + LN_EPS)
    return (x - m1) * inv * w + b


def _gelu(x):
    # TODO(synk): PyTorch's default 'gelu' is the exact erf form; erf lowering is
    # not guaranteed in Mosaic, so the tanh approximation is used here.
    c = 0.7978845608028654  # sqrt(2/pi)
    return 0.5 * x * (1.0 + jnp.tanh(c * (x + 0.044715 * x * x * x)))


# --------------------------------- kernel -----------------------------------

def _world_model_kernel(
    x_ref, mask_ref,
    in_proj_w_ref, in_proj_b_ref, out_proj_w_ref, out_proj_b_ref,
    ln1_w_ref, ln1_b_ref, ln2_w_ref, ln2_b_ref,
    ff_w1_ref, ff_b1_ref, ff_w2_ref, ff_b2_ref,
    obs_ln_w_ref, obs_ln_b_ref, obs_w_ref, obs_b_ref,
    rew_ln_w_ref, rew_ln_b_ref, rew_w_ref, rew_b_ref,
    obs_out_ref, rew_out_ref,
    x_scratch,
):
    l = pl.program_id(1)
    bb, L, _ = x_ref.shape
    R = bb * L

    # First layer step of this batch block: pull the residual stream into scratch.
    @pl.when(l == 0)
    def _():
        x_scratch[...] = x_ref[...].reshape(R, D_MODEL)

    x = x_scratch[...]                 # (R, D) f32 residual stream
    mask = mask_ref[...]               # (L, L) additive causal mask (0 / -1e30)

    # ---- self-attention block (norm_first) ----
    h = _layer_norm(x, ln1_w_ref[0], ln1_b_ref[0])
    qkv = jnp.dot(h.astype(jnp.bfloat16), in_proj_w_ref[0],
                  preferred_element_type=jnp.float32) + in_proj_b_ref[0]    # (R, 3D)
    qkv = qkv.reshape(bb, L, 3 * D_MODEL).astype(jnp.bfloat16)

    scale = 1.0 / (HEAD_DIM ** 0.5)    # 0.125: exact in bf16
    heads = []
    # TODO(synk): a head-batched einsum ('bqhd,bkhd->bhqk') would remove the
    # 64-lane slices/concat, but multi-batch-dim dot_general lowering is not
    # guaranteed in Mosaic; the 4-iteration loop is kept (trace is per-layer now,
    # so vreg pressure is bounded by the layer grid axis).
    # TODO(synk): for L near MAX_POS, serialize heads / go flash-style so only one
    # (bb, L, L) score matrix is live (v7x 64 MiB VMEM).
    for hh in range(N_HEADS):
        lo = hh * HEAD_DIM
        q = qkv[:, :, lo:lo + HEAD_DIM] * scale
        k = qkv[:, :, D_MODEL + lo:D_MODEL + lo + HEAD_DIM]
        v = qkv[:, :, 2 * D_MODEL + lo:2 * D_MODEL + lo + HEAD_DIM]
        s = jnp.einsum("bqd,bkd->bqk", q, k,
                       preferred_element_type=jnp.float32) + mask           # (bb,L,L)
        s = s - jnp.max(s, axis=-1, keepdims=True)
        p = jnp.exp(s)
        p = p * pl.reciprocal(jnp.sum(p, axis=-1, keepdims=True), approx=True)
        heads.append(jnp.einsum("bqk,bkd->bqd", p.astype(jnp.bfloat16), v,
                                preferred_element_type=jnp.float32))        # (bb,L,dh)

    # Fused output projection: one full-K (256) matmul over all heads.
    attn = jnp.concatenate(heads, axis=-1).reshape(R, D_MODEL)
    attn = jnp.dot(attn.astype(jnp.bfloat16), out_proj_w_ref[0],
                   preferred_element_type=jnp.float32) + out_proj_b_ref[0]
    x = x + attn

    # ---- feed-forward block (norm_first) ----
    h2 = _layer_norm(x, ln2_w_ref[0], ln2_b_ref[0])
    ff = _gelu(jnp.dot(h2.astype(jnp.bfloat16), ff_w1_ref[0],
                       preferred_element_type=jnp.float32) + ff_b1_ref[0])
    ff = jnp.dot(ff.astype(jnp.bfloat16), ff_w2_ref[0],
                 preferred_element_type=jnp.float32) + ff_b2_ref[0]
    x = x + ff
    x_scratch[...] = x

    # ---- output heads: only on the last layer step of this batch block ----
    @pl.when(l == pl.num_programs(1) - 1)
    def _():
        obs_h = _layer_norm(x, obs_ln_w_ref[...], obs_ln_b_ref[...])
        obs = jnp.dot(obs_h.astype(jnp.bfloat16), obs_w_ref[...],
                      preferred_element_type=jnp.float32) + obs_b_ref[...]  # (R, V)
        obs_out_ref[...] = obs.reshape(bb, L, VOCAB).astype(obs_out_ref.dtype)

        # Reward head on the VPU (row-dot); lane-dense (bb, 1, L) store.
        rew_h = _layer_norm(x, rew_ln_w_ref[...], rew_ln_b_ref[...])
        rew_h = rew_h.reshape(bb, L, D_MODEL)
        rew = jnp.sum(rew_h * rew_w_ref[...], axis=-1) + rew_b_ref[...]     # (bb, L)
        rew_out_ref[...] = rew[:, None, :]


# ------------------------------ tiling helpers -------------------------------

def _vmem_capacity_bytes():
    try:
        cap = getattr(pltpu.get_tpu_info(), "vmem_capacity_bytes", None)
        if cap:
            return int(cap)
    except Exception:
        pass
    return 64 * 1024 * 1024  # conservative (v7x per-core)


def _row_cap():
    # Bigger tiles amortize per-grid-step overhead; keep activations well under
    # VMEM (live f32 intermediates are ~12 KB/row at small L).
    return 2048 if _vmem_capacity_bytes() <= 64 * 1024 * 1024 else 4096


def _vmem_limit_bytes():
    cap = _vmem_capacity_bytes()
    if cap <= 64 * 1024 * 1024:
        return (cap * 3) // 4                        # v7x: leave ~16 MiB headroom
    return min(100 * 1024 * 1024, (cap * 7) // 8)    # v5e/v6e


def _pick_bb(B, L, row_cap):
    """Batch sub-block size: divisor of B, bb*L under row_cap, >= 2 grid steps
    when B >= 2 (both v7x TensorCores), preferring bb*L multiple of 256 (MXU M)."""
    max_bb = min(B, max(1, row_cap // L))
    if B >= 2:
        max_bb = min(max_bb, max(1, B // 2))
    best, best_aligned = 1, False
    for d in range(1, max_bb + 1):
        if B % d:
            continue
        aligned = (d * L) % 256 == 0
        if (aligned and not best_aligned) or (aligned == best_aligned and d > best):
            best, best_aligned = d, aligned
    return best


# -------------------------------- wrapper ------------------------------------

def mini_world_model_forward(params, obs_tokens, action_tokens, game_ids):
    """
    obs_tokens:    (B, T, K) int32
    action_tokens: (B, T)    int32
    game_ids:      (B,)      int32   (a (B, T) input is reduced to its first column)
    returns: obs_logits (B, T, K, 512) f32, rewards (B, T) f32
    """
    B, T, K = obs_tokens.shape
    L = T * (K + 1)
    assert L <= MAX_POS
    if game_ids.ndim == 2:
        game_ids = game_ids[:, 0]

    # TODO(synk): the PyTorch `assert action_tokens.max() < num_actions` is a host
    # sync; omitted here. Dropout (p=0.1) is also omitted (eval-mode forward).

    # --- embedding / token packing glue (plain JAX gathers) ---
    z_embed = params["obs_embed"][obs_tokens.reshape(B, T * K)]     # (B, T*K, D)
    a_embed = params["action_embed"][action_tokens]                 # (B, T, D)
    g_embed = params["game_embed"][game_ids]                        # (B, D)
    tokens = jnp.concatenate(
        [z_embed.reshape(B, T, K, D_MODEL), a_embed[:, :, None, :]], axis=2
    ).reshape(B, L, D_MODEL)
    x = (tokens + params["pos"][:, :L, :] + g_embed[:, None, :]).astype(jnp.float32)

    # Additive causal mask, built once and kept resident (constant block).
    causal_mask = jnp.where(jnp.tril(jnp.ones((L, L), dtype=bool)),
                            0.0, -1e30).astype(jnp.float32)

    bb = _pick_bb(B, L, _row_cap())

    weight_arrays = [
        params["in_proj_w"], params["in_proj_b"],
        params["out_proj_w"], params["out_proj_b"],
        params["ln1_w"], params["ln1_b"], params["ln2_w"], params["ln2_b"],
        params["ff_w1"], params["ff_b1"], params["ff_w2"], params["ff_b2"],
    ]
    head_arrays = [
        params["obs_ln_w"], params["obs_ln_b"], params["obs_w"], params["obs_b"],
        params["rew_ln_w"], params["rew_ln_b"], params["rew_w"], params["rew_b"],
    ]

    def batch_map(b, l):
        return (b, 0, 0)

    def layer_map(b, l):
        return (l, 0, 0)

    def const_map2(b, l):
        return (0, 0)

    in_specs = (
        [pl.BlockSpec((bb, L, D_MODEL), batch_map),          # activations
         pl.BlockSpec((L, L), const_map2)]                   # causal mask
        # per-layer weights: only one layer resident, double-buffered by Pallas
        + [pl.BlockSpec((1,) + w.shape[1:], layer_map) for w in weight_arrays]
        # head weights: grid-invariant, fetched once
        + [pl.BlockSpec(w.shape, const_map2) for w in head_arrays]
    )

    # Advisory cost estimate (helps XLA schedule the gather glue around the call).
    rows = B * L
    layer_mm = (2 * D_MODEL * 3 * D_MODEL + 2 * D_MODEL * D_MODEL
                + 4 * D_MODEL * D_FF + 4 * L * D_MODEL)
    flops = rows * (N_LAYERS * layer_mm + 2 * D_MODEL * VOCAB + 2 * D_MODEL)
    transcendentals = rows * N_LAYERS * (D_FF + N_HEADS * L + 4)
    wbytes = 2 * (N_LAYERS * (4 * D_MODEL * D_MODEL + 2 * D_MODEL * D_FF)
                  + D_MODEL * VOCAB)
    bytes_accessed = (rows * D_MODEL * 4 + (B // bb) * wbytes
                      + rows * VOCAB * 2 + rows * 4)
    cost = pl.CostEstimate(flops=int(flops), transcendentals=int(transcendentals),
                           bytes_accessed=int(bytes_accessed))

    obs_all, rew_all = pl.pallas_call(
        _world_model_kernel,
        out_shape=(
            jax.ShapeDtypeStruct((B, L, VOCAB), jnp.bfloat16),   # bf16 logits writeback
            jax.ShapeDtypeStruct((B, 1, L), jnp.float32),        # lane-dense rewards
        ),
        grid=(B // bb, N_LAYERS),
        in_specs=in_specs,
        out_specs=(
            pl.BlockSpec((bb, L, VOCAB), batch_map),
            pl.BlockSpec((bb, 1, L), batch_map),
        ),
        scratch_shapes=[pltpu.VMEM((bb * L, D_MODEL), jnp.float32)],
        compiler_params=pltpu.CompilerParams(
            dimension_semantics=("parallel", "arbitrary"),
            vmem_limit_bytes=_vmem_limit_bytes(),
        ),
        cost_estimate=cost,
    )(x, causal_mask, *weight_arrays, *head_arrays)

    # per-timestep layout is [K obs tokens, 1 action token]
    obs_logits = obs_all.reshape(B, T, K + 1, VOCAB)[:, :, :K, :].astype(jnp.float32)
    rewards = rew_all.reshape(B, T, K + 1)[:, :, K]
    return obs_logits, rewards


# ------------------------------ parameters -----------------------------------

def init_params(key):
    keys = jax.random.split(key, 10)

    def nrm(k, shape, scale=0.02, dtype=jnp.float32):
        return (scale * jax.random.normal(k, shape)).astype(dtype)

    bf16 = jnp.bfloat16
    # Linear weights stored pre-transposed as (in, out) so the kernel does x @ W.
    # Matmul weights in bf16 (MXU-native, halves HBM/VMEM); LN params and biases
    # stay f32; accumulation is f32 inside the kernel.
    return {
        "obs_embed": nrm(keys[0], (VOCAB, D_MODEL)),
        "action_embed": nrm(keys[1], (NUM_ACTIONS, D_MODEL)),
        "game_embed": nrm(keys[2], (NUM_GAMES, D_MODEL)),
        "pos": nrm(keys[3], (1, MAX_POS, D_MODEL), scale=1.0),
        "in_proj_w": nrm(keys[4], (N_LAYERS, D_MODEL, 3 * D_MODEL), dtype=bf16),
        "in_proj_b": jnp.zeros((N_LAYERS, 1, 3 * D_MODEL), jnp.float32),
        "out_proj_w": nrm(keys[5], (N_LAYERS, D_MODEL, D_MODEL), dtype=bf16),
        "out_proj_b": jnp.zeros((N_LAYERS, 1, D_MODEL), jnp.float32),
        "ln1_w": jnp.ones((N_LAYERS, 1, D_MODEL), jnp.float32),
        "ln1_b": jnp.zeros((N_LAYERS, 1, D_MODEL), jnp.float32),
        "ln2_w": jnp.ones((N_LAYERS, 1, D_MODEL), jnp.float32),
        "ln2_b": jnp.zeros((N_LAYERS, 1, D_MODEL), jnp.float32),
        "ff_w1": nrm(keys[6], (N_LAYERS, D_MODEL, D_FF), dtype=bf16),
        "ff_b1": jnp.zeros((N_LAYERS, 1, D_FF), jnp.float32),
        "ff_w2": nrm(keys[7], (N_LAYERS, D_FF, D_MODEL), dtype=bf16),
        "ff_b2": jnp.zeros((N_LAYERS, 1, D_MODEL), jnp.float32),
        "obs_ln_w": jnp.ones((1, D_MODEL), jnp.float32),
        "obs_ln_b": jnp.zeros((1, D_MODEL), jnp.float32),
        "obs_w": nrm(keys[8], (D_MODEL, VOCAB), dtype=bf16),
        "obs_b": jnp.zeros((1, VOCAB), jnp.float32),
        "rew_ln_w": jnp.ones((1, D_MODEL), jnp.float32),
        "rew_ln_b": jnp.zeros((1, D_MODEL), jnp.float32),
        "rew_w": nrm(keys[9], (1, D_MODEL)),   # row vector; reduced on the VPU
        "rew_b": jnp.zeros((1, 1), jnp.float32),
    }


# ---------------------------------- main --------------------------------------

if __name__ == "__main__":
    key = jax.random.PRNGKey(0)
    pkey, k1, k2, k3 = jax.random.split(key, 4)
    params = init_params(pkey)

    B, T, K = 2, 2, 7      # L = T*(K+1) = 16
    obs_tokens = jax.random.randint(k1, (B, T, K), 0, VOCAB, dtype=jnp.int32)
    action_tokens = jax.random.randint(k2, (B, T), 0, NUM_ACTIONS, dtype=jnp.int32)
    game_ids = jax.random.randint(k3, (B,), 0, NUM_GAMES, dtype=jnp.int32)

    fwd = jax.jit(mini_world_model_forward)
    obs_logits, rewards = fwd(params, obs_tokens, action_tokens, game_ids)
    jax.block_until_ready((obs_logits, rewards))

    assert obs_logits.shape == (B, T, K, VOCAB), obs_logits.shape
    assert rewards.shape == (B, T), rewards.shape
    assert bool(jnp.all(jnp.isfinite(obs_logits))) and bool(jnp.all(jnp.isfinite(rewards)))
    print("KERNEL_OK")
</pallas_src>

<mosaic_0001>
module attributes {stable_mosaic.version = 11 : i64} {
  func.func @_world_model_kernel(%arg0: i32, %arg1: i32, %arg2: memref<1x16x256xf32, #tpu.memory_space<vmem>>, %arg3: memref<16x16xf32, #tpu.memory_space<vmem>>, %arg4: memref<1x256x768xbf16, #tpu.memory_space<vmem>>, %arg5: memref<1x1x768xf32, #tpu.memory_space<vmem>>, %arg6: memref<1x256x256xbf16, #tpu.memory_space<vmem>>, %arg7: memref<1x1x256xf32, #tpu.memory_space<vmem>>, %arg8: memref<1x1x256xf32, #tpu.memory_space<vmem>>, %arg9: memref<1x1x256xf32, #tpu.memory_space<vmem>>, %arg10: memref<1x1x256xf32, #tpu.memory_space<vmem>>, %arg11: memref<1x1x256xf32, #tpu.memory_space<vmem>>, %arg12: memref<1x256x1024xbf16, #tpu.memory_space<vmem>>, %arg13: memref<1x1x1024xf32, #tpu.memory_space<vmem>>, %arg14: memref<1x1024x256xbf16, #tpu.memory_space<vmem>>, %arg15: memref<1x1x256xf32, #tpu.memory_space<vmem>>, %arg16: memref<1x256xf32, #tpu.memory_space<vmem>>, %arg17: memref<1x256xf32, #tpu.memory_space<vmem>>, %arg18: memref<256x512xbf16, #tpu.memory_space<vmem>>, %arg19: memref<1x512xf32, #tpu.memory_space<vmem>>, %arg20: memref<1x256xf32, #tpu.memory_space<vmem>>, %arg21: memref<1x256xf32, #tpu.memory_space<vmem>>, %arg22: memref<1x256xf32, #tpu.memory_space<vmem>>, %arg23: memref<1x1xf32, #tpu.memory_space<vmem>>, %arg24: memref<1x16x512xbf16, #tpu.memory_space<vmem>>, %arg25: memref<1x1x16xf32, #tpu.memory_space<vmem>>, %arg26: memref<16x256xf32, #tpu.memory_space<vmem>>) attributes {dimension_semantics = [#tpu.dimension_semantics<parallel>, #tpu.dimension_semantics<arbitrary>], iteration_bounds = array<i64: 2, 6>, scalar_prefetch = 0 : i64, scratch_operands = 1 : i64, tpu.core_type = #tpu.core_type<tc>, window_params = [{transform_indices = @transform_0, window_bounds = array<i64: 1, 16, 256>}, {pipeline_mode = #tpu.pipeline_mode<synchronous>, transform_indices = @transform_1, window_bounds = array<i64: 16, 16>}, {transform_indices = @transform_2, window_bounds = array<i64: 1, 256, 768>}, {transform_indices = @transform_3, window_bounds = array<i64: 1, 1, 768>}, {transform_indices = @transform_4, window_bounds = array<i64: 1, 256, 256>}, {transform_indices = @transform_5, window_bounds = array<i64: 1, 1, 256>}, {transform_indices = @transform_6, window_bounds = array<i64: 1, 1, 256>}, {transform_indices = @transform_7, window_bounds = array<i64: 1, 1, 256>}, {transform_indices = @transform_8, window_bounds = array<i64: 1, 1, 256>}, {transform_indices = @transform_9, window_bounds = array<i64: 1, 1, 256>}, {transform_indices = @transform_10, window_bounds = array<i64: 1, 256, 1024>}, {transform_indices = @transform_11, window_bounds = array<i64: 1, 1, 1024>}, {transform_indices = @transform_12, window_bounds = array<i64: 1, 1024, 256>}, {transform_indices = @transform_13, window_bounds = array<i64: 1, 1, 256>}, {pipeline_mode = #tpu.pipeline_mode<synchronous>, transform_indices = @transform_14, window_bounds = array<i64: 1, 256>}, {pipeline_mode = #tpu.pipeline_mode<synchronous>, transform_indices = @transform_15, window_bounds = array<i64: 1, 256>}, {pipeline_mode = #tpu.pipeline_mode<synchronous>, transform_indices = @transform_16, window_bounds = array<i64: 256, 512>}, {pipeline_mode = #tpu.pipeline_mode<synchronous>, transform_indices = @transform_17, window_bounds = array<i64: 1, 512>}, {pipeline_mode = #tpu.pipeline_mode<synchronous>, transform_indices = @transform_18, window_bounds = array<i64: 1, 256>}, {pipeline_mode = #tpu.pipeline_mode<synchronous>, transform_indices = @transform_19, window_bounds = array<i64: 1, 256>}, {pipeline_mode = #tpu.pipeline_mode<synchronous>, transform_indices = @transform_20, window_bounds = array<i64: 1, 256>}, {pipeline_mode = #tpu.pipeline_mode<synchronous>, transform_indices = @transform_21, window_bounds = array<i64: 1, 1>}, {transform_indices = @transform_22, window_bounds = array<i64: 1, 16, 512>}, {transform_indices = @transform_23, window_bounds = array<i64: 1, 1, 16>}]} {
    %c0_i32 = arith.constant 0 : i32
    %0 = arith.cmpi eq, %arg1, %c0_i32 : i32
    %1 = arith.extui %0 : i1 to i32
    %c0_i32_0 = arith.constant 0 : i32
    %2 = arith.cmpi ne, %1, %c0_i32_0 : i32
    scf.if %2 {
      %c0_82 = arith.constant 0 : index
      %c0_83 = arith.constant 0 : index
      %c0_84 = arith.constant 0 : index
      %196 = vector.load %arg2[%c0_82, %c0_83, %c0_84] : memref<1x16x256xf32, #tpu.memory_space<vmem>>, vector<1x16x256xf32>
      %197 = vector.shape_cast %196 : vector<1x16x256xf32> to vector<16x256xf32>
      %c0_85 = arith.constant 0 : index
      %c0_86 = arith.constant 0 : index
      %198 = vector.load %arg26[%c0_85, %c0_86] : memref<16x256xf32, #tpu.memory_space<vmem>>, vector<16x256xf32>
      tpu.vector_store %arg26[%c0_85, %c0_86], %197 {strides = array<i32>} : memref<16x256xf32, #tpu.memory_space<vmem>>, vector<16x256xf32>,
    } else {
    }
    %c0 = arith.constant 0 : index
    %c0_1 = arith.constant 0 : index
    %3 = vector.load %arg26[%c0, %c0_1] : memref<16x256xf32, #tpu.memory_space<vmem>>, vector<16x256xf32>
    %c0_2 = arith.constant 0 : index
    %c0_3 = arith.constant 0 : index
    %4 = vector.load %arg3[%c0_2, %c0_3] : memref<16x16xf32, #tpu.memory_space<vmem>>, vector<16x16xf32>
    %c0_4 = arith.constant 0 : index
    %c0_5 = arith.constant 0 : index
    %c0_6 = arith.constant 0 : index
    %5 = vector.load %arg8[%c0_4, %c0_5, %c0_6] : memref<1x1x256xf32, #tpu.memory_space<vmem>>, vector<1x1x256xf32>
    %6 = vector.shape_cast %5 : vector<1x1x256xf32> to vector<1x256xf32>
    %c0_7 = arith.constant 0 : index
    %c0_8 = arith.constant 0 : index
    %c0_9 = arith.constant 0 : index
    %7 = vector.load %arg9[%c0_7, %c0_8, %c0_9] : memref<1x1x256xf32, #tpu.memory_space<vmem>>, vector<1x1x256xf32>
    %8 = vector.shape_cast %7 : vector<1x1x256xf32> to vector<1x256xf32>
    %cst = arith.constant dense<0.000000e+00> : vector<16xf32>
    %9 = vector.multi_reduction <add>, %3, %cst [1] : vector<16x256xf32> to vector<16xf32>
    %10 = vector.shape_cast %9 : vector<16xf32> to vector<16x1xf32>
    %cst_10 = arith.constant 2.560000e+02 : f32
    %11 = vector.broadcast %cst_10 : f32 to vector<16x1xf32>
    %12 = arith.divf %10, %11 : vector<16x1xf32>
    %13 = arith.mulf %3, %3 : vector<16x256xf32>
    %cst_11 = arith.constant dense<0.000000e+00> : vector<16xf32>
    %14 = vector.multi_reduction <add>, %13, %cst_11 [1] : vector<16x256xf32> to vector<16xf32>
    %15 = vector.shape_cast %14 : vector<16xf32> to vector<16x1xf32>
    %cst_12 = arith.constant 2.560000e+02 : f32
    %16 = vector.broadcast %cst_12 : f32 to vector<16x1xf32>
    %17 = arith.divf %15, %16 : vector<16x1xf32>
    %18 = arith.mulf %12, %12 : vector<16x1xf32>
    %19 = arith.subf %17, %18 : vector<16x1xf32>
    %cst_13 = arith.constant 0.000000e+00 : f32
    %20 = vector.broadcast %cst_13 : f32 to vector<16x1xf32>
    %21 = arith.maximumf %19, %20 : vector<16x1xf32>
    %cst_14 = arith.constant 9.99999974E-6 : f32
    %22 = vector.broadcast %cst_14 : f32 to vector<16x1xf32>
    %23 = arith.addf %21, %22 : vector<16x1xf32>
    %24 = math.rsqrt %23 : vector<16x1xf32>
    %25 = vector.broadcast %12 : vector<16x1xf32> to vector<16x256xf32>
    %26 = arith.subf %3, %25 : vector<16x256xf32>
    %27 = vector.broadcast %24 : vector<16x1xf32> to vector<16x256xf32>
    %28 = arith.mulf %26, %27 : vector<16x256xf32>
    %29 = vector.broadcast %6 : vector<1x256xf32> to vector<16x256xf32>
    %30 = arith.mulf %28, %29 : vector<16x256xf32>
    %31 = vector.broadcast %8 : vector<1x256xf32> to vector<16x256xf32>
    %32 = arith.addf %30, %31 : vector<16x256xf32>
    %33 = arith.truncf %32 : vector<16x256xf32> to vector<16x256xbf16>
    %c0_15 = arith.constant 0 : index
    %c0_16 = arith.constant 0 : index
    %c0_17 = arith.constant 0 : index
    %34 = vector.load %arg4[%c0_15, %c0_16, %c0_17] : memref<1x256x768xbf16, #tpu.memory_space<vmem>>, vector<1x256x768xbf16>
    %35 = vector.shape_cast %34 : vector<1x256x768xbf16> to vector<256x768xbf16>
    %cst_18 = arith.constant dense<0.000000e+00> : vector<16x768xf32>
    %36 = tpu.matmul %33, %35, %cst_18 {dimension_numbers = #tpu.dot_dimension_numbers<[1], [0], [0], [1], [0, 0, 1, 1], [], []>} : vector<16x256xbf16>, vector<256x768xbf16>, vector<16x768xf32> -> vector<16x768xf32>
    %c0_19 = arith.constant 0 : index
    %c0_20 = arith.constant 0 : index
    %c0_21 = arith.constant 0 : index
    %37 = vector.load %arg5[%c0_19, %c0_20, %c0_21] : memref<1x1x768xf32, #tpu.memory_space<vmem>>, vector<1x1x768xf32>
    %38 = vector.shape_cast %37 : vector<1x1x768xf32> to vector<1x768xf32>
    %39 = vector.broadcast %38 : vector<1x768xf32> to vector<16x768xf32>
    %40 = arith.addf %36, %39 : vector<16x768xf32>
    %41 = vector.shape_cast %40 : vector<16x768xf32> to vector<1x16x768xf32>
    %42 = arith.truncf %41 : vector<1x16x768xf32> to vector<1x16x768xbf16>
    %43 = vector.extract_strided_slice %42 {offsets = [0, 0, 0], sizes = [1, 16, 64], strides = [1, 1, 1]} : vector<1x16x768xbf16> to vector<1x16x64xbf16>
    %cst_22 = arith.constant 1.250000e-01 : bf16
    %44 = vector.broadcast %cst_22 : bf16 to vector<1x16x64xbf16>
    %45 = arith.mulf %43, %44 : vector<1x16x64xbf16>
    %46 = vector.extract_strided_slice %42 {offsets = [0, 0, 256], sizes = [1, 16, 64], strides = [1, 1, 1]} : vector<1x16x768xbf16> to vector<1x16x64xbf16>
    %47 = vector.extract_strided_slice %42 {offsets = [0, 0, 512], sizes = [1, 16, 64], strides = [1, 1, 1]} : vector<1x16x768xbf16> to vector<1x16x64xbf16>
    "tpu.trace_start"() <{level = 10 : i32, message = "bqd,bkd->bqk"}> : () -> ()
    %cst_23 = arith.constant dense<0.000000e+00> : vector<1x16x16xf32>
    %48 = tpu.matmul %45, %46, %cst_23 {dimension_numbers = #tpu.dot_dimension_numbers<[2], [2], [1], [1], [0, 0, 0, 1, 1, 1], [0], [0]>} : vector<1x16x64xbf16>, vector<1x16x64xbf16>, vector<1x16x16xf32> -> vector<1x16x16xf32>
    "tpu.trace_stop"() : () -> ()
    %49 = vector.shape_cast %4 : vector<16x16xf32> to vector<1x16x16xf32>
    %50 = arith.addf %48, %49 : vector<1x16x16xf32>
    %cst_24 = arith.constant dense<0xFF800000> : vector<1x16xf32>
    %51 = vector.multi_reduction <maximumf>, %50, %cst_24 [2] : vector<1x16x16xf32> to vector<1x16xf32>
    %52 = vector.shape_cast %51 : vector<1x16xf32> to vector<1x16x1xf32>
    %53 = vector.broadcast %52 : vector<1x16x1xf32> to vector<1x16x16xf32>
    %54 = arith.subf %50, %53 : vector<1x16x16xf32>
    %55 = math.exp %54 : vector<1x16x16xf32>
    %cst_25 = arith.constant dense<0.000000e+00> : vector<1x16xf32>
    %56 = vector.multi_reduction <add>, %55, %cst_25 [2] : vector<1x16x16xf32> to vector<1x16xf32>
    %57 = vector.shape_cast %56 : vector<1x16xf32> to vector<1x16x1xf32>
    %58 = tpu.reciprocal %57 {approx = true} : vector<1x16x1xf32> -> vector<1x16x1xf32>
    %59 = vector.broadcast %58 : vector<1x16x1xf32> to vector<1x16x16xf32>
    %60 = arith.mulf %55, %59 : vector<1x16x16xf32>
    %61 = arith.truncf %60 : vector<1x16x16xf32> to vector<1x16x16xbf16>
    "tpu.trace_start"() <{level = 10 : i32, message = "bqk,bkd->bqd"}> : () -> ()
    %cst_26 = arith.constant dense<0.000000e+00> : vector<1x16x64xf32>
    %62 = tpu.matmul %61, %47, %cst_26 {dimension_numbers = #tpu.dot_dimension_numbers<[2], [1], [1], [2], [0, 0, 0, 1, 1, 2], [0], [0]>} : vector<1x16x16xbf16>, vector<1x16x64xbf16>, vector<1x16x64xf32> -> vector<1x16x64xf32>
    "tpu.trace_stop"() : () -> ()
    %63 = vector.extract_strided_slice %42 {offsets = [0, 0, 64], sizes = [1, 16, 64], strides = [1, 1, 1]} : vector<1x16x768xbf16> to vector<1x16x64xbf16>
    %cst_27 = arith.constant 1.250000e-01 : bf16
    %64 = vector.broadcast %cst_27 : bf16 to vector<1x16x64xbf16>
    %65 = arith.mulf %63, %64 : vector<1x16x64xbf16>
    %66 = vector.extract_strided_slice %42 {offsets = [0, 0, 320], sizes = [1, 16, 64], strides = [1, 1, 1]} : vector<1x16x768xbf16> to vector<1x16x64xbf16>
    %67 = vector.extract_strided_slice %42 {offsets = [0, 0, 576], sizes = [1, 16, 64], strides = [1, 1, 1]} : vector<1x16x768xbf16> to vector<1x16x64xbf16>
    "tpu.trace_start"() <{level = 10 : i32, message = "bqd,bkd->bqk"}> : () -> ()
    %cst_28 = arith.constant dense<0.000000e+00> : vector<1x16x16xf32>
    %68 = tpu.matmul %65, %66, %cst_28 {dimension_numbers = #tpu.dot_dimension_numbers<[2], [2], [1], [1], [0, 0, 0, 1, 1, 1], [0], [0]>} : vector<1x16x64xbf16>, vector<1x16x64xbf16>, vector<1x16x16xf32> -> vector<1x16x16xf32>
    "tpu.trace_stop"() : () -> ()
    %69 = vector.shape_cast %4 : vector<16x16xf32> to vector<1x16x16xf32>
    %70 = arith.addf %68, %69 : vector<1x16x16xf32>
    %cst_29 = arith.constant dense<0xFF800000> : vector<1x16xf32>
    %71 = vector.multi_reduction <maximumf>, %70, %cst_29 [2] : vector<1x16x16xf32> to vector<1x16xf32>
    %72 = vector.shape_cast %71 : vector<1x16xf32> to vector<1x16x1xf32>
    %73 = vector.broadcast %72 : vector<1x16x1xf32> to vector<1x16x16xf32>
    %74 = arith.subf %70, %73 : vector<1x16x16xf32>
    %75 = math.exp %74 : vector<1x16x16xf32>
    %cst_30 = arith.constant dense<0.000000e+00> : vector<1x16xf32>
    %76 = vector.multi_reduction <add>, %75, %cst_30 [2] : vector<1x16x16xf32> to vector<1x16xf32>
    %77 = vector.shape_cast %76 : vector<1x16xf32> to vector<1x16x1xf32>
    %78 = tpu.reciprocal %77 {approx = true} : vector<1x16x1xf32> -> vector<1x16x1xf32>
    %79 = vector.broadcast %78 : vector<1x16x1xf32> to vector<1x16x16xf32>
    %80 = arith.mulf %75, %79 : vector<1x16x16xf32>
    %81 = arith.truncf %80 : vector<1x16x16xf32> to vector<1x16x16xbf16>
    "tpu.trace_start"() <{level = 10 : i32, message = "bqk,bkd->bqd"}> : () -> ()
    %cst_31 = arith.constant dense<0.000000e+00> : vector<1x16x64xf32>
    %82 = tpu.matmul %81, %67, %cst_31 {dimension_numbers = #tpu.dot_dimension_numbers<[2], [1], [1], [2], [0, 0, 0, 1, 1, 2], [0], [0]>} : vector<1x16x16xbf16>, vector<1x16x64xbf16>, vector<1x16x64xf32> -> vector<1x16x64xf32>
    "tpu.trace_stop"() : () -> ()
    %83 = vector.extract_strided_slice %42 {offsets = [0, 0, 128], sizes = [1, 16, 64], strides = [1, 1, 1]} : vector<1x16x768xbf16> to vector<1x16x64xbf16>
    %cst_32 = arith.constant 1.250000e-01 : bf16
    %84 = vector.broadcast %cst_32 : bf16 to vector<1x16x64xbf16>
    %85 = arith.mulf %83, %84 : vector<1x16x64xbf16>
    %86 = vector.extract_strided_slice %42 {offsets = [0, 0, 384], sizes = [1, 16, 64], strides = [1, 1, 1]} : vector<1x16x768xbf16> to vector<1x16x64xbf16>
    %87 = vector.extract_strided_slice %42 {offsets = [0, 0, 640], sizes = [1, 16, 64], strides = [1, 1, 1]} : vector<1x16x768xbf16> to vector<1x16x64xbf16>
    "tpu.trace_start"() <{level = 10 : i32, message = "bqd,bkd->bqk"}> : () -> ()
    %cst_33 = arith.constant dense<0.000000e+00> : vector<1x16x16xf32>
    %88 = tpu.matmul %85, %86, %cst_33 {dimension_numbers = #tpu.dot_dimension_numbers<[2], [2], [1], [1], [0, 0, 0, 1, 1, 1], [0], [0]>} : vector<1x16x64xbf16>, vector<1x16x64xbf16>, vector<1x16x16xf32> -> vector<1x16x16xf32>
    "tpu.trace_stop"() : () -> ()
    %89 = vector.shape_cast %4 : vector<16x16xf32> to vector<1x16x16xf32>
    %90 = arith.addf %88, %89 : vector<1x16x16xf32>
    %cst_34 = arith.constant dense<0xFF800000> : vector<1x16xf32>
    %91 = vector.multi_reduction <maximumf>, %90, %cst_34 [2] : vector<1x16x16xf32> to vector<1x16xf32>
    %92 = vector.shape_cast %91 : vector<1x16xf32> to vector<1x16x1xf32>
    %93 = vector.broadcast %92 : vector<1x16x1xf32> to vector<1x16x16xf32>
    %94 = arith.subf %90, %93 : vector<1x16x16xf32>
    %95 = math.exp %94 : vector<1x16x16xf32>
    %cst_35 = arith.constant dense<0.000000e+00> : vector<1x16xf32>
    %96 = vector.multi_reduction <add>, %95, %cst_35 [2] : vector<1x16x16xf32> to vector<1x16xf32>
    %97 = vector.shape_cast %96 : vector<1x16xf32> to vector<1x16x1xf32>
    %98 = tpu.reciprocal %97 {approx = true} : vector<1x16x1xf32> -> vector<1x16x1xf32>
    %99 = vector.broadcast %98 : vector<1x16x1xf32> to vector<1x16x16xf32>
    %100 = arith.mulf %95, %99 : vector<1x16x16xf32>
    %101 = arith.truncf %100 : vector<1x16x16xf32> to vector<1x16x16xbf16>
    "tpu.trace_start"() <{level = 10 : i32, message = "bqk,bkd->bqd"}> : () -> ()
    %cst_36 = arith.constant dense<0.000000e+00> : vector<1x16x64xf32>
    %102 = tpu.matmul %101, %87, %cst_36 {dimension_numbers = #tpu.dot_dimension_numbers<[2], [1], [1], [2], [0, 0, 0, 1, 1, 2], [0], [0]>} : vector<1x16x16xbf16>, vector<1x16x64xbf16>, vector<1x16x64xf32> -> vector<1x16x64xf32>
    "tpu.trace_stop"() : () -> ()
    %103 = vector.extract_strided_slice %42 {offsets = [0, 0, 192], sizes = [1, 16, 64], strides = [1, 1, 1]} : vector<1x16x768xbf16> to vector<1x16x64xbf16>
    %cst_37 = arith.constant 1.250000e-01 : bf16
    %104 = vector.broadcast %cst_37 : bf16 to vector<1x16x64xbf16>
    %105 = arith.mulf %103, %104 : vector<1x16x64xbf16>
    %106 = vector.extract_strided_slice %42 {offsets = [0, 0, 448], sizes = [1, 16, 64], strides = [1, 1, 1]} : vector<1x16x768xbf16> to vector<1x16x64xbf16>
    %107 = vector.extract_strided_slice %42 {offsets = [0, 0, 704], sizes = [1, 16, 64], strides = [1, 1, 1]} : vector<1x16x768xbf16> to vector<1x16x64xbf16>
    "tpu.trace_start"() <{level = 10 : i32, message = "bqd,bkd->bqk"}> : () -> ()
    %cst_38 = arith.constant dense<0.000000e+00> : vector<1x16x16xf32>
    %108 = tpu.matmul %105, %106, %cst_38 {dimension_numbers = #tpu.dot_dimension_numbers<[2], [2], [1], [1], [0, 0, 0, 1, 1, 1], [0], [0]>} : vector<1x16x64xbf16>, vector<1x16x64xbf16>, vector<1x16x16xf32> -> vector<1x16x16xf32>
    "tpu.trace_stop"() : () -> ()
    %109 = vector.shape_cast %4 : vector<16x16xf32> to vector<1x16x16xf32>
    %110 = arith.addf %108, %109 : vector<1x16x16xf32>
    %cst_39 = arith.constant dense<0xFF800000> : vector<1x16xf32>
    %111 = vector.multi_reduction <maximumf>, %110, %cst_39 [2] : vector<1x16x16xf32> to vector<1x16xf32>
    %112 = vector.shape_cast %111 : vector<1x16xf32> to vector<1x16x1xf32>
    %113 = vector.broadcast %112 : vector<1x16x1xf32> to vector<1x16x16xf32>
    %114 = arith.subf %110, %113 : vector<1x16x16xf32>
    %115 = math.exp %114 : vector<1x16x16xf32>
    %cst_40 = arith.constant dense<0.000000e+00> : vector<1x16xf32>
    %116 = vector.multi_reduction <add>, %115, %cst_40 [2] : vector<1x16x16xf32> to vector<1x16xf32>
    %117 = vector.shape_cast %116 : vector<1x16xf32> to vector<1x16x1xf32>
    %118 = tpu.reciprocal %117 {approx = true} : vector<1x16x1xf32> -> vector<1x16x1xf32>
    %119 = vector.broadcast %118 : vector<1x16x1xf32> to vector<1x16x16xf32>
    %120 = arith.mulf %115, %119 : vector<1x16x16xf32>
    %121 = arith.truncf %120 : vector<1x16x16xf32> to vector<1x16x16xbf16>
    "tpu.trace_start"() <{level = 10 : i32, message = "bqk,bkd->bqd"}> : () -> ()
    %cst_41 = arith.constant dense<0.000000e+00> : vector<1x16x64xf32>
    %122 = tpu.matmul %121, %107, %cst_41 {dimension_numbers = #tpu.dot_dimension_numbers<[2], [1], [1], [2], [0, 0, 0, 1, 1, 2], [0], [0]>} : vector<1x16x16xbf16>, vector<1x16x64xbf16>, vector<1x16x64xf32> -> vector<1x16x64xf32>
    "tpu.trace_stop"() : () -> ()
    %123 = tpu.concatenate %62, %82, %102, %122 in 2 : vector<1x16x64xf32>, vector<1x16x64xf32>, vector<1x16x64xf32>, vector<1x16x64xf32> -> vector<1x16x256xf32>
    %124 = vector.shape_cast %123 : vector<1x16x256xf32> to vector<16x256xf32>
    %125 = arith.truncf %124 : vector<16x256xf32> to vector<16x256xbf16>
    %c0_42 = arith.constant 0 : index
    %c0_43 = arith.constant 0 : index
    %c0_44 = arith.constant 0 : index
    %126 = vector.load %arg6[%c0_42, %c0_43, %c0_44] : memref<1x256x256xbf16, #tpu.memory_space<vmem>>, vector<1x256x256xbf16>
    %127 = vector.shape_cast %126 : vector<1x256x256xbf16> to vector<256x256xbf16>
    %cst_45 = arith.constant dense<0.000000e+00> : vector<16x256xf32>
    %128 = tpu.matmul %125, %127, %cst_45 {dimension_numbers = #tpu.dot_dimension_numbers<[1], [0], [0], [1], [0, 0, 1, 1], [], []>} : vector<16x256xbf16>, vector<256x256xbf16>, vector<16x256xf32> -> vector<16x256xf32>
    %c0_46 = arith.constant 0 : index
    %c0_47 = arith.constant 0 : index
    %c0_48 = arith.constant 0 : index
    %129 = vector.load %arg7[%c0_46, %c0_47, %c0_48] : memref<1x1x256xf32, #tpu.memory_space<vmem>>, vector<1x1x256xf32>
    %130 = vector.shape_cast %129 : vector<1x1x256xf32> to vector<1x256xf32>
    %131 = vector.broadcast %130 : vector<1x256xf32> to vector<16x256xf32>
    %132 = arith.addf %128, %131 : vector<16x256xf32>
    %133 = arith.addf %3, %132 : vector<16x256xf32>
    %c0_49 = arith.constant 0 : index
    %c0_50 = arith.constant 0 : index
    %c0_51 = arith.constant 0 : index
    %134 = vector.load %arg10[%c0_49, %c0_50, %c0_51] : memref<1x1x256xf32, #tpu.memory_space<vmem>>, vector<1x1x256xf32>
    %135 = vector.shape_cast %134 : vector<1x1x256xf32> to vector<1x256xf32>
    %c0_52 = arith.constant 0 : index
    %c0_53 = arith.constant 0 : index
    %c0_54 = arith.constant 0 : index
    %136 = vector.load %arg11[%c0_52, %c0_53, %c0_54] : memref<1x1x256xf32, #tpu.memory_space<vmem>>, vector<1x1x256xf32>
    %137 = vector.shape_cast %136 : vector<1x1x256xf32> to vector<1x256xf32>
    %cst_55 = arith.constant dense<0.000000e+00> : vector<16xf32>
    %138 = vector.multi_reduction <add>, %133, %cst_55 [1] : vector<16x256xf32> to vector<16xf32>
    %139 = vector.shape_cast %138 : vector<16xf32> to vector<16x1xf32>
    %cst_56 = arith.constant 2.560000e+02 : f32
    %140 = vector.broadcast %cst_56 : f32 to vector<16x1xf32>
    %141 = arith.divf %139, %140 : vector<16x1xf32>
    %142 = arith.mulf %133, %133 : vector<16x256xf32>
    %cst_57 = arith.constant dense<0.000000e+00> : vector<16xf32>
    %143 = vector.multi_reduction <add>, %142, %cst_57 [1] : vector<16x256xf32> to vector<16xf32>
    %144 = vector.shape_cast %143 : vector<16xf32> to vector<16x1xf32>
    %cst_58 = arith.constant 2.560000e+02 : f32
    %145 = vector.broadcast %cst_58 : f32 to vector<16x1xf32>
    %146 = arith.divf %144, %145 : vector<16x1xf32>
    %147 = arith.mulf %141, %141 : vector<16x1xf32>
    %148 = arith.subf %146, %147 : vector<16x1xf32>
    %cst_59 = arith.constant 0.000000e+00 : f32
    %149 = vector.broadcast %cst_59 : f32 to vector<16x1xf32>
    %150 = arith.maximumf %148, %149 : vector<16x1xf32>
    %cst_60 = arith.constant 9.99999974E-6 : f32
    %151 = vector.broadcast %cst_60 : f32 to vector<16x1xf32>
    %152 = arith.addf %150, %151 : vector<16x1xf32>
    %153 = math.rsqrt %152 : vector<16x1xf32>
    %154 = vector.broadcast %141 : vector<16x1xf32> to vector<16x256xf32>
    %155 = arith.subf %133, %154 : vector<16x256xf32>
    %156 = vector.broadcast %153 : vector<16x1xf32> to vector<16x256xf32>
    %157 = arith.mulf %155, %156 : vector<16x256xf32>
    %158 = vector.broadcast %135 : vector<1x256xf32> to vector<16x256xf32>
    %159 = arith.mulf %157, %158 : vector<16x256xf32>
    %160 = vector.broadcast %137 : vector<1x256xf32> to vector<16x256xf32>
    %161 = arith.addf %159, %160 : vector<16x256xf32>
    %162 = arith.truncf %161 : vector<16x256xf32> to vector<16x256xbf16>
    %c0_61 = arith.constant 0 : index
    %c0_62 = arith.constant 0 : index
    %c0_63 = arith.constant 0 : index
    %163 = vector.load %arg12[%c0_61, %c0_62, %c0_63] : memref<1x256x1024xbf16, #tpu.memory_space<vmem>>, vector<1x256x1024xbf16>
    %164 = vector.shape_cast %163 : vector<1x256x1024xbf16> to vector<256x1024xbf16>
    %cst_64 = arith.constant dense<0.000000e+00> : vector<16x1024xf32>
    %165 = tpu.matmul %162, %164, %cst_64 {dimension_numbers = #tpu.dot_dimension_numbers<[1], [0], [0], [1], [0, 0, 1, 1], [], []>} : vector<16x256xbf16>, vector<256x1024xbf16>, vector<16x1024xf32> -> vector<16x1024xf32>
    %c0_65 = arith.constant 0 : index
    %c0_66 = arith.constant 0 : index
    %c0_67 = arith.constant 0 : index
    %166 = vector.load %arg13[%c0_65, %c0_66, %c0_67] : memref<1x1x1024xf32, #tpu.memory_space<vmem>>, vector<1x1x1024xf32>
    %167 = vector.shape_cast %166 : vector<1x1x1024xf32> to vector<1x1024xf32>
    %168 = vector.broadcast %167 : vector<1x1024xf32> to vector<16x1024xf32>
    %169 = arith.addf %165, %168 : vector<16x1024xf32>
    %cst_68 = arith.constant 5.000000e-01 : f32
    %170 = vector.broadcast %cst_68 : f32 to vector<16x1024xf32>
    %171 = arith.mulf %170, %169 : vector<16x1024xf32>
    %cst_69 = arith.constant 4.471500e-02 : f32
    %172 = vector.broadcast %cst_69 : f32 to vector<16x1024xf32>
    %173 = arith.mulf %172, %169 : vector<16x1024xf32>
    %174 = arith.mulf %173, %169 : vector<16x1024xf32>
    %175 = arith.mulf %174, %169 : vector<16x1024xf32>
    %176 = arith.addf %169, %175 : vector<16x1024xf32>
    %cst_70 = arith.constant 0.797884583 : f32
    %177 = vector.broadcast %cst_70 : f32 to vector<16x1024xf32>
    %178 = arith.mulf %177, %176 : vector<16x1024xf32>
    %179 = math.tanh %178 : vector<16x1024xf32>
    %cst_71 = arith.constant 1.000000e+00 : f32
    %180 = vector.broadcast %cst_71 : f32 to vector<16x1024xf32>
    %181 = arith.addf %180, %179 : vector<16x1024xf32>
    %182 = arith.mulf %171, %181 : vector<16x1024xf32>
    %183 = arith.truncf %182 : vector<16x1024xf32> to vector<16x1024xbf16>
    %c0_72 = arith.constant 0 : index
    %c0_73 = arith.constant 0 : index
    %c0_74 = arith.constant 0 : index
    %184 = vector.load %arg14[%c0_72, %c0_73, %c0_74] : memref<1x1024x256xbf16, #tpu.memory_space<vmem>>, vector<1x1024x256xbf16>
    %185 = vector.shape_cast %184 : vector<1x1024x256xbf16> to vector<1024x256xbf16>
    %cst_75 = arith.constant dense<0.000000e+00> : vector<16x256xf32>
    %186 = tpu.matmul %183, %185, %cst_75 {dimension_numbers = #tpu.dot_dimension_numbers<[1], [0], [0], [1], [0, 0, 1, 1], [], []>} : vector<16x1024xbf16>, vector<1024x256xbf16>, vector<16x256xf32> -> vector<16x256xf32>
    %c0_76 = arith.constant 0 : index
    %c0_77 = arith.constant 0 : index
    %c0_78 = arith.constant 0 : index
    %187 = vector.load %arg15[%c0_76, %c0_77, %c0_78] : memref<1x1x256xf32, #tpu.memory_space<vmem>>, vector<1x1x256xf32>
    %188 = vector.shape_cast %187 : vector<1x1x256xf32> to vector<1x256xf32>
    %189 = vector.broadcast %188 : vector<1x256xf32> to vector<16x256xf32>
    %190 = arith.addf %186, %189 : vector<16x256xf32>
    %191 = arith.addf %133, %190 : vector<16x256xf32>
    %c0_79 = arith.constant 0 : index
    %c0_80 = arith.constant 0 : index
    %192 = vector.load %arg26[%c0_79, %c0_80] : memref<16x256xf32, #tpu.memory_space<vmem>>, vector<16x256xf32>
    tpu.vector_store %arg26[%c0_79, %c0_80], %191 {strides = array<i32>} : memref<16x256xf32, #tpu.memory_space<vmem>>, vector<16x256xf32>,
    %c5_i32 = arith.constant 5 : i32
    %193 = arith.cmpi eq, %arg1, %c5_i32 : i32
    %194 = arith.extui %193 : i1 to i32
    %c0_i32_81 = arith.constant 0 : i32
    %195 = arith.cmpi ne, %194, %c0_i32_81 : i32
    scf.if %195 {
      %c0_82 = arith.constant 0 : index
      %c0_83 = arith.constant 0 : index
      %196 = vector.load %arg16[%c0_82, %c0_83] : memref<1x256xf32, #tpu.memory_space<vmem>>, vector<1x256xf32>
      %c0_84 = arith.constant 0 : index
      %c0_85 = arith.constant 0 : index
      %197 = vector.load %arg17[%c0_84, %c0_85] : memref<1x256xf32, #tpu.memory_space<vmem>>, vector<1x256xf32>
      %cst_86 = arith.constant dense<0.000000e+00> : vector<16xf32>
      %198 = vector.multi_reduction <add>, %191, %cst_86 [1] : vector<16x256xf32> to vector<16xf32>
      %199 = vector.shape_cast %198 : vector<16xf32> to vector<16x1xf32>
      %cst_87 = arith.constant 2.560000e+02 : f32
      %200 = vector.broadcast %cst_87 : f32 to vector<16x1xf32>
      %201 = arith.divf %199, %200 : vector<16x1xf32>
      %202 = arith.mulf %191, %191 : vector<16x256xf32>
      %cst_88 = arith.constant dense<0.000000e+00> : vector<16xf32>
      %203 = vector.multi_reduction <add>, %202, %cst_88 [1] : vector<16x256xf32> to vector<16xf32>
      %204 = vector.shape_cast %203 : vector<16xf32> to vector<16x1xf32>
      %cst_89 = arith.constant 2.560000e+02 : f32
      %205 = vector.broadcast %cst_89 : f32 to vector<16x1xf32>
      %206 = arith.divf %204, %205 : vector<16x1xf32>
      %207 = arith.mulf %201, %201 : vector<16x1xf32>
      %208 = arith.subf %206, %207 : vector<16x1xf32>
      %cst_90 = arith.constant 0.000000e+00 : f32
      %209 = vector.broadcast %cst_90 : f32 to vector<16x1xf32>
      %210 = arith.maximumf %208, %209 : vector<16x1xf32>
      %cst_91 = arith.constant 9.99999974E-6 : f32
      %211 = vector.broadcast %cst_91 : f32 to vector<16x1xf32>
      %212 = arith.addf %210, %211 : vector<16x1xf32>
      %213 = math.rsqrt %212 : vector<16x1xf32>
      %214 = vector.broadcast %201 : vector<16x1xf32> to vector<16x256xf32>
      %215 = arith.subf %191, %214 : vector<16x256xf32>
      %216 = vector.broadcast %213 : vector<16x1xf32> to vector<16x256xf32>
      %217 = arith.mulf %215, %216 : vector<16x256xf32>
      %218 = vector.broadcast %196 : vector<1x256xf32> to vector<16x256xf32>
      %219 = arith.mulf %217, %218 : vector<16x256xf32>
      %220 = vector.broadcast %197 : vector<1x256xf32> to vector<16x256xf32>
      %221 = arith.addf %219, %220 : vector<16x256xf32>
      %222 = arith.truncf %221 : vector<16x256xf32> to vector<16x256xbf16>
      %c0_92 = arith.constant 0 : index
      %c0_93 = arith.constant 0 : index
      %223 = vector.load %arg18[%c0_92, %c0_93] : memref<256x512xbf16, #tpu.memory_space<vmem>>, vector<256x512xbf16>
      %cst_94 = arith.constant dense<0.000000e+00> : vector<16x512xf32>
      %224 = tpu.matmul %222, %223, %cst_94 {dimension_numbers = #tpu.dot_dimension_numbers<[1], [0], [0], [1], [0, 0, 1, 1], [], []>} : vector<16x256xbf16>, vector<256x512xbf16>, vector<16x512xf32> -> vector<16x512xf32>
      %c0_95 = arith.constant 0 : index
      %c0_96 = arith.constant 0 : index
      %225 = vector.load %arg19[%c0_95, %c0_96] : memref<1x512xf32, #tpu.memory_space<vmem>>, vector<1x512xf32>
      %226 = vector.broadcast %225 : vector<1x512xf32> to vector<16x512xf32>
      %227 = arith.addf %224, %226 : vector<16x512xf32>
      %228 = vector.shape_cast %227 : vector<16x512xf32> to vector<1x16x512xf32>
      %229 = arith.truncf %228 : vector<1x16x512xf32> to vector<1x16x512xbf16>
      %c0_97 = arith.constant 0 : index
      %c0_98 = arith.constant 0 : index
      %c0_99 = arith.constant 0 : index
      %230 = vector.load %arg24[%c0_97, %c0_98, %c0_99] : memref<1x16x512xbf16, #tpu.memory_space<vmem>>, vector<1x16x512xbf16>
      tpu.vector_store %arg24[%c0_97, %c0_98, %c0_99], %229 {strides = array<i32>} : memref<1x16x512xbf16, #tpu.memory_space<vmem>>, vector<1x16x512xbf16>,
      %c0_100 = arith.constant 0 : index
      %c0_101 = arith.constant 0 : index
      %231 = vector.load %arg20[%c0_100, %c0_101] : memref<1x256xf32, #tpu.memory_space<vmem>>, vector<1x256xf32>
      %c0_102 = arith.constant 0 : index
      %c0_103 = arith.constant 0 : index
      %232 = vector.load %arg21[%c0_102, %c0_103] : memref<1x256xf32, #tpu.memory_space<vmem>>, vector<1x256xf32>
      %cst_104 = arith.constant dense<0.000000e+00> : vector<16xf32>
      %233 = vector.multi_reduction <add>, %191, %cst_104 [1] : vector<16x256xf32> to vector<16xf32>
      %234 = vector.shape_cast %233 : vector<16xf32> to vector<16x1xf32>
      %cst_105 = arith.constant 2.560000e+02 : f32
      %235 = vector.broadcast %cst_105 : f32 to vector<16x1xf32>
      %236 = arith.divf %234, %235 : vector<16x1xf32>
      %237 = arith.mulf %191, %191 : vector<16x256xf32>
      %cst_106 = arith.constant dense<0.000000e+00> : vector<16xf32>
      %238 = vector.multi_reduction <add>, %237, %cst_106 [1] : vector<16x256xf32> to vector<16xf32>
      %239 = vector.shape_cast %238 : vector<16xf32> to vector<16x1xf32>
      %cst_107 = arith.constant 2.560000e+02 : f32
      %240 = vector.broadcast %cst_107 : f32 to vector<16x1xf32>
      %241 = arith.divf %239, %240 : vector<16x1xf32>
      %242 = arith.mulf %236, %236 : vector<16x1xf32>
      %243 = arith.subf %241, %242 : vector<16x1xf32>
      %cst_108 = arith.constant 0.000000e+00 : f32
      %244 = vector.broadcast %cst_108 : f32 to vector<16x1xf32>
      %245 = arith.maximumf %243, %244 : vector<16x1xf32>
      %cst_109 = arith.constant 9.99999974E-6 : f32
      %246 = vector.broadcast %cst_109 : f32 to vector<16x1xf32>
      %247 = arith.addf %245, %246 : vector<16x1xf32>
      %248 = math.rsqrt %247 : vector<16x1xf32>
      %249 = vector.broadcast %236 : vector<16x1xf32> to vector<16x256xf32>
      %250 = arith.subf %191, %249 : vector<16x256xf32>
      %251 = vector.broadcast %248 : vector<16x1xf32> to vector<16x256xf32>
      %252 = arith.mulf %250, %251 : vector<16x256xf32>
      %253 = vector.broadcast %231 : vector<1x256xf32> to vector<16x256xf32>
      %254 = arith.mulf %252, %253 : vector<16x256xf32>
      %255 = vector.broadcast %232 : vector<1x256xf32> to vector<16x256xf32>
      %256 = arith.addf %254, %255 : vector<16x256xf32>
      %257 = vector.shape_cast %256 : vector<16x256xf32> to vector<1x16x256xf32>
      %c0_110 = arith.constant 0 : index
      %c0_111 = arith.constant 0 : index
      %258 = vector.load %arg22[%c0_110, %c0_111] : memref<1x256xf32, #tpu.memory_space<vmem>>, vector<1x256xf32>
      %259 = vector.shape_cast %258 : vector<1x256xf32> to vector<1x1x256xf32>
      %260 = vector.broadcast %259 : vector<1x1x256xf32> to vector<1x16x256xf32>
      %261 = arith.mulf %257, %260 : vector<1x16x256xf32>
      %cst_112 = arith.constant dense<0.000000e+00> : vector<1x16xf32>
      %262 = vector.multi_reduction <add>, %261, %cst_112 [2] : vector<1x16x256xf32> to vector<1x16xf32>
      %c0_113 = arith.constant 0 : index
      %c0_114 = arith.constant 0 : index
      %263 = vector.load %arg23[%c0_113, %c0_114] : memref<1x1xf32, #tpu.memory_space<vmem>>, vector<1x1xf32>
      %264 = vector.broadcast %263 : vector<1x1xf32> to vector<1x16xf32>
      %265 = arith.addf %262, %264 : vector<1x16xf32>
      %266 = vector.shape_cast %265 : vector<1x16xf32> to vector<1x1x16xf32>
      %c0_115 = arith.constant 0 : index
      %c0_116 = arith.constant 0 : index
      %c0_117 = arith.constant 0 : index
      %267 = vector.load %arg25[%c0_115, %c0_116, %c0_117] : memref<1x1x16xf32, #tpu.memory_space<vmem>>, vector<1x1x16xf32>
      tpu.vector_store %arg25[%c0_115, %c0_116, %c0_117], %266 {strides = array<i32>} : memref<1x1x16xf32, #tpu.memory_space<vmem>>, vector<1x1x16xf32>,
    } else {
    }
    return
  }
  func.func @transform_0(%arg0: i32, %arg1: i32) -> (i32, i32, i32) {
    %c0_i32 = arith.constant 0 : i32
    %c0_i32_0 = arith.constant 0 : i32
    %c0_i32_1 = arith.constant 0 : i32
    return %arg0, %c0_i32, %c0_i32_0 : i32, i32, i32
  }
  func.func @transform_1(%arg0: i32, %arg1: i32) -> (i32, i32) {
    %c0_i32 = arith.constant 0 : i32
    %c0_i32_0 = arith.constant 0 : i32
    %c0_i32_1 = arith.constant 0 : i32
    return %c0_i32, %c0_i32_0 : i32, i32
  }
  func.func @transform_2(%arg0: i32, %arg1: i32) -> (i32, i32, i32) {
    %c0_i32 = arith.constant 0 : i32
    %c0_i32_0 = arith.constant 0 : i32
    %c0_i32_1 = arith.constant 0 : i32
    return %arg1, %c0_i32, %c0_i32_0 : i32, i32, i32
  }
  func.func @transform_3(%arg0: i32, %arg1: i32) -> (i32, i32, i32) {
    %c0_i32 = arith.constant 0 : i32
    %c0_i32_0 = arith.constant 0 : i32
    %c0_i32_1 = arith.constant 0 : i32
    return %arg1, %c0_i32, %c0_i32_0 : i32, i32, i32
  }
  func.func @transform_4(%arg0: i32, %arg1: i32) -> (i32, i32, i32) {
    %c0_i32 = arith.constant 0 : i32
    %c0_i32_0 = arith.constant 0 : i32
    %c0_i32_1 = arith.constant 0 : i32
    return %arg1, %c0_i32, %c0_i32_0 : i32, i32, i32
  }
  func.func @transform_5(%arg0: i32, %arg1: i32) -> (i32, i32, i32) {
    %c0_i32 = arith.constant 0 : i32
    %c0_i32_0 = arith.constant 0 : i32
    %c0_i32_1 = arith.constant 0 : i32
    return %arg1, %c0_i32, %c0_i32_0 : i32, i32, i32
  }
  func.func @transform_6(%arg0: i32, %arg1: i32) -> (i32, i32, i32) {
    %c0_i32 = arith.constant 0 : i32
    %c0_i32_0 = arith.constant 0 : i32
    %c0_i32_1 = arith.constant 0 : i32
    return %arg1, %c0_i32, %c0_i32_0 : i32, i32, i32
  }
  func.func @transform_7(%arg0: i32, %arg1: i32) -> (i32, i32, i32) {
    %c0_i32 = arith.constant 0 : i32
    %c0_i32_0 = arith.constant 0 : i32
    %c0_i32_1 = arith.constant 0 : i32
    return %arg1, %c0_i32, %c0_i32_0 : i32, i32, i32
  }
  func.func @transform_8(%arg0: i32, %arg1: i32) -> (i32, i32, i32) {
    %c0_i32 = arith.constant 0 : i32
    %c0_i32_0 = arith.constant 0 : i32
    %c0_i32_1 = arith.constant 0 : i32
    return %arg1, %c0_i32, %c0_i32_0 : i32, i32, i32
  }
  func.func @transform_9(%arg0: i32, %arg1: i32) -> (i32, i32, i32) {
    %c0_i32 = arith.constant 0 : i32
    %c0_i32_0 = arith.constant 0 : i32
    %c0_i32_1 = arith.constant 0 : i32
    return %arg1, %c0_i32, %c0_i32_0 : i32, i32, i32
  }
  func.func @transform_10(%arg0: i32, %arg1: i32) -> (i32, i32, i32) {
    %c0_i32 = arith.constant 0 : i32
    %c0_i32_0 = arith.constant 0 : i32
    %c0_i32_1 = arith.constant 0 : i32
    return %arg1, %c0_i32, %c0_i32_0 : i32, i32, i32
  }
  func.func @transform_11(%arg0: i32, %arg1: i32) -> (i32, i32, i32) {
    %c0_i32 = arith.constant 0 : i32
    %c0_i32_0 = arith.constant 0 : i32
    %c0_i32_1 = arith.constant 0 : i32
    return %arg1, %c0_i32, %c0_i32_0 : i32, i32, i32
  }
  func.func @transform_12(%arg0: i32, %arg1: i32) -> (i32, i32, i32) {
    %c0_i32 = arith.constant 0 : i32
    %c0_i32_0 = arith.constant 0 : i32
    %c0_i32_1 = arith.constant 0 : i32
    return %arg1, %c0_i32, %c0_i32_0 : i32, i32, i32
  }
  func.func @transform_13(%arg0: i32, %arg1: i32) -> (i32, i32, i32) {
    %c0_i32 = arith.constant 0 : i32
    %c0_i32_0 = arith.constant 0 : i32
    %c0_i32_1 = arith.constant 0 : i32
    return %arg1, %c0_i32, %c0_i32_0 : i32, i32, i32
  }
  func.func @transform_14(%arg0: i32, %arg1: i32) -> (i32, i32) {
    %c0_i32 = arith.constant 0 : i32
    %c0_i32_0 = arith.constant 0 : i32
    %c0_i32_1 = arith.constant 0 : i32
    return %c0_i32, %c0_i32_0 : i32, i32
  }
  func.func @transform_15(%arg0: i32, %arg1: i32) -> (i32, i32) {
    %c0_i32 = arith.constant 0 : i32
    %c0_i32_0 = arith.constant 0 : i32
    %c0_i32_1 = arith.constant 0 : i32
    return %c0_i32, %c0_i32_0 : i32, i32
  }
  func.func @transform_16(%arg0: i32, %arg1: i32) -> (i32, i32) {
    %c0_i32 = arith.constant 0 : i32
    %c0_i32_0 = arith.constant 0 : i32
    %c0_i32_1 = arith.constant 0 : i32
    return %c0_i32, %c0_i32_0 : i32, i32
  }
  func.func @transform_17(%arg0: i32, %arg1: i32) -> (i32, i32) {
    %c0_i32 = arith.constant 0 : i32
    %c0_i32_0 = arith.constant 0 : i32
    %c0_i32_1 = arith.constant 0 : i32
    return %c0_i32, %c0_i32_0 : i32, i32
  }
  func.func @transform_18(%arg0: i32, %arg1: i32) -> (i32, i32) {
    %c0_i32 = arith.constant 0 : i32
    %c0_i32_0 = arith.constant 0 : i32
    %c0_i32_1 = arith.constant 0 : i32
    return %c0_i32, %c0_i32_0 : i32, i32
  }
  func.func @transform_19(%arg0: i32, %arg1: i32) -> (i32, i32) {
    %c0_i32 = arith.constant 0 : i32
    %c0_i32_0 = arith.constant 0 : i32
    %c0_i32_1 = arith.constant 0 : i32
    return %c0_i32, %c0_i32_0 : i32, i32
  }
  func.func @transform_20(%arg0: i32, %arg1: i32) -> (i32, i32) {
    %c0_i32 = arith.constant 0 : i32
    %c0_i32_0 = arith.constant 0 : i32
    %c0_i32_1 = arith.constant 0 : i32
    return %c0_i32, %c0_i32_0 : i32, i32
  }
  func.func @transform_21(%arg0: i32, %arg1: i32) -> (i32, i32) {
    %c0_i32 = arith.constant 0 : i32
    %c0_i32_0 = arith.constant 0 : i32
    %c0_i32_1 = arith.constant 0 : i32
    return %c0_i32, %c0_i32_0 : i32, i32
  }
  func.func @transform_22(%arg0: i32, %arg1: i32) -> (i32, i32, i32) {
    %c0_i32 = arith.constant 0 : i32
    %c0_i32_0 = arith.constant 0 : i32
    %c0_i32_1 = arith.constant 0 : i32
    return %arg0, %c0_i32, %c0_i32_0 : i32, i32, i32
  }
  func.func @transform_23(%arg0: i32, %arg1: i32) -> (i32, i32, i32) {
    %c0_i32 = arith.constant 0 : i32
    %c0_i32_0 = arith.constant 0 : i32
    %c0_i32_1 = arith.constant 0 : i32
    return %arg0, %c0_i32, %c0_i32_0 : i32, i32, i32
  }
}

</mosaic_0001>

<bundles_post_ra>
// kernel: mini_world_model_forward.1
= control target key start
LH: loop header
LB: loop body
LE: loop exit
PB: predicated region body
PF: predicated region fallthrough
CT: control target
= control target key end

     0   :  { %s9558_s0 = inlined_call_operand.vmem [shape: f32[2,16,256], index: 0, kind: input, shape index: {}]   ;;  %s9559_s1 = inlined_call_operand.vmem [shape: f32[16,16], index: 1, kind: input, shape index: {}]   ;;  %s9560_s2 = inlined_call_operand.hbm [shape: bf16[6,256,768], index: 2, kind: input, shape index: {}]   ;;  %s9561_s3 = inlined_call_operand.hbm [shape: f32[6,1,768], index: 3, kind: input, shape index: {}]   ;;  %s9562_s4 = inlined_call_operand.hbm [shape: bf16[6,256,256], index: 4, kind: input, shape index: {}]   ;;  %s9563_s5 = inlined_call_operand.hbm [shape: f32[6,1,256], index: 5, kind: input, shape index: {}]   ;;  %s9564_s6 = inlined_call_operand.hbm [shape: f32[6,1,256], index: 6, kind: input, shape index: {}]   ;;  %s9565_s7 = inlined_call_operand.hbm [shape: f32[6,1,256], index: 7, kind: input, shape index: {}]   ;;  %s9566_s8 = inlined_call_operand.hbm [shape: f32[6,1,256], index: 8, kind: input, shape index: {}]   ;;  %s9567_s9 = inlined_call_operand.hbm [shape: f32[6,1,256], index: 9, kind: input, shape index: {}]   ;;  %s9568_s10 = inlined_call_operand.hbm [shape: bf16[6,256,1024], index: 10, kind: input, shape index: {}]   ;;  %s9569_s11 = inlined_call_operand.hbm [shape: f32[6,1,1024], index: 11, kind: input, shape index: {}]   ;;  %s9570_s12 = inlined_call_operand.hbm [shape: bf16[6,1024,256], index: 12, kind: input, shape index: {}]   ;;  %s9571_s13 = inlined_call_operand.hbm [shape: f32[6,1,256], index: 13, kind: input, shape index: {}]   ;;  %s9572_s14 = inlined_call_operand.hbm [shape: f32[1,256], index: 14, kind: input, shape index: {}]   ;;  %s9573_s15 = inlined_call_operand.hbm [shape: f32[1,256], index: 15, kind: input, shape index: {}]   ;;  %s9574_s16 = inlined_call_operand.hbm [shape: bf16[256,512], index: 16, kind: input, shape index: {}]   ;;  %s9575_s17 = inlined_call_operand.hbm [shape: f32[1,512], index: 17, kind: input, shape index: {}]   ;;  %s9576_s18 = inlined_call_operand.hbm [shape: f32[1,256], index: 18, kind: input, shape index: {}]   ;;  %s9577_s19 = inlined_call_operand.hbm [shape: f32[1,256], index: 19, kind: input, shape index: {}]   ;;  %s9578_s20 = inlined_call_operand.hbm [shape: f32[1,256], index: 20, kind: input, shape index: {}]   ;;  %s9579_s21 = inlined_call_operand.<no memory space> [shape: f32[1,1], index: 21, kind: input, shape index: {}]   ;;  %s9580_s22 = inlined_call_operand.vmem [shape: bf16[2,16,512], index: 22, kind: output, shape index: {0}]   ;;  %s9581_s23 = inlined_call_operand.vmem [shape: f32[2,1,16], index: 23, kind: output, shape index: {1}]  }
   0x1   :  { %9610 = sst [smem:[#allocation56_spill]] %s9558_s0  ;;  %v29_v0 = vstv %s9579_s21 }
   0x2   :  { %9611 = sst [smem:[#allocation57_spill]] %s9559_s1  ;;  %30 = vst [vmem:[#allocation3] sm:$0x1] %v29_v0 }
   0x3   :  { %9612 = sst [smem:[#allocation58_spill]] %s9560_s2 }
   0x4   :  { %9613 = sst [smem:[#allocation59_spill]] %s9561_s3 }
   0x5   :  { %9614 = sst [smem:[#allocation60_spill]] %s9562_s4 }
   0x6   :  { %9615 = sst [smem:[#allocation61_spill]] %s9563_s5 }
   0x7   :  { %9616 = sst [smem:[#allocation62_spill]] %s9564_s6 }
   0x8   :  { %9617 = sst [smem:[#allocation63_spill]] %s9565_s7 }
   0x9   :  { %9618 = sst [smem:[#allocation64_spill]] %s9567_s9 }
   0xa   :  { %9619 = sst [smem:[#allocation65_spill]] %s9570_s12 }
   0xb   :  { %9620 = sst [smem:[#allocation66_spill]] %s9571_s13 }
   0xc   :  { %9621 = sst [smem:[#allocation67_spill]] %s9572_s14 }
   0xd   :  { %9622 = sst [smem:[#allocation68_spill]] %s9573_s15 }
   0xe   :  { %9623 = sst [smem:[#allocation69_spill]] %s9575_s17 }
   0xf   :  { %9624 = sst [smem:[#allocation70_spill]] %s9577_s19 }
  0x10   :  { %9625 = sst [smem:[#allocation71_spill]] %s9580_s22 }
  0x11   :  { %9626 = sst [smem:[#allocation72_spill]] %s9581_s23 }
  0x12   :  { %31 = vsyncpa [#allocation5], 0 }
  0x13   :  { %33 = vsyncpa [#allocation5 + $0x1], 0 }
  0x14   :  { %34 = vsyncpa [#allocation7], 0 }
  0x15   :  { %36 = vsyncpa [#allocation7 + $0x1], 0 }
  0x16   :  { %37 = vsyncpa [#allocation10], 0 }
  0x17   :  { %39 = vsyncpa [#allocation10 + $0x1], 0 }
  0x18   :  { %40 = vsyncpa [#allocation13], 0 }
  0x19   :  { %42 = vsyncpa [#allocation13 + $0x1], 0 }
  0x1a   :  { %43 = vsyncpa [#allocation16], 0 }
  0x1b   :  { %45 = vsyncpa [#allocation16 + $0x1], 0 }
  0x1c   :  { %46 = vsyncpa [#allocation19], 0 }
  0x1d   :  { %48 = vsyncpa [#allocation19 + $0x1], 0 }
  0x1e   :  { %49 = vsyncpa [#allocation22], 0 }
  0x1f   :  { %51 = vsyncpa [#allocation22 + $0x1], 0 }
  0x20   :  { %52 = vsyncpa [#allocation25], 0 }
  0x21   :  { %53 = vsyncpa [#allocation28], 0 }
  0x22   :  { %54 = vsyncpa [#allocation31], 0  ;;  %s8301_s24 = smov 0   ;;  %s8303_s21 = smov 0  }
  0x23   :  { %s8305_s25 = smov 0   ;;  %s8307_s5 = smov 0  }
  0x24   :  { %s8309_s1 = smov 0   ;;  %s8311_s26 = smov 0  }
  0x25   :  { %s8313_s2 = smov 0   ;;  %s8315_s6 = smov 0  }
  0x26 LB: > { %9627 = sst [smem:[#allocation44_spill]] %s8121_s21  ;;  %s9583_s27 = sadd.s32 4294967295, %s8145_s6   ;;  %s8145_s6 = sphi %s8315_s6, %s60_s6   ;;  %s8141_s2 = sphi %s8313_s2, %s9695_s2   ;;  %s8137_s26 = sphi %s8311_s26, %s9697_s26   ;;  %s8133_s1 = sphi %s8309_s1, %s9693_s1   ;;  %s8129_s5 = sphi %s8307_s5, %s9696_s5   ;;  %s8125_s25 = sphi %s8305_s25, %s9692_s25   ;;  %s8121_s21 = sphi %s8303_s21, %s9691_s21   ;;  %s8117_s24 = sphi %s8301_s24, %s9690_s24  }
  0x27   : > { %9628 = sst [smem:[#allocation45_spill]] %s8125_s25  ;;  %p6128_p0 = scmp.ge.s32.totalorder %s8145_s6, 1 }
  0x28   : > { %9629 = sst [smem:[#allocation46_spill]] %s8129_s5  ;;  %p8345_p1 = scmp.eq.s32.totalorder %s9583_s27, 0 }
  0x29   : > { %9630 = sst [smem:[#allocation47_spill]] %s8133_s1  ;;  %p656_p2 = scmp.lt.s32.totalorder %s8145_s6, 13 }
  0x2a   : > { %9631 = sst [smem:[#allocation48_spill]] %s8141_s2  ;;  %s8147_s29 = smov [#allocation23]  }
  0x2b   : > { %9632 = sst [smem:[#allocation49_spill]] %s8145_s6  ;;  %p8350_p3 = pnand %p6128_p0, %p656_p2 }
  0x2c   : > { %s9633_s7 = scalar_select %p8345_p1, 1, 0 }
  0x2d   : > { %s9635_s28 = scalar_select %p8350_p3, 1, 0 }
  0x2e   : > { %9634 = sst [smem:[#allocation50_spill]] %s9633_s7  ;;  %s672_s3 = sshll.u32 %s8147_s29, 4  ;;  %s673_s3 = int_to_ptr.vmem [resolvable:$true] %s672_s3 }
  0x2f   : > { %9636 = sst [smem:[#allocation51_spill]] %s9635_s28  ;;  %p6793_p4 = pneg %p8350_p3 }
  0x30   : > { %s8148_s0 = smov [#allocation24]   ;;  %s8149_s27 = smov [#allocation27]  }
  0x31   : > { %s683_s4 = sshll.u32 %s8148_s0, 4  ;;  %p8358_p5 = pnand %p6793_p4, %p8345_p1  ;;  %s684_s4 = int_to_ptr.vmem [resolvable:$true] %s683_s4 }
  0x32   : > { %s707_s5 = sshll.u32 %s8149_s27, 4  ;;  %s7532_s29 = scalar_lea.vmem %s673_s3, 32  ;;  %s8362_s5 = int_to_ptr.vmem [resolvable:$true] %s707_s5 }
  0x33   : > { %s9637_s30 = scalar_select %p8358_p5, 1, 0 }
  0x34   : > { %p8366_p6 = pneg %p8358_p5  ;;  %p7533_p7 = scmp.ne.s32.totalorder %s673_s3, %s7532_s29 }
  0x35   : > { %p7540_p10 = scmp.lt.s32.totalorder %s673_s3, %s673_s3  ;;  %p7541_p11 = scmp.lt.s32.totalorder %s7532_s29, %s7532_s29 }
  0x36   : > { %p7535_p8 = pnand %p7533_p7, %p8366_p6 }
  0x37   : > { %p7542_p12 = por %p7541_p11, %p7540_p10 }
  0x38   : > { %p7536_p9 = pneg %p7535_p8 }
  0x3a   : > { %p7543_p13 = pnand %p7542_p12, %p7536_p9 }
  0x3c   : > { %7546 = shalt.err (!%p7543_p13)
}
  0x3d   : > { %s9639_s14 = sld [smem:[#allocation67_spill]]  ;;  %s7558_s23 = scalar_lea.vmem %s684_s4, 32 }
  0x3e   : > { %p7559_p0 = scmp.ne.s32.totalorder %s684_s4, %s7558_s23  ;;  %p7566_p3 = scmp.lt.s32.totalorder %s684_s4, %s684_s4 }
  0x3f   : > { %p7567_p7 = scmp.lt.s32.totalorder %s7558_s23, %s7558_s23 }
  0x40   : > { %p7561_p2 = pnand %p7559_p0, %p8366_p6 }
  0x41   : > { %p7568_p8 = por %p7567_p7, %p7566_p3 }
  0x42   : > { %p7562_p4 = pneg %p7561_p2 }
  0x43   : > { %6796 = dma.hbm_to_vmem [thread:$0]  (!%p8358_p5), %s9639_s14, 32, %s673_s3, [#allocation22]  }
  0x44   : > { %p7569_p1 = pnand %p7568_p8, %p7562_p4 }
  0x46   : > { %7572 = shalt.err (!%p7569_p1)
}
  0x47   : > { %s9640_s15 = sld [smem:[#allocation68_spill]]  ;;  %s7584_s3 = scalar_lea.vmem %s8362_s5, 64 }
  0x48   : > { %p7585_p9 = scmp.ne.s32.totalorder %s8362_s5, %s7584_s3  ;;  %p7592_p12 = scmp.lt.s32.totalorder %s8362_s5, %s8362_s5 }
  0x49   : > { %p7593_p3 = scmp.lt.s32.totalorder %s7584_s3, %s7584_s3 }
  0x4a   : > { %p7587_p10 = pnand %p7585_p9, %p8366_p6 }
  0x4b   : > { %p7594_p13 = por %p7593_p3, %p7592_p12 }
  0x4c   : > { %p7588_p11 = pneg %p7587_p10 }
  0x4d   : > { %6799 = dma.hbm_to_vmem [thread:$0]  (!%p8358_p5), %s9640_s15, 32, %s684_s4, [#allocation25]  }
  0x4e   : > { %p7595_p1 = pnand %p7594_p13, %p7588_p11 }
  0x50   : > { %7598 = shalt.err (!%p7595_p1)
}
  0x51   : > { %s9641_s17 = sld [smem:[#allocation69_spill]]  ;;  %s8150_s4 = smov [#allocation30]  }
  0x52   : > { %s729_s27 = sshll.u32 %s8150_s4, 4  ;;  %s730_s27 = int_to_ptr.vmem [resolvable:$true] %s729_s27 }
  0x53   : > { %s7610_s0 = scalar_lea.vmem %s730_s27, 32  ;;  %p7618_p7 = scmp.lt.s32.totalorder %s730_s27, %s730_s27 }
  0x54   : > { %p7611_p0 = scmp.ne.s32.totalorder %s730_s27, %s7610_s0  ;;  %p7619_p8 = scmp.lt.s32.totalorder %s7610_s0, %s7610_s0 }
  0x56   : > { %p7613_p2 = pnand %p7611_p0, %p8366_p6  ;;  %p7620_p9 = por %p7619_p8, %p7618_p7 }
  0x57   : > { %6805 = dma.hbm_to_vmem [thread:$0]  (!%p8358_p5), %s9641_s17, 64, %s8362_s5, [#allocation28]  }
  0x58   : > { %p7614_p4 = pneg %p7613_p2 }
  0x5a   : > { %p7621_p10 = pnand %p7620_p9, %p7614_p4 }
  0x5c   : > { %7624 = shalt.err (!%p7621_p10)
}
  0x5d   : > { %s9642_s19 = sld [smem:[#allocation70_spill]]  ;;  %s69_s5 = sadd.s32 1, %s8137_s26 }
  0x5e   : > { %s72_s23 = sadd.s32 1, %s8141_s2  ;;  %p70_p11 = scmp.ge.s32.totalorder %s69_s5, 6 }
  0x5f   : > { %s126_s1 = sadd.s32 1, %s8125_s25  ;;  %p133_p12 = scmp.ne.s32.totalorder %s8125_s25, %s8121_s21 }
  0x60   : > { %p134_p3 = scmp.eq.s32.totalorder %s8145_s6, 0  ;;  %s9699_s5 = smov (%p70_p11, %s69_s5), 0 }
  0x61   : > { %9643 = sst [smem:[#allocation52_spill]] %s9699_s5  ;;  %s9701_s23 = smov (!%p70_p11, %s72_s23), %s8141_s2 }
  0x62   : > { %s123_s4 = ssub.s32 %s8137_s26, %s9699_s5  ;;  %p135_p13 = por %p134_p3, %p133_p12 }
  0x63   : > { %6811 = dma.hbm_to_vmem [thread:$0]  (!%p8358_p5), %s9642_s19, 32, %s730_s27, [#allocation31]  }
  0x64   : > { %p74_p1 = scmp.ge.s32.totalorder %s9701_s23, 2  ;;  %p124_p0 = scmp.eq.s32.totalorder %s123_s4, 0 }
  0x65   : > { %p139_p2 = scmp.ne.s32.totalorder %s8121_s21, %s8117_s24  ;;  %p6859_p4 = scmp.lt.s32.totalorder %s8145_s6, 12 }
  0x66   : > { %s9703_s23 = smov (%p74_p1, %s9701_s23), 0  ;;  %p9646_p7 = scmp.ne.s32.totalorder %s9633_s7, 0 }
  0x67   : > { %9644 = sst [smem:[#allocation53_spill]] %s9703_s23  ;;  %s8429_s29 = sand.u32 1, %s8125_s25  }
  0x68   : > { %s8420_s27 = scalar_select %p124_p0, %s8125_s25, %s126_s1  }
  0x69   : > { %p8424_p8 = por %p9646_p7, %p139_p2  ;;  %p8431_p9 = pnand %p6859_p4, %p135_p13 }
  0x6a   : > { %9645 = sst [smem:[#allocation54_spill]] %s8420_s27  ;;  %s8436_s24 = sand.u32 1, %s8145_s6  }
  0x6b   : > { %s9647_s0 = scalar_select %p8424_p8, 1, 0 }
  0x6c   : > { %s9649_s3 = scalar_select %p8431_p9, 1, 0 }
  0x6d   : > { %9648 = sst [smem:[#allocation55_spill]] %s9647_s0  ;;  %s6737_s4 = smul.u32 6, %s8429_s29 }
  0x6e   : > { %s6738_s1 = smul.u32 96, %s8137_s26  ;;  %s9650_s17 = sld [smem:[#allocation59_spill]] }
  0x6f   : > { %s787_s23 = scalar_lea.vmem [#allocation6], %s6737_s4  ;;  %s8444_s2 = sshll.u32 %s8429_s29, 1 }
  0x70   : > { %s795_s5 = sshll.u32 %s787_s23, 4  ;;  %s9598_s27 = scalar_lea.sflag [#allocation7], %s8436_s24  ;;  %s796_s5 = int_to_ptr.vmem [resolvable:$true] %s795_s5 }
  0x71   : > { %p8449_p10 = pneg %p8431_p9  ;;  %s7638_s7 = scalar_lea.vmem %s796_s5, 96 }
  0x72   : > { %p7639_p11 = scmp.ne.s32.totalorder %s796_s5, %s7638_s7  ;;  %s8151_s6 = smov [#allocation6]  }
  0x73   : > { %s9651_s25 = scalar_select %p8449_p10, 1, 0 }
  0x74   : > { %s793_s19 = scalar_lea.hbm %s9650_s17, %s6738_s1  ;;  %p7641_p12 = pnand %p7639_p11, %p8449_p10 }
  0x75   : > { %s7643_s14 = sshll.u32 %s8151_s6, 4  ;;  %s7644_s14 = int_to_ptr.vmem [resolvable:$false] %s7643_s14 }
  0x76   : > { %p7642_p3 = pneg %p7641_p12  ;;  %s7645_s15 = scalar_lea.vmem %s7644_s14, 192 }
  0x77   : > { %p7646_p13 = scmp.lt.s32.totalorder %s796_s5, %s7644_s14  ;;  %p7647_p1 = scmp.lt.s32.totalorder %s7645_s15, %s7638_s7 }
  0x79   : > { %p7648_p0 = por %p7647_p1, %p7646_p13 }
  0x7b   : > { %p7649_p2 = pnand %p7648_p0, %p7642_p3 }
  0x7d   : > { %7652 = shalt.err (!%p7649_p2)
}
  0x7e   : > { %6821 = dma.hbm_to_vmem [thread:$0]  (!%p8431_p9), %s793_s19, 96, %s796_s5, %s9598_s27  }
  0x7f   : > { %s8460_s17 = sshll.u32 %s8137_s26, 5  ;;  %s9652_s4 = sld [smem:[#allocation61_spill]] }
  0x80   : > { %s827_s7 = scalar_lea.vmem [#allocation9], %s8444_s2  ;;  %s9600_s15 = scalar_lea.sflag [#allocation10], %s8436_s24 }
  0x81   : > { %s835_s14 = sshll.u32 %s827_s7, 4  ;;  %s8152_s21 = smov [#allocation9]   ;;  %s836_s14 = int_to_ptr.vmem [resolvable:$true] %s835_s14 }
  0x82   : > { %s7666_s0 = scalar_lea.vmem %s836_s14, 32  ;;  %s7671_s28 = sshll.u32 %s8152_s21, 4  ;;  %s7672_s28 = int_to_ptr.vmem [resolvable:$false] %s7671_s28 }
  0x83   : > { %p7667_p4 = scmp.ne.s32.totalorder %s836_s14, %s7666_s0  ;;  %s7673_s19 = scalar_lea.vmem %s7672_s28, 64 }
  0x84   : > { %p7674_p12 = scmp.lt.s32.totalorder %s836_s14, %s7672_s28  ;;  %p7675_p3 = scmp.lt.s32.totalorder %s7673_s19, %s7666_s0 }
  0x85   : > { %s833_s1 = scalar_lea.hbm %s9652_s4, %s8460_s17  ;;  %p7669_p7 = pnand %p7667_p4, %p8449_p10 }
  0x86   : > { %p7676_p13 = por %p7675_p3, %p7674_p12 }
  0x87   : > { %p7670_p11 = pneg %p7669_p7 }
  0x89   : > { %p7677_p1 = pnand %p7676_p13, %p7670_p11 }
  0x8b   : > { %7680 = shalt.err (!%p7677_p1)
}
  0x8c   : > { %6827 = dma.hbm_to_vmem [thread:$0]  (!%p8431_p9), %s833_s1, 32, %s836_s14, %s9600_s15  }
  0x8d   : > { %s9653_s23 = sld [smem:[#allocation63_spill]]  ;;  %s865_s4 = scalar_lea.vmem [#allocation12], %s8444_s2 }
  0x8e   : > { %s873_s7 = sshll.u32 %s865_s4, 4  ;;  %s9599_s28 = scalar_lea.sflag [#allocation13], %s8436_s24  ;;  %s874_s7 = int_to_ptr.vmem [resolvable:$true] %s873_s7 }
  0x8f   : > { %s7694_s0 = scalar_lea.vmem %s874_s7, 32  ;;  %s8153_s19 = smov [#allocation12]  }
  0x90   : > { %p7695_p0 = scmp.ne.s32.totalorder %s874_s7, %s7694_s0  ;;  %s7699_s27 = sshll.u32 %s8153_s19, 4  ;;  %s7700_s27 = int_to_ptr.vmem [resolvable:$false] %s7699_s27 }
  0x91   : > { %s7701_s13 = scalar_lea.vmem %s7700_s27, 64  ;;  %p7702_p7 = scmp.lt.s32.totalorder %s874_s7, %s7700_s27 }
  0x92   : > { %p7697_p2 = pnand %p7695_p0, %p8449_p10  ;;  %p7703_p11 = scmp.lt.s32.totalorder %s7701_s13, %s7694_s0 }
  0x93   : > { %s871_s21 = scalar_lea.hbm %s9653_s23, %s8460_s17 }
  0x94   : > { %p7698_p4 = pneg %p7697_p2  ;;  %p7704_p12 = por %p7703_p11, %p7702_p7 }
  0x96   : > { %p7705_p3 = pnand %p7704_p12, %p7698_p4 }
  0x98   : > { %7708 = shalt.err (!%p7705_p3)
}
  0x99   : > { %6833 = dma.hbm_to_vmem [thread:$0]  (!%p8431_p9), %s871_s21, 32, %s874_s7, %s9599_s28  }
  0x9a   : > { %s9654_s9 = sld [smem:[#allocation64_spill]]  ;;  %s903_s6 = scalar_lea.vmem [#allocation15], %s8444_s2 }
  0x9b   : > { %s911_s23 = sshll.u32 %s903_s6, 4  ;;  %s900_s13 = scalar_lea.sflag [#allocation16], %s8436_s24  ;;  %s912_s23 = int_to_ptr.vmem [resolvable:$true] %s911_s23 }
  0x9c   : > { %s7722_s27 = scalar_lea.vmem %s912_s23, 32  ;;  %s8154_s4 = smov [#allocation15]  }
  0x9d   : > { %p7723_p13 = scmp.ne.s32.totalorder %s912_s23, %s7722_s27  ;;  %s7727_s0 = sshll.u32 %s8154_s4, 4  ;;  %s7728_s0 = int_to_ptr.vmem [resolvable:$false] %s7727_s0 }
  0x9e   : > { %s7729_s19 = scalar_lea.vmem %s7728_s0, 64  ;;  %p7730_p2 = scmp.lt.s32.totalorder %s912_s23, %s7728_s0 }
  0x9f   : > { %p7725_p1 = pnand %p7723_p13, %p8449_p10  ;;  %p7731_p4 = scmp.lt.s32.totalorder %s7729_s19, %s7722_s27 }
  0xa0   : > { %s909_s5 = scalar_lea.hbm %s9654_s9, %s8460_s17 }
  0xa1   : > { %p7726_p0 = pneg %p7725_p1  ;;  %p7732_p7 = por %p7731_p4, %p7730_p2 }
  0xa3   : > { %p7733_p11 = pnand %p7732_p7, %p7726_p0 }
  0xa5   : > { %7736 = shalt.err (!%p7733_p11)
}
  0xa6   : > { %6839 = dma.hbm_to_vmem [thread:$0]  (!%p8431_p9), %s909_s5, 32, %s912_s23, %s900_s13  }
  0xa7   : > { %s6160_s21 = sshll.u32 %s8429_s29, 3  ;;  %s6662_s7 = sshll.u32 %s8137_s26, 7 }
  0xa8   : > { %s949_s6 = scalar_lea.hbm %s9569_s11, %s6662_s7  ;;  %s943_s4 = scalar_lea.vmem [#allocation18], %s6160_s21 }
  0xa9   : > { %s951_s27 = sshll.u32 %s943_s4, 4  ;;  %s8155_s0 = smov [#allocation26]   ;;  %s952_s27 = int_to_ptr.vmem [resolvable:$true] %s951_s27 }
  0xaa   : > { %s693_s19 = sshll.u32 %s8155_s0, 4  ;;  %s9608_s28 = scalar_lea.sflag [#allocation19], %s8436_s24  ;;  %s694_s19 = int_to_ptr.vmem [resolvable:$true] %s693_s19 }
  0xab   : > { %s7750_s15 = scalar_lea.vmem %s952_s27, 128  ;;  %s8156_s9 = smov [#allocation18]  }
  0xac   : > { %p7751_p12 = scmp.ne.s32.totalorder %s952_s27, %s7750_s15  ;;  %s7755_s12 = sshll.u32 %s8156_s9, 4  ;;  %s7756_s12 = int_to_ptr.vmem [resolvable:$false] %s7755_s12 }
  0xad   : > { %s7757_s5 = scalar_lea.vmem %s7756_s12, 256  ;;  %p7758_p1 = scmp.lt.s32.totalorder %s952_s27, %s7756_s12 }
  0xae   : > { %p7753_p3 = pnand %p7751_p12, %p8449_p10  ;;  %p7759_p0 = scmp.lt.s32.totalorder %s7757_s5, %s7750_s15 }
  0xb0   : > { %p7754_p13 = pneg %p7753_p3  ;;  %p7760_p2 = por %p7759_p0, %p7758_p1 }
  0xb2   : > { %p7761_p4 = pnand %p7760_p2, %p7754_p13 }
  0xb4   : > { %7764 = shalt.err (!%p7761_p4)
}
  0xb5   : > { %6845 = dma.hbm_to_vmem [thread:$0]  (!%p8431_p9), %s949_s6, 128, %s952_s27, %s9608_s28  }
  0xb6   : > { %s7776_s23 = scalar_lea.vmem %s694_s19, 8192  ;;  %p7784_p3 = scmp.lt.s32.totalorder %s694_s19, %s694_s19 }
  0xb7   : > { %p7777_p7 = scmp.ne.s32.totalorder %s694_s19, %s7776_s23  ;;  %p7785_p8 = scmp.lt.s32.totalorder %s7776_s23, %s7776_s23 }
  0xb9   : > { %p7779_p11 = pnand %p7777_p7, %p8366_p6  ;;  %p7786_p10 = por %p7785_p8, %p7784_p3 }
  0xbb   : > { %p7780_p12 = pneg %p7779_p11 }
  0xbd   : > { %p7787_p5 = pnand %p7786_p10, %p7780_p12 }
  0xbf   : > { %7790 = shalt.err (!%p7787_p5)
}
  0xc0   : > { %s8157_s9 = smov 256   ;;  %s8158_s12 = smov 16  }
  0xc1   : > { %p9655_p13 = scmp.ne.s32.totalorder %s9637_s30, 0  ;;  %s8159_s7 = smov [#allocation29]  }
  0xc2   : > { %s718_s1 = sshll.u32 %s8159_s7, 4  ;;  %s8160_s14 = smov [#allocation32]   ;;  %s719_s1 = int_to_ptr.vmem [resolvable:$true] %s718_s1 }
  0xc3   : > { %6802 = dma.hbm_to_vmem [thread:$0]  (!%p9655_p13), %s9574_s16, 8192, %s694_s19, [#allocation25], %s8157_s9, %s8157_s9, %s8158_s12  }
  0xc4   : > { %s740_s6 = sshll.u32 %s8160_s14, 4  ;;  %s7802_s4 = scalar_lea.vmem %s719_s1, 32  ;;  %s741_s6 = int_to_ptr.vmem [resolvable:$true] %s740_s6 }
  0xc5   : > { %p7803_p1 = scmp.ne.s32.totalorder %s719_s1, %s7802_s4  ;;  %p7810_p5 = scmp.lt.s32.totalorder %s719_s1, %s719_s1 }
  0xc6   : > { %p7811_p0 = scmp.lt.s32.totalorder %s7802_s4, %s7802_s4 }
  0xc7   : > { %p7805_p8 = pnand %p7803_p1, %p8366_p6 }
  0xc8   : > { %p7812_p2 = por %p7811_p0, %p7810_p5 }
  0xc9   : > { %p7806_p10 = pneg %p7805_p8 }
  0xcb   : > { %p7813_p4 = pnand %p7812_p2, %p7806_p10 }
  0xcd   : > { %7816 = shalt.err (!%p7813_p4)
}
  0xce   : > { %6808 = dma.hbm_to_vmem [thread:$0]  (!%p9655_p13), %s9576_s18, 32, %s719_s1, [#allocation28]  }
  0xcf   : > { %s7828_s19 = scalar_lea.vmem %s741_s6, 32  ;;  %p7836_p3 = scmp.lt.s32.totalorder %s741_s6, %s741_s6 }
  0xd0   : > { %p7829_p7 = scmp.ne.s32.totalorder %s741_s6, %s7828_s19  ;;  %p7837_p1 = scmp.lt.s32.totalorder %s7828_s19, %s7828_s19 }
  0xd2   : > { %p7831_p11 = pnand %p7829_p7, %p8366_p6  ;;  %p7838_p8 = por %p7837_p1, %p7836_p3 }
  0xd4   : > { %p7832_p12 = pneg %p7831_p11 }
  0xd6   : > { %p7839_p9 = pnand %p7838_p8, %p7832_p12 }
  0xd8   : > { %7842 = shalt.err (!%p7839_p9)
}
  0xd9   : > { %6814 = dma.hbm_to_vmem [thread:$0]  (!%p9655_p13), %s9578_s20, 32, %s741_s6, [#allocation31]  }
  0xda   : > { %s6735_s9 = smul.u32 768, %s8429_s29  ;;  %s6139_s12 = sshll.u32 %s8429_s29, 8 }
  0xdb   : > { %s6736_s22 = smul.u32 12288, %s8137_s26  ;;  %s9656_s7 = sld [smem:[#allocation58_spill]] }
  0xdc   : > { %s766_s14 = scalar_lea.vmem [#allocation4], %s6735_s9  ;;  %s763_s30 = scalar_lea.sflag [#allocation5], %s8429_s29 }
  0xdd   : > { %s773_s4 = sshll.u32 %s766_s14, 4  ;;  %p9657_p9 = scmp.ne.s32.totalorder %s9651_s25, 0  ;;  %s774_s4 = int_to_ptr.vmem [resolvable:$true] %s773_s4 }
  0xde   : > { %s7856_s27 = scalar_lea.vmem %s774_s4, 12288  ;;  %s8161_s0 = smov [#allocation4]  }
  0xdf   : > { %p7857_p6 = scmp.ne.s32.totalorder %s774_s4, %s7856_s27  ;;  %s7861_s19 = sshll.u32 %s8161_s0, 4  ;;  %s7862_s19 = int_to_ptr.vmem [resolvable:$false] %s7861_s19 }
  0xe0   : > { %s7863_s6 = scalar_lea.vmem %s7862_s19, 24576  ;;  %p7864_p13 = scmp.lt.s32.totalorder %s774_s4, %s7862_s19 }
  0xe1   : > { %s772_s1 = scalar_lea.hbm %s9656_s7, %s6736_s22  ;;  %p7859_p10 = pnand %p7857_p6, %p9657_p9 }
  0xe2   : > { %p7865_p0 = scmp.lt.s32.totalorder %s7863_s6, %s7856_s27 }
  0xe3   : > { %p7860_p5 = pneg %p7859_p10 }
  0xe4   : > { %p7866_p2 = por %p7865_p0, %p7864_p13 }
  0xe6   : > { %p7867_p4 = pnand %p7866_p2, %p7860_p5 }
  0xe8   : > { %7870 = shalt.err (!%p7867_p4)
}
  0xe9   : > { %s8162_s5 = smov 384   ;;  %s8163_s23 = smov 24  }
  0xea   : > { %p9658_p7 = scmp.ne.s32.totalorder %s9649_s3, 0  ;;  %s6655_s9 = sshll.u32 %s8137_s26, 12 }
  0xeb   : > { %s806_s22 = scalar_lea.vmem [#allocation8], %s6139_s12  ;;  %s9659_s14 = sld [smem:[#allocation60_spill]] }
  0xec   : > { %6818 = dma.hbm_to_vmem [thread:$0]  (!%p9658_p7), %s772_s1, 12288, %s774_s4, %s763_s30, %s8162_s5, %s8162_s5, %s8163_s23  }
  0xed   : > { %s813_s15 = sshll.u32 %s806_s22, 4  ;;  %s8164_s27 = smov [#allocation8]   ;;  %s814_s15 = int_to_ptr.vmem [resolvable:$true] %s813_s15 }
  0xee   : > { %s7884_s19 = scalar_lea.vmem %s814_s15, 4096  ;;  %s7889_s6 = sshll.u32 %s8164_s27, 4  ;;  %s7890_s6 = int_to_ptr.vmem [resolvable:$false] %s7889_s6 }
  0xef   : > { %p7885_p11 = scmp.ne.s32.totalorder %s814_s15, %s7884_s19  ;;  %s7891_s28 = scalar_lea.vmem %s7890_s6, 8192 }
  0xf0   : > { %p7892_p1 = scmp.lt.s32.totalorder %s814_s15, %s7890_s6  ;;  %p7893_p8 = scmp.lt.s32.totalorder %s7891_s28, %s7884_s19 }
  0xf1   : > { %s812_s0 = scalar_lea.hbm %s9659_s14, %s6655_s9  ;;  %p7887_p12 = pnand %p7885_p11, %p9657_p9 }
  0xf2   : > { %p7894_p6 = por %p7893_p8, %p7892_p1 }
  0xf3   : > { %p7888_p3 = pneg %p7887_p12 }
  0xf5   : > { %p7895_p10 = pnand %p7894_p6, %p7888_p3 }
  0xf7   : > { %7898 = shalt.err (!%p7895_p10)
}
  0xf8   : > { %s9609_s12 = smov 128   ;;  %s8166_s1 = smov 8  }
  0xf9   : > { %s9660_s4 = scalar_lea.sflag [#allocation7], %s8436_s24  ;;  %s9661_s28 = sld [smem:[#allocation62_spill]] }
  0xfa   : > { %6824 = dma.hbm_to_vmem [thread:$0]  (!%p9658_p7), %s812_s0, 4096, %s814_s15, %s9660_s4, %s9609_s12, %s9609_s12, %s8166_s1  }
  0xfb   : > { %s846_s9 = scalar_lea.vmem [#allocation11], %s8444_s2  ;;  %s890_s14 = scalar_lea.hbm %s9566_s8, %s8460_s17 }
  0xfc   : > { %s854_s22 = sshll.u32 %s846_s9, 4  ;;  %s8167_s27 = smov [#allocation11]   ;;  %s855_s22 = int_to_ptr.vmem [resolvable:$true] %s854_s22 }
  0xfd   : > { %s7912_s19 = scalar_lea.vmem %s855_s22, 32  ;;  %s7917_s6 = sshll.u32 %s8167_s27, 4  ;;  %s7918_s6 = int_to_ptr.vmem [resolvable:$false] %s7917_s6 }
  0xfe   : > { %p7913_p5 = scmp.ne.s32.totalorder %s855_s22, %s7912_s19  ;;  %s7919_s15 = scalar_lea.vmem %s7918_s6, 64 }
  0xff   : > { %s852_s23 = scalar_lea.hbm %s9661_s28, %s8460_s17  ;;  %p7920_p2 = scmp.lt.s32.totalorder %s855_s22, %s7918_s6 }
 0x100   : > { %p7915_p13 = pnand %p7913_p5, %p9657_p9  ;;  %p7921_p4 = scmp.lt.s32.totalorder %s7919_s15, %s7912_s19 }
 0x102   : > { %p7916_p0 = pneg %p7915_p13  ;;  %p7922_p11 = por %p7921_p4, %p7920_p2 }
 0x104   : > { %p7923_p12 = pnand %p7922_p11, %p7916_p0 }
 0x106   : > { %7926 = shalt.err (!%p7923_p12)
}
 0x107   : > { %s9662_s0 = scalar_lea.sflag [#allocation10], %s8436_s24  ;;  %s884_s4 = scalar_lea.vmem [#allocation14], %s8444_s2 }
 0x108   : > { %6830 = dma.hbm_to_vmem [thread:$0]  (!%p9658_p7), %s852_s23, 32, %s855_s22, %s9662_s0  }
 0x109   : > { %s892_s30 = sshll.u32 %s884_s4, 4  ;;  %s6157_s5 = sshll.u32 %s8429_s29, 10  ;;  %s893_s30 = int_to_ptr.vmem [resolvable:$true] %s892_s30 }
 0x10a   : > { %s7940_s28 = scalar_lea.vmem %s893_s30, 32  ;;  %s8168_s9 = smov [#allocation14]  }
 0x10b   : > { %p7941_p3 = scmp.ne.s32.totalorder %s893_s30, %s7940_s28  ;;  %s7945_s21 = sshll.u32 %s8168_s9, 4  ;;  %s7946_s21 = int_to_ptr.vmem [resolvable:$false] %s7945_s21 }
 0x10c   : > { %s7947_s7 = scalar_lea.vmem %s7946_s21, 64  ;;  %p7948_p6 = scmp.lt.s32.totalorder %s893_s30, %s7946_s21 }
 0x10d   : > { %p7943_p1 = pnand %p7941_p3, %p9657_p9  ;;  %p7949_p10 = scmp.lt.s32.totalorder %s7947_s7, %s7940_s28 }
 0x10f   : > { %p7944_p8 = pneg %p7943_p1  ;;  %p7950_p5 = por %p7949_p10, %p7948_p6 }
 0x111   : > { %p7951_p13 = pnand %p7950_p5, %p7944_p8 }
 0x113   : > { %7954 = shalt.err (!%p7951_p13)
}
 0x114   : > { %s9663_s23 = scalar_lea.sflag [#allocation13], %s8436_s24  ;;  %s6661_s27 = sshll.u32 %s8137_s26, 14 }
 0x115   : > { %6836 = dma.hbm_to_vmem [thread:$0]  (!%p9658_p7), %s890_s14, 32, %s893_s30, %s9663_s23  }
 0x116   : > { %s922_s6 = scalar_lea.vmem [#allocation17], %s6157_s5  ;;  %s928_s28 = scalar_lea.hbm %s9568_s10, %s6661_s27 }
 0x117   : > { %s929_s15 = sshll.u32 %s922_s6, 4  ;;  %s8169_s21 = smov [#allocation17]   ;;  %s930_s15 = int_to_ptr.vmem [resolvable:$true] %s929_s15 }
 0x118   : > { %s7968_s9 = scalar_lea.vmem %s930_s15, 16384  ;;  %s7973_s7 = sshll.u32 %s8169_s21, 4  ;;  %s7974_s7 = int_to_ptr.vmem [resolvable:$false] %s7973_s7 }
 0x119   : > { %p7969_p0 = scmp.ne.s32.totalorder %s930_s15, %s7968_s9  ;;  %s7975_s22 = scalar_lea.vmem %s7974_s7, 32768 }
 0x11a   : > { %p7976_p11 = scmp.lt.s32.totalorder %s930_s15, %s7974_s7  ;;  %p7977_p12 = scmp.lt.s32.totalorder %s7975_s22, %s7968_s9 }
 0x11b   : > { %p7971_p2 = pnand %p7969_p0, %p9657_p9 }
 0x11c   : > { %p7978_p3 = por %p7977_p12, %p7976_p11 }
 0x11d   : > { %p7972_p4 = pneg %p7971_p2 }
 0x11f   : > { %p7979_p1 = pnand %p7978_p3, %p7972_p4 }
 0x121   : > { %7982 = shalt.err (!%p7979_p1)
}
 0x122   : > { %s8170_s14 = smov 512   ;;  %s8171_s30 = smov 32  }
 0x123   : > { %6842 = dma.hbm_to_vmem [thread:$0]  (!%p9658_p7), %s928_s28, 16384, %s930_s15, %s900_s13, %s8170_s14, %s8170_s14, %s8171_s30  }
 0x124   : > { %s9664_s6 = sld [smem:[#allocation65_spill]]  ;;  %s962_s4 = scalar_lea.vmem [#allocation20], %s6157_s5 }
 0x125   : > { %s969_s21 = sshll.u32 %s962_s4, 4  ;;  %s8172_s7 = smov [#allocation20]   ;;  %s970_s21 = int_to_ptr.vmem [resolvable:$true] %s969_s21 }
 0x126   : > { %s7996_s9 = scalar_lea.vmem %s970_s21, 16384  ;;  %s8001_s22 = sshll.u32 %s8172_s7, 4  ;;  %s8002_s22 = int_to_ptr.vmem [resolvable:$false] %s8001_s22 }
 0x127   : > { %p7997_p8 = scmp.ne.s32.totalorder %s970_s21, %s7996_s9  ;;  %s8003_s12 = scalar_lea.vmem %s8002_s22, 32768 }
 0x128   : > { %p8004_p5 = scmp.lt.s32.totalorder %s970_s21, %s8002_s22  ;;  %p8005_p13 = scmp.lt.s32.totalorder %s8003_s12, %s7996_s9 }
 0x129   : > { %p7999_p6 = pnand %p7997_p8, %p9657_p9 }
 0x12a   : > { %s968_s0 = scalar_lea.hbm %s9664_s6, %s6661_s27  ;;  %p8006_p0 = por %p8005_p13, %p8004_p5 }
 0x12b   : > { %p8000_p10 = pneg %p7999_p6 }
 0x12d   : > { %p8007_p2 = pnand %p8006_p0, %p8000_p10 }
 0x12f   : > { %8010 = shalt.err (!%p8007_p2)
}
 0x130   : > { %s9665_s29 = smov 128   ;;  %s9666_s13 = scalar_lea.sflag [#allocation19], %s8436_s24 }
 0x131   : > { %6848 = dma.hbm_to_vmem [thread:$0]  (!%p9658_p7), %s968_s0, 16384, %s970_s21, %s9666_s13, %s9665_s29, %s9665_s29, %s8166_s1  }
 0x132   : > { %s9667_s15 = sld [smem:[#allocation66_spill]]  ;;  %s983_s12 = scalar_lea.vmem [#allocation21], %s8444_s2 }
 0x133   : > { %s991_s14 = sshll.u32 %s983_s12, 4  ;;  %s980_s30 = scalar_lea.sflag [#allocation22], %s8436_s24  ;;  %s992_s14 = int_to_ptr.vmem [resolvable:$true] %s991_s14 }
 0x134   : > { %s8024_s23 = scalar_lea.vmem %s992_s14, 32  ;;  %s8173_s19 = smov [#allocation21]  }
 0x135   : > { %p8025_p4 = scmp.ne.s32.totalorder %s992_s14, %s8024_s23  ;;  %s8029_s6 = sshll.u32 %s8173_s19, 4  ;;  %s8030_s6 = int_to_ptr.vmem [resolvable:$false] %s8029_s6 }
 0x136   : > { %s8031_s4 = scalar_lea.vmem %s8030_s6, 64  ;;  %p8032_p3 = scmp.lt.s32.totalorder %s992_s14, %s8030_s6 }
 0x137   : > { %p8027_p11 = pnand %p8025_p4, %p9657_p9  ;;  %p8033_p1 = scmp.lt.s32.totalorder %s8031_s4, %s8024_s23 }
 0x138   : > { %s989_s28 = scalar_lea.hbm %s9667_s15, %s8460_s17 }
 0x139   : > { %p8028_p12 = pneg %p8027_p11  ;;  %p8034_p8 = por %p8033_p1, %p8032_p3 }
 0x13b   : > { %p8035_p6 = pnand %p8034_p8, %p8028_p12 }
 0x13d   : > { %8038 = shalt.err (!%p8035_p6)
}
 0x13e   : > { %6851 = dma.hbm_to_vmem [thread:$0]  (!%p9658_p7), %s989_s28, 32, %s992_s14, %s980_s30  }
 0x13f   : > { %s9668_s2 = sld [smem:[#allocation51_spill]] }
 0x145   : > { %p9669_p10 = scmp.ne.s32.totalorder %s9668_s2, 0 }
 0x146   : > { %s9670_s24 = sld [smem:[#allocation44_spill]] (!%p9669_p10) }
 0x147   : > { %1000 = sbr.rel (%p9669_p10) target bundleno = 4450 (0x1162), region = 108  ;;  %s9671_s17 = sld [smem:[#allocation55_spill]] (!%p9669_p10) }
 0x14c   : > { %s8622_s25 = sand.u32 1, %s9670_s24  }
 0x14d   : > { %s6739_s1 = smul.u32 768, %s8622_s25  ;;  %s1003_s0 = scalar_lea.sflag [#allocation5], %s8622_s25 }
 0x14e   : > { %p9672_p9 = scmp.ne.s32.totalorder %s9671_s17, 0 }
 0x14f   : > { %s8626_s21 = scalar_lea.vmem [#allocation4], %s6739_s1 }
 0x150   : > { %8072 = dma.done.wait (%p9672_p9), %s1003_s0, 12288  }
 0x151   : > { %8074 = vsyncadd (%p9672_p9), %s1003_s0, 4294955008  ;;  %s9673_s3 = sld [smem:[#allocation49_spill]]  ;;  %s6740_s22 = smul.u32 6, %s8622_s25 }
 0x153   : > { %s8638_s13 = scalar_lea.vmem [#allocation6], %s6740_s22 }
 0x157   : > { %s9674_s9 = sadd.s32 4294967295, %s9673_s3  }
 0x158   : > { %s8634_s7 = sand.u32 1, %s9674_s9  }
 0x159   : > { %s1012_s29 = scalar_lea.sflag [#allocation7], %s8634_s7 }
 0x15a   : > { %8076 = dma.done.wait (%p9672_p9), %s1012_s29, 4192  }
 0x15b   : > { %8078 = vsyncadd (%p9672_p9), %s1012_s29, 4294963104  ;;  %s6170_s5 = sshll.u32 %s8622_s25, 8  ;;  %s8646_s27 = sshll.u32 %s8622_s25, 1 }
 0x15c   : > { %s8648_s15 = scalar_lea.vmem [#allocation8], %s6170_s5  ;;  %s1030_s28 = scalar_lea.sflag [#allocation10], %s8634_s7 }
 0x15d   : > { %8080 = dma.done.wait (%p9672_p9), %s1030_s28, 64  }
 0x15e   : > { %8082 = vsyncadd (%p9672_p9), %s1030_s28, 4294967232  ;;  %s1042_s14 = scalar_lea.vmem [#allocation11], %s8646_s27  ;;  %s1048_s30 = scalar_lea.sflag [#allocation13], %s8634_s7 }
 0x15f   : > { %s1051_s23 = scalar_lea.vmem [#allocation12], %s8646_s27 }
 0x160   : > { %8084 = dma.done.wait (%p9672_p9), %s1048_s30, 64  }
 0x161   : > { %8086 = vsyncadd (%p9672_p9), %s1048_s30, 4294967232  ;;  %s1066_s6 = scalar_lea.sflag [#allocation16], %s8634_s7 }
 0x162   : > { %8088 = dma.done.wait (%p9672_p9), %s1066_s6, 16416  }
 0x163   : > { %8090 = vsyncadd (%p9672_p9), %s1066_s6, 4294950880  ;;  %s6176_s2 = sshll.u32 %s8622_s25, 10  ;;  %s6177_s24 = sshll.u32 %s8622_s25, 3 }
 0x164   : > { %s8672_s1 = scalar_lea.vmem [#allocation17], %s6176_s2  ;;  %s1084_s0 = scalar_lea.sflag [#allocation19], %s8634_s7 }
 0x165   : > { %s8675_s3 = scalar_lea.vmem [#allocation18], %s6177_s24 }
 0x166   : > { %8092 = dma.done.wait (%p9672_p9), %s1084_s0, 16512  }
 0x167   : > { %8094 = vsyncadd (%p9672_p9), %s1084_s0, 4294950784  ;;  %s8681_s9 = scalar_lea.vmem [#allocation20], %s6176_s2  ;;  %s1102_s22 = scalar_lea.sflag [#allocation22], %s8634_s7 }
 0x168   : > { %8096 = dma.done.wait (%p9672_p9), %s1102_s22, 32  }
 0x169   : > { %8098 = vsyncadd (%p9672_p9), %s1102_s22, 4294967264  ;;  %s9675_s25 = sld [smem:[#allocation50_spill]] }
 0x16f   : > { %p9676_p7 = scmp.ne.s32.totalorder %s9675_s25, 0 }
 0x171   : > { %8100 = dma.done.wait (%p9676_p7), [#allocation22], 32  }
 0x172   : > { %8102 = vsyncadd (%p9676_p7), [#allocation22], 4294967264 }
 0x173   : > { %8104 = dma.done.wait (%p9676_p7), [#allocation25], 8224  }
 0x174   : > { %8106 = vsyncadd (%p9676_p7), [#allocation25], 4294959072 }
 0x175   : > { %8108 = dma.done.wait (%p9676_p7), [#allocation28], 96  }
 0x176   : > { %8110 = vsyncadd (%p9676_p7), [#allocation28], 4294967200 }
 0x177   : > { %8112 = dma.done.wait (%p9676_p7), [#allocation31], 64  }
 0x178   : > { %8114 = vsyncadd (%p9676_p7), [#allocation31], 4294967232  ;;  %s9677_s17 = sld [smem:[#allocation47_spill]] }
 0x179   : > { %s9678_s30 = sld [smem:[#allocation72_spill]] }
 0x17a   : > { %s9679_s0 = sld [smem:[#allocation56_spill]] }
 0x17b   : > { %s9680_s25 = sld [smem:[#allocation71_spill]] }
 0x17c   : > { %s9681_s12 = sld [smem:[#allocation46_spill]] }
 0x17e   : > { %p1259_p5 = scmp.lt.s32.totalorder %s9677_s17, 1 }
 0x180   : > { %s9705_s17 = smov (!%p1259_p5, %s9677_s17), 1 }
 0x181   : > { %s6665_s7 = sshll.u32 %s9705_s17, 5  ;;  %s1271_s6 = scalar_lea.vmem %s9678_s30, %s9705_s17 }
 0x182   : > { %s1263_s22 = scalar_lea.vmem %s9679_s0, %s6665_s7  ;;  %s8720_s19 = scalar_lea.vmem %s9680_s25, %s6665_s7 }
 0x183   : > { %p6191_p13 = scmp.ne.s32.totalorder %s9681_s12, 0 }
 0x185   : > { %1277 = sbr.rel (%p6191_p13) target bundleno = 397 (0x18d), region = 188 }
 0x18a   : > { %v1278_v1 = vld [vmem:[%s1263_s22] sm:$0xff]  ;;  %v1279_v2 = vld [vmem:[%s1263_s22 + $0x8] sm:$0xff]  ;;  %v1280_v3 = vld [vmem:[%s1263_s22 + $0x10] sm:$0xff] }
 0x18b   : > { %1282 = vst [vmem:[#allocation2 + $0x10] sm:$0xff] %v1278_v1  ;;  %1283 = vst [vmem:[#allocation2] sm:$0xff] %v1279_v2  ;;  %v1281_v4 = vld [vmem:[%s1263_s22 + $0x18] sm:$0xff] }
 0x18c   : > { %1284 = vst [vmem:[#allocation2 + $0x18] sm:$0xff] %v1280_v3  ;;  %1285 = vst [vmem:[#allocation2 + $0x8] sm:$0xff] %v1281_v4 }
 0x18d PF: > { %v6960_v14 = vld [vmem:[%s8626_s21 + $0x154] ss:$24 sps:$4 sm:$0xff]   ;;  %v6962_v15 = vld [vmem:[%s8626_s21 + $0x150] ss:$24 sps:$4 sm:$0xff]   ;;  %v6966_v20 = vld [vmem:[%s8626_s21 + $0x124] ss:$24 sps:$4 sm:$0xff]  }
 0x18e   : > { %v6963_v18 = vld [vmem:[%s8626_s21 + $0x15c] ss:$24 sps:$4 sm:$0xff]   ;;  %v6965_v19 = vld [vmem:[%s8626_s21 + $0x158] ss:$24 sps:$4 sm:$0xff]   ;;  %1973 = vmatprep.subr.bf16.mxu0 %v6960_v14  ;;  %v6969_v23 = vld [vmem:[%s8626_s21 + $0x12c] ss:$24 sps:$4 sm:$0xff]  }
 0x18f   : > { %1974 = vmatpush1.bf16.msra.mxu0 %v6962_v15  ;;  %v6968_v22 = vld [vmem:[%s8626_s21 + $0x120] ss:$24 sps:$4 sm:$0xff]   ;;  %2016 = vmatprep.subr.bf16.mxu1 %v6963_v18  ;;  %v6972_v25 = vld [vmem:[%s8626_s21 + $0xf4] ss:$24 sps:$4 sm:$0xff]   ;;  %v6974_v27 = vld [vmem:[%s8626_s21 + $0xf0] ss:$24 sps:$4 sm:$0xff]  }
 0x190   : > { %1975 = vmatprep.subr.bf16.mxu0 %v6966_v20  ;;  %2017 = vmatpush1.bf16.msra.mxu1 %v6965_v19  ;;  %v6971_v24 = vld [vmem:[%s8626_s21 + $0x128] ss:$24 sps:$4 sm:$0xff]   ;;  %v6975_v26 = vld [vmem:[%s8626_s21 + $0xfc] ss:$24 sps:$4 sm:$0xff]   ;;  %v6977_v29 = vld [vmem:[%s8626_s21 + $0xf8] ss:$24 sps:$4 sm:$0xff]  }
 0x191   : > { %2018 = vmatprep.subr.bf16.mxu1 %v6969_v23  ;;  %v6978_v28 = vld [vmem:[%s8626_s21 + $0xc4] ss:$24 sps:$4 sm:$0xff]   ;;  %v6980_v31 = vld [vmem:[%s8626_s21 + $0xc0] ss:$24 sps:$4 sm:$0xff]   ;;  %v6984_v32 = vld [vmem:[%s8626_s21 + $0x94] ss:$24 sps:$4 sm:$0xff]  }
 0x192   : > { %v8723_v5 = vld [vmem:[#allocation2 + $0x10] sm:$0xff]  ;;  %v8725_v6 = vld [vmem:[#allocation2] sm:$0xff]  ;;  %vm8175_vm0 = vmmov 0   ;;  %vm2109_vm1 = vcmask 523264   ;;  %s9682_s12 = sld [smem:[#allocation57_spill]]  ;;  %vm2157_vm2 = vcmask 130048  }
 0x193   : > { %v8727_v7 = vld [vmem:[#allocation2 + $0x18] sm:$0xff]  ;;  %v1294_v8 = vadd.f32 %v8725_v6, %v8723_v5  ;;  %v1303_v9 = vmul.f32 %v8723_v5, %v8723_v5  ;;  %v1304_v10 = vmul.f32 %v8725_v6, %v8725_v6  ;;  %v8735_v11 = vld [vmem:[#allocation2 + $0x8] sm:$0xff]  ;;  %1976 = vmatpush1.bf16.msra.mxu0 %v6968_v22  ;;  %s8176_s4 = smov 64   ;;  %s9684_s29 = scalar_lea.vmem [#allocation14], %s8646_s27 }
 0x194   : > { %v1305_v12 = vmul.f32 %v8727_v7, %v8727_v7  ;;  %v1306_v13 = vmul.f32 %v8735_v11, %v8735_v11  ;;  %v1297_v17 = vadd.f32 %v8735_v11, %v8727_v7  ;;  %1977 = vmatprep.subr.bf16.mxu0 %v6972_v25  ;;  %2019 = vmatpush1.bf16.msra.mxu1 %v6971_v24  ;;  %v6981_v30 = vld [vmem:[%s8626_s21 + $0xcc] ss:$24 sps:$4 sm:$0xff]   ;;  %v6983_v33 = vld [vmem:[%s8626_s21 + $0xc8] ss:$24 sps:$4 sm:$0xff]   ;;  %v6987_v34 = vld [vmem:[%s8626_s21 + $0x9c] ss:$24 sps:$4 sm:$0xff]  }
 0x195   : > { %1295 = vadd.xlane.f32.xlu0 %v1294_v8  ;;  %v1307_v16 = vadd.f32 %v1304_v10, %v1303_v9  ;;  %2020 = vmatprep.subr.bf16.mxu1 %v6975_v26  ;;  %v6986_v35 = vld [vmem:[%s8626_s21 + $0x90] ss:$24 sps:$4 sm:$0xff]   ;;  %v6990_v36 = vld [vmem:[%s8626_s21 + $0x64] ss:$24 sps:$4 sm:$0xff]   ;;  %v6992_v39 = vld [vmem:[%s8626_s21 + $0x60] ss:$24 sps:$4 sm:$0xff]  }
 0x196   : > { %v1310_v21 = vadd.f32 %v1306_v13, %v1305_v12  ;;  %v6989_v37 = vld [vmem:[%s8626_s21 + $0x98] ss:$24 sps:$4 sm:$0xff]   ;;  %v6993_v38 = vld [vmem:[%s8626_s21 + $0x6c] ss:$24 sps:$4 sm:$0xff]   ;;  %v6995_v41 = vld [vmem:[%s8626_s21 + $0x68] ss:$24 sps:$4 sm:$0xff]  }
 0x197   : > { %1308 = vadd.xlane.f32.xlu1 %v1307_v16  ;;  %1978 = vmatpush1.bf16.msra.mxu0 %v6974_v27  ;;  %v6996_v40 = vld [vmem:[%s8626_s21 + $0x34] ss:$24 sps:$4 sm:$0xff]   ;;  %v6998_v43 = vld [vmem:[%s8626_s21 + $0x30] ss:$24 sps:$4 sm:$0xff]   ;;  %v7002_v44 = vld [vmem:[%s8626_s21 + $0x4] ss:$24 sps:$4 sm:$0xff]  }
 0x198   : > { %1979 = vmatprep.subr.bf16.mxu0 %v6978_v28  ;;  %2021 = vmatpush1.bf16.msra.mxu1 %v6977_v29  ;;  %v6999_v42 = vld [vmem:[%s8626_s21 + $0x3c] ss:$24 sps:$4 sm:$0xff]   ;;  %v7001_v45 = vld [vmem:[%s8626_s21 + $0x38] ss:$24 sps:$4 sm:$0xff]   ;;  %v7005_v46 = vld [vmem:[%s8626_s21 + $0xc] ss:$24 sps:$4 sm:$0xff]  }
 0x199   : > { %1298 = vadd.xlane.f32.xlu0 %v1297_v17  ;;  %2022 = vmatprep.subr.bf16.mxu1 %v6981_v30  ;;  %v7004_v47 = vld [vmem:[%s8626_s21] ss:$24 sps:$4 sm:$0xff]   ;;  %v7008_v48 = vld [vmem:[%s8626_s21 + $0x2d4] ss:$24 sps:$4 sm:$0xff]   ;;  %v7010_v51 = vld [vmem:[%s8626_s21 + $0x2d0] ss:$24 sps:$4 sm:$0xff]  }
 0x19a   : > { %v7007_v49 = vld [vmem:[%s8626_s21 + $0x8] ss:$24 sps:$4 sm:$0xff]   ;;  %v7011_v50 = vld [vmem:[%s8626_s21 + $0x2dc] ss:$24 sps:$4 sm:$0xff]   ;;  %v7013_v53 = vld [vmem:[%s8626_s21 + $0x2d8] ss:$24 sps:$4 sm:$0xff]  }
 0x19b   : > { %1311 = vadd.xlane.f32.xlu1 %v1310_v21  ;;  %1980 = vmatpush1.bf16.msra.mxu0 %v6980_v31  ;;  %v7014_v52 = vld [vmem:[%s8626_s21 + $0x2a4] ss:$24 sps:$4 sm:$0xff]   ;;  %v7016_v55 = vld [vmem:[%s8626_s21 + $0x2a0] ss:$24 sps:$4 sm:$0xff]   ;;  %v7020_v56 = vld [vmem:[%s8626_s21 + $0x274] ss:$24 sps:$4 sm:$0xff]  }
 0x19c   : > { %1981 = vmatprep.subr.bf16.mxu0 %v6984_v32  ;;  %2023 = vmatpush1.bf16.msra.mxu1 %v6983_v33  ;;  %v7017_v54 = vld [vmem:[%s8626_s21 + $0x2ac] ss:$24 sps:$4 sm:$0xff]   ;;  %v7019_v57 = vld [vmem:[%s8626_s21 + $0x2a8] ss:$24 sps:$4 sm:$0xff]   ;;  %v7023_v58 = vld [vmem:[%s8626_s21 + $0x27c] ss:$24 sps:$4 sm:$0xff]  }
 0x19d   : > { %2024 = vmatprep.subr.bf16.mxu1 %v6987_v34  ;;  %v7022_v59 = vld [vmem:[%s8626_s21 + $0x270] ss:$24 sps:$4 sm:$0xff]   ;;  %v7026_v60 = vld [vmem:[%s8626_s21 + $0x244] ss:$24 sps:$4 sm:$0xff]   ;;  %v7028_v62 = vld [vmem:[%s8626_s21 + $0x240] ss:$24 sps:$4 sm:$0xff]  }
 0x19e   : > { %v7025_v61 = vld [vmem:[%s8626_s21 + $0x278] ss:$24 sps:$4 sm:$0xff]   ;;  %v7029_v63 = vld [vmem:[%s8626_s21 + $0x24c] ss:$24 sps:$4 sm:$0xff]   ;;  %v7031_v1 = vld [vmem:[%s8626_s21 + $0x248] ss:$24 sps:$4 sm:$0xff]  }
 0x19f   : > { %1982 = vmatpush1.bf16.msra.mxu0 %v6986_v35  ;;  %v7032_v0 = vld [vmem:[%s8626_s21 + $0x214] ss:$24 sps:$4 sm:$0xff]   ;;  %v7034_v2 = vld [vmem:[%s8626_s21 + $0x210] ss:$24 sps:$4 sm:$0xff]   ;;  %v7038_v8 = vld [vmem:[%s8626_s21 + $0x1e4] ss:$24 sps:$4 sm:$0xff]  }
 0x1a0   : > { %1983 = vmatprep.subr.bf16.mxu0 %v6990_v36  ;;  %2025 = vmatpush1.bf16.msra.mxu1 %v6989_v37  ;;  %v7035_v3 = vld [vmem:[%s8626_s21 + $0x21c] ss:$24 sps:$4 sm:$0xff]   ;;  %v7037_v4 = vld [vmem:[%s8626_s21 + $0x218] ss:$24 sps:$4 sm:$0xff]   ;;  %v7041_v10 = vld [vmem:[%s8626_s21 + $0x1ec] ss:$24 sps:$4 sm:$0xff]  }
 0x1a1   : > { %2026 = vmatprep.subr.bf16.mxu1 %v6993_v38  ;;  %v7040_v9 = vld [vmem:[%s8626_s21 + $0x1e0] ss:$24 sps:$4 sm:$0xff]   ;;  %v7044_v12 = vld [vmem:[%s8626_s21 + $0x1b4] ss:$24 sps:$4 sm:$0xff]   ;;  %v7046_v14 = vld [vmem:[%s8626_s21 + $0x1b0] ss:$24 sps:$4 sm:$0xff]   ;;  %v1334_v38 = vlaneseq }
 0x1a2   : > { %v7043_v13 = vld [vmem:[%s8626_s21 + $0x1e8] ss:$24 sps:$4 sm:$0xff]   ;;  %v7047_v15 = vld [vmem:[%s8626_s21 + $0x1bc] ss:$24 sps:$4 sm:$0xff]   ;;  %v7049_v17 = vld [vmem:[%s8626_s21 + $0x1b8] ss:$24 sps:$4 sm:$0xff]  }
 0x1a3   : > { %1984 = vmatpush1.bf16.msra.mxu0 %v6992_v39  ;;  %v7050_v16 = vld [vmem:[%s8626_s21 + $0x184] ss:$24 sps:$4 sm:$0xff]   ;;  %v7052_v18 = vld [vmem:[%s8626_s21 + $0x180] ss:$24 sps:$4 sm:$0xff]   ;;  %v8809_v39 = vshrl.u32 %v1334_v38, 7  ;;  %s9685_s7 = scalar_lea.vmem [#allocation15], %s8646_s27 }
 0x1a4   : > { %1985 = vmatprep.subr.bf16.mxu0 %v6996_v40  ;;  %2027 = vmatpush1.bf16.msra.mxu1 %v6995_v41  ;;  %v7053_v19 = vld [vmem:[%s8626_s21 + $0x18c] ss:$24 sps:$4 sm:$0xff]   ;;  %v7055_v21 = vld [vmem:[%s8626_s21 + $0x188] ss:$24 sps:$4 sm:$0xff]  }
 0x1a5   : > { %2028 = vmatprep.subr.bf16.mxu1 %v6999_v42  ;;  %v7058_v20 = vld [vmem:[%s8626_s21 + $0x164] ss:$24 sps:$4 sm:$0xff]   ;;  %v8812_v40 = vsub.s32 1, %v8809_v39  ;;  %v8815_v41 = vsub.s32 0, %v8809_v39  ;;  %v1292_v42 = vld [vmem:[%s1042_s14] sm:$0x3] }
 0x1a7   : > { %1986 = vmatpush1.bf16.msra.mxu0 %v6998_v43 }
 0x1a8   : > { %1987 = vmatprep.subr.bf16.mxu0 %v7002_v44  ;;  %2029 = vmatpush1.bf16.msra.mxu1 %v7001_v45 }
 0x1a9   : > { %2030 = vmatprep.subr.bf16.mxu1 %v7005_v46  ;;  %v1293_v46 = vld [vmem:[%s1051_s23] sm:$0x3] }
 0x1ab   : > { %1988 = vmatpush1.bf16.msra.mxu0 %v7004_v47 }
 0x1ac   : > { %1989 = vmatprep.subr.bf16.mxu0 %v7008_v48  ;;  %2031 = vmatpush1.bf16.msra.mxu1 %v7007_v49  ;;  %v1341_v48 = vrot.slane %v1292_v42, %v8812_v40 }
 0x1ad   : > { %2032 = vmatprep.subr.bf16.mxu1 %v7011_v50  ;;  %v1337_v50 = vrot.slane %v1292_v42, %v8815_v41 }
 0x1af   : > { %1990 = vmatpush2.bf16.msra.mxu0 %v7010_v51 }
 0x1b0   : > { %1991 = vmatprep.subr.bf16.mxu0 %v7014_v52  ;;  %2033 = vmatpush2.bf16.msra.mxu1 %v7013_v53 }
 0x1b1   : > { %2034 = vmatprep.subr.bf16.mxu1 %v7017_v54  ;;  %v1356_v54 = vrot.slane %v1293_v46, %v8812_v40 }
 0x1b3   : > { %1992 = vmatpush2.bf16.msra.mxu0 %v7016_v55 }
 0x1b4   : > { %1993 = vmatprep.subr.bf16.mxu0 %v7020_v56  ;;  %2035 = vmatpush2.bf16.msra.mxu1 %v7019_v57 }
 0x1b5   : > { %2036 = vmatprep.subr.bf16.mxu1 %v7023_v58 }
 0x1b7   : > { %1994 = vmatpush2.bf16.msra.mxu0 %v7022_v59 }
 0x1b8   : > { %1995 = vmatprep.subr.bf16.mxu0 %v7026_v60  ;;  %2037 = vmatpush2.bf16.msra.mxu1 %v7025_v61 }
 0x1b9   : > { %2038 = vmatprep.subr.bf16.mxu1 %v7029_v63  ;;  %v7056_v63 = vld [vmem:[%s8626_s21 + $0x160] ss:$24 sps:$4 sm:$0xff]  }
 0x1bb   : > { %1996 = vmatpush2.bf16.msra.mxu0 %v7028_v62 }
 0x1bc   : > { %1997 = vmatprep.subr.bf16.mxu0 %v7032_v0  ;;  %2039 = vmatpush2.bf16.msra.mxu1 %v7031_v1  ;;  %v7061_v1 = vld [vmem:[%s8626_s21 + $0x134] ss:$24 sps:$4 sm:$0xff]  }
 0x1bd   : > { %2040 = vmatprep.subr.bf16.mxu1 %v7035_v3  ;;  %v7064_v3 = vld [vmem:[%s8626_s21 + $0x104] ss:$24 sps:$4 sm:$0xff]  }
 0x1bf   : > { %1998 = vmatpush2.bf16.msra.mxu0 %v7034_v2  ;;  %v7059_v2 = vld [vmem:[%s8626_s21 + $0x130] ss:$24 sps:$4 sm:$0xff]  }
 0x1c0   : > { %1999 = vmatprep.subr.bf16.mxu0 %v7038_v8  ;;  %2041 = vmatpush2.bf16.msra.mxu1 %v7037_v4  ;;  %v7062_v4 = vld [vmem:[%s8626_s21 + $0x100] ss:$24 sps:$4 sm:$0xff]   ;;  %v7067_v8 = vld [vmem:[%s8626_s21 + $0xd4] ss:$24 sps:$4 sm:$0xff]  }
 0x1c1   : > { %2042 = vmatprep.subr.bf16.mxu1 %v7041_v10  ;;  %v7070_v10 = vld [vmem:[%s8626_s21 + $0xa4] ss:$24 sps:$4 sm:$0xff]  }
 0x1c3   : > { %2000 = vmatpush2.bf16.msra.mxu0 %v7040_v9  ;;  %v7065_v9 = vld [vmem:[%s8626_s21 + $0xd0] ss:$24 sps:$4 sm:$0xff]  }
 0x1c4   : > { %2001 = vmatprep.subr.bf16.mxu0 %v7044_v12  ;;  %2043 = vmatpush2.bf16.msra.mxu1 %v7043_v13  ;;  %v7068_v12 = vld [vmem:[%s8626_s21 + $0xa0] ss:$24 sps:$4 sm:$0xff]   ;;  %v7073_v13 = vld [vmem:[%s8626_s21 + $0x74] ss:$24 sps:$4 sm:$0xff]  }
 0x1c5   : > { %2044 = vmatprep.subr.bf16.mxu1 %v7047_v15  ;;  %v7076_v15 = vld [vmem:[%s8626_s21 + $0x44] ss:$24 sps:$4 sm:$0xff]  }
 0x1c7   : > { %2002 = vmatpush2.bf16.msra.mxu0 %v7046_v14  ;;  %v7071_v14 = vld [vmem:[%s8626_s21 + $0x70] ss:$24 sps:$4 sm:$0xff]  }
 0x1c8   : > { %2003 = vmatprep.subr.bf16.mxu0 %v7050_v16  ;;  %2045 = vmatpush2.bf16.msra.mxu1 %v7049_v17  ;;  %v7074_v16 = vld [vmem:[%s8626_s21 + $0x40] ss:$24 sps:$4 sm:$0xff]   ;;  %v7079_v17 = vld [vmem:[%s8626_s21 + $0x14] ss:$24 sps:$4 sm:$0xff]  }
 0x1c9   : > { %2046 = vmatprep.subr.bf16.mxu1 %v7053_v19  ;;  %v7082_v19 = vld [vmem:[%s8626_s21 + $0x2e4] ss:$24 sps:$4 sm:$0xff]  }
 0x1cb   : > { %2004 = vmatpush2.bf16.msra.mxu0 %v7052_v18  ;;  %v7077_v18 = vld [vmem:[%s8626_s21 + $0x10] ss:$24 sps:$4 sm:$0xff]  }
 0x1cc   : > { %2059 = vmatprep.subr.bf16.mxu0 %v7058_v20  ;;  %2047 = vmatpush2.bf16.msra.mxu1 %v7055_v21  ;;  %v7080_v20 = vld [vmem:[%s8626_s21 + $0x2e0] ss:$24 sps:$4 sm:$0xff]   ;;  %v7085_v21 = vld [vmem:[%s8626_s21 + $0x2b4] ss:$24 sps:$4 sm:$0xff]  }
 0x21e   : > { %v1296_v22 = vpop.xlane.xlu0 %1295 }
 0x21f   : > { %v1301_v23 = vmul.f32 0.00390625, %v1296_v22  ;;  %v7083_v22 = vld [vmem:[%s8626_s21 + $0x2b0] ss:$24 sps:$4 sm:$0xff]  }
 0x220   : > { %v1309_v24 = vpop.xlane.xlu1 %1308 }
 0x221   : > { %v1313_v25 = vmul.f32 0.00390625, %v1309_v24  ;;  %v1315_v26 = vmul.f32 %v1301_v23, %v1301_v23  ;;  %v1325_v44 = vsub.f32 %v8723_v5, %v1301_v23  ;;  %v1326_v45 = vsub.f32 %v8725_v6, %v1301_v23  ;;  %v7088_v23 = vld [vmem:[%s8626_s21 + $0x284] ss:$24 sps:$4 sm:$0xff]   ;;  %v7086_v24 = vld [vmem:[%s8626_s21 + $0x280] ss:$24 sps:$4 sm:$0xff]  }
 0x222   : > { %v1299_v27 = vpop.xlane.xlu0 %1298  ;;  %v1352_v5 = vrot.slane %v1293_v46, %v8815_v41 }
 0x223   : > { %v1317_v28 = vsub.f32 %v1313_v25, %v1315_v26  ;;  %v1302_v29 = vmul.f32 0.00390625, %v1299_v27  ;;  %v7091_v25 = vld [vmem:[%s8626_s21 + $0x254] ss:$24 sps:$4 sm:$0xff]   ;;  %v7089_v26 = vld [vmem:[%s8626_s21 + $0x250] ss:$24 sps:$4 sm:$0xff]  }
 0x224   : > { %v1312_v30 = vpop.xlane.xlu1 %1311  ;;  %v7094_v27 = vld [vmem:[%s8626_s21 + $0x224] ss:$24 sps:$4 sm:$0xff]  }
 0x225   : > { %v1319_v31 = vmax.f32 %v1317_v28, 0.0  ;;  %v1314_v32 = vmul.f32 0.00390625, %v1312_v30  ;;  %v1316_v33 = vmul.f32 %v1302_v29, %v1302_v29  ;;  %v1327_v51 = vsub.f32 %v8727_v7, %v1302_v29  ;;  %v7092_v28 = vld [vmem:[%s8626_s21 + $0x220] ss:$24 sps:$4 sm:$0xff]   ;;  %v7095_v30 = vld [vmem:[%s8626_s21 + $0x1f0] ss:$24 sps:$4 sm:$0xff]  }
 0x226   : > { %v1328_v52 = vsub.f32 %v8735_v11, %v1302_v29  ;;  %v7097_v29 = vld [vmem:[%s8626_s21 + $0x1f4] ss:$24 sps:$4 sm:$0xff]  }
 0x227   : > { %v1321_v34 = vadd.f32 1e-05, %v1319_v31  ;;  %v1318_v35 = vsub.f32 %v1314_v32, %v1316_v33  ;;  %v7100_v31 = vld [vmem:[%s8626_s21 + $0x1c4] ss:$24 sps:$4 sm:$0xff]   ;;  %v7098_v32 = vld [vmem:[%s8626_s21 + $0x1c0] ss:$24 sps:$4 sm:$0xff]  }
 0x228   : > { %v7103_v33 = vld [vmem:[%s8626_s21 + $0x194] ss:$24 sps:$4 sm:$0xff]  }
 0x229   : > { %7344 = vrsqrt.f32 %v1321_v34  ;;  %v1320_v36 = vmax.f32 %v1318_v35, 0.0  ;;  %v7101_v34 = vld [vmem:[%s8626_s21 + $0x190] ss:$24 sps:$4 sm:$0xff]   ;;  %v8174_v35 = vmov 0.0  }
 0x22a   : > { %6687 = vmatprep.subr.bf16.mxu1 %v8174_v35 }
 0x22b   : > { %v1322_v37 = vadd.f32 1e-05, %v1320_v36  ;;  %v8869_v36 = vsub.s32 2, %v8809_v39 }
 0x22d   : > { %7346 = vrsqrt.f32 %v1322_v37  ;;  %v8872_v37 = vld [vmem:[%s8638_s13] sm:$0x3f] }
 0x236   : > { %v7345_v43 = vpop.eup %7344 }
 0x237   : > { %v1330_v47 = vmul.f32 %v7345_v43, %v1326_v45  ;;  %v1329_v49 = vmul.f32 %v7345_v43, %v1325_v44  ;;  %v1474_v44 = vrot.slane %v8872_v37, %v8869_v36 }
 0x239   : > { %v1345_v55 = vmul.f32 %v1341_v48, %v1330_v47  ;;  %v1344_v57 = vmul.f32 %v1337_v50, %v1329_v49  ;;  %v1470_v47 = vrot.slane %v8872_v37, %v8812_v40 }
 0x23a   : > { %v7347_v53 = vpop.eup %7346 }
 0x23b   : > { %v1332_v6 = vmul.f32 %v7347_v53, %v1328_v52  ;;  %v1331_v56 = vmul.f32 %v7347_v53, %v1327_v51  ;;  %v1360_v60 = vadd.f32 %v1356_v54, %v1345_v55  ;;  %v1359_v7 = vadd.f32 %v1352_v5, %v1344_v57 }
 0x23d   : > { %v1347_v58 = vmul.f32 %v1341_v48, %v1332_v6  ;;  %v1346_v59 = vmul.f32 %v1337_v50, %v1331_v56  ;;  %v1466_v50 = vrot.slane %v8872_v37, %v8815_v41 }
 0x23f   : > { %v1362_v61 = vadd.f32 %v1356_v54, %v1347_v58  ;;  %v1361_v62 = vadd.f32 %v1352_v5, %v1346_v59 }
 0x241   : > { %v1364_v11 = vpack.c.bf16 %v1362_v61, %v1360_v60  ;;  %v8830_v0 = vpack.c.bf16 %v1361_v62, %v1359_v7  ;;  %v1481_v61 = vsub.s32 4, %v8809_v39 }
 0x243   : > { %2005 = vmatprep.mubr.bf16.mxu0 %v1364_v11  ;;  %2048 = vmatprep.mubr.bf16.mxu1 %v1364_v11  ;;  %v1482_v62 = vrot.slane %v8872_v37, %v1481_v61 }
 0x244   : > { %2006 = vmatmul.mubr.bf16.vlgmr.msra.gmra.mxu0 %v8830_v0  ;;  %2049 = vmatmul.mubr.bf16.vlgmr.msra.gmra.mxu1 %v8830_v0 }
 0x245   : > { %2060 = vmatpush1.bf16.msra.mxu0 %v7056_v63  ;;  %2091 = vmatprep.mubr.bf16.mxu0 %v1364_v11 }
 0x246   : > { %2061 = vmatprep.subr.bf16.mxu0 %v7061_v1  ;;  %6689 = vmatprep.mubr.msk.bf16.mxu1 %vm8175_vm0, %v8174_v35 }
 0x249   : > { %2062 = vmatpush1.bf16.msra.mxu0 %v7059_v2 }
 0x24a   : > { %2063 = vmatprep.subr.bf16.mxu0 %v7064_v3 }
 0x24d   : > { %2064 = vmatpush1.bf16.msra.mxu0 %v7062_v4  ;;  %v8908_v4 = vld [vmem:[%s9682_s12] sm:$0xff] }
 0x24e   : > { %2065 = vmatprep.subr.bf16.mxu0 %v7067_v8 }
 0x251   : > { %2066 = vmatpush1.bf16.msra.mxu0 %v7065_v9 }
 0x252   : > { %2067 = vmatprep.subr.bf16.mxu0 %v7070_v10 }
 0x255   : > { %2068 = vmatpush1.bf16.msra.mxu0 %v7068_v12  ;;  %v8914_v12 = vld [vmem:[%s9682_s12 + $0x8] sm:$0xff] }
 0x256   : > { %2069 = vmatprep.subr.bf16.mxu0 %v7073_v13 }
 0x259   : > { %2070 = vmatpush1.bf16.msra.mxu0 %v7071_v14 }
 0x25a   : > { %2071 = vmatprep.subr.bf16.mxu0 %v7076_v15 }
 0x25d   : > { %2072 = vmatpush1.bf16.msra.mxu0 %v7074_v16 }
 0x25e   : > { %2073 = vmatprep.subr.bf16.mxu0 %v7079_v17 }
 0x261   : > { %2074 = vmatpush1.bf16.msra.mxu0 %v7077_v18 }
 0x262   : > { %2075 = vmatprep.subr.bf16.mxu0 %v7082_v19 }
 0x265   : > { %2076 = vmatpush2.bf16.msra.mxu0 %v7080_v20 }
 0x266   : > { %2077 = vmatprep.subr.bf16.mxu0 %v7085_v21 }
 0x269   : > { %2078 = vmatpush2.bf16.msra.mxu0 %v7083_v22 }
 0x26a   : > { %2079 = vmatprep.subr.bf16.mxu0 %v7088_v23 }
 0x26d   : > { %2080 = vmatpush2.bf16.msra.mxu0 %v7086_v24 }
 0x26e   : > { %2081 = vmatprep.subr.bf16.mxu0 %v7091_v25 }
 0x271   : > { %2082 = vmatpush2.bf16.msra.mxu0 %v7089_v26 }
 0x272   : > { %2083 = vmatprep.subr.bf16.mxu0 %v7094_v27 }
 0x275   : > { %2084 = vmatpush2.bf16.msra.mxu0 %v7092_v28 }
 0x276   : > { %2085 = vmatprep.subr.bf16.mxu0 %v7097_v29 }
 0x279   : > { %2086 = vmatpush2.bf16.msra.mxu0 %v7095_v30 }
 0x27a   : > { %2087 = vmatprep.subr.bf16.mxu0 %v7100_v31 }
 0x27d   : > { %2088 = vmatpush2.bf16.msra.mxu0 %v7098_v32 }
 0x27e   : > { %2089 = vmatprep.subr.bf16.mxu0 %v7103_v33 }
 0x281   : > { %2090 = vmatpush2.bf16.msra.mxu0 %v7101_v34 }
 0x284   : > { %2092 = vmatmul.mubr.bf16.vlgmr.msra.gmra.mxu0 %v8830_v0 }
 0x304   : > { %v2007_v42 = vpop.f32.mrf.mxu0  ;;  %v2050_v43 = vpop.f32.mrf.mxu1 }
 0x305   : > { %v2051_v51 = vadd.f32 %v2050_v43, %v1474_v44  ;;  %v2008_v56 = vadd.f32 %v2007_v42, %v1466_v50 }
 0x306   : > { %v2009_v45 = vpop.f32.mrf.mxu0  ;;  %v8876_v46 = vpop.f32.mrf.mxu1 }
 0x307   : > { %v8882_v54 = vadd.f32 %v2009_v45, %v1470_v47 }
 0x308   : > { %v2011_v48 = vpop.f32.mrf.mxu0  ;;  %v2054_v49 = vpop.f32.mrf.mxu1 }
 0x309   : > { %v2055_v52 = vadd.f32 %v2054_v49, %v1474_v44  ;;  %v2012_v5 = vadd.f32 %v2011_v48, %v1466_v50 }
 0x30a   : > { %v2013_v53 = vpop.f32.mrf.mxu0  ;;  %v8903_v3 = vpop.f32.mrf.mxu1 }
 0x30b   : > { %v2104_v6 = vpack.c.bf16 %v2055_v52, %v2051_v51  ;;  %v8884_v55 = vadd.f32 %v2013_v53, %v1470_v47  ;;  %v2102_v59 = vpack.c.bf16 %v2012_v5, %v2008_v56 }
 0x30d   : > { %v2103_v57 = vpack.c.bf16 %v8884_v55, %v8882_v54  ;;  %v2114_v58 = vsel %vm2109_vm1, %v2104_v6, 0  ;;  %v2108_v60 = vmul.bf16 1040203264, %v2102_v59 }
 0x30e   : > { %6688 = vmatpush3.bf16.xpose.msra.mxu1 %v2114_v58 }
 0x30f   : > { %6693 = vmatprep.subr.bf16.mxu1 %v8174_v35 }
 0x315   : > { %6690 = vmatmul.mubr.msk.bf16.vlgmr.msra.gmra.mxu1 %vm2109_vm1, %v2108_v60 }
 0x316   : > { %6695 = vmatprep.mubr.msk.bf16.mxu1 %vm8175_vm0, %v8174_v35 }
 0x344   : > { %v2093_v7 = vpop.f32.mrf.mxu0 }
 0x345   : > { %v2094_v0 = vadd.f32 %v2093_v7, %v1482_v62 }
 0x346   : > { %v8897_v11 = vpop.f32.mrf.mxu0 }
 0x348   : > { %v2097_v63 = vpop.f32.mrf.mxu0 }
 0x349   : > { %v2098_v1 = vadd.f32 %v2097_v63, %v1482_v62 }
 0x34b   : > { %v8899_v2 = vpack.c.bf16 %v2098_v1, %v2094_v0 }
 0x34d   : > { %6694 = vmatpush3.bf16.msra.mxu1 %v8899_v2 }
 0x34e   : > { %6699 = vmatprep.subr.bf16.mxu1 %v8174_v35 }
 0x3d5   : > { %v2150_v8 = vpop.f32.mrf.mxu1 }
 0x3d6   : > { %v2151_v9 = vadd.f32 %v2150_v8, %v8908_v4 }
 0x3d7   : > { %v6691_v10 = vpop.f32.mrf.mxu1 }
 0x3d8   : > { %v2158_v13 = vsel %vm2157_vm2, %v2151_v9, -inf }
 0x3d9   : > { %2159 = vmax.xlane.f32.xlu0 %v2158_v13  ;;  %v2153_v14 = vpop.f32.mrf.mxu1  ;;  %v2349_v13 = vmul.bf16 1040203264, %v2103_v57 }
 0x3da   : > { %v2154_v15 = vadd.f32 %v2153_v14, %v8914_v12 }
 0x3db   : > { %v6692_v16 = vpop.f32.mrf.mxu1 }
 0x3dc   : > { %v2161_v17 = vsel %vm2157_vm2, %v2154_v15, -inf }
 0x3dd   : > { %2162 = vmax.xlane.f32.xlu1 %v2161_v17  ;;  %v8949_v17 = vsub.s32 3, %v8809_v39 }
 0x462   : > { %v2160_v18 = vpop.xlane.xlu0 %2159 }
 0x463   : > { %v2164_v19 = vsub.f32 %v2151_v9, %v2160_v18 }
 0x465   : > { %v2166_v20 = vmul.f32 1.442695, %v2164_v19 }
 0x466   : > { %v2163_v21 = vpop.xlane.xlu1 %2162 }
 0x467   : > { %7348 = vpow2.f32 %v2166_v20  ;;  %v2165_v22 = vsub.f32 %v2154_v15, %v2163_v21 }
 0x469   : > { %v2168_v23 = vmul.f32 1.442695, %v2165_v22  ;;  %v1485_v22 = vsub.s32 5, %v8809_v39 }
 0x46b   : > { %7350 = vpow2.f32 %v2168_v23 }
 0x474   : > { %v7349_v24 = vpop.eup %7348 }
 0x475   : > { %v2170_v25 = vsel %vm2157_vm2, %v7349_v24, 0.0 }
 0x476   : > { %2171 = vadd.xlane.f32.xlu0 %v2170_v25 }
 0x478   : > { %v7351_v26 = vpop.eup %7350 }
 0x479   : > { %v2173_v27 = vsel %vm2157_vm2, %v7351_v26, 0.0 }
 0x47a   : > { %2174 = vadd.xlane.f32.xlu1 %v2173_v27 }
 0x48b   : > { %2226 = vrot.lane.b32.xlu1 %v2108_v60, %s8176_s4 }
 0x48c   : > { %2229 = vrot.lane.b32.xlu0 %v2104_v6, %s8176_s4 }
 0x4ff   : > { %v2172_v28 = vpop.xlane.xlu0 %2171 }
 0x500   : > { %7352 = vrcp.f32 %v2172_v28 }
 0x503   : > { %v2175_v29 = vpop.xlane.xlu1 %2174  ;;  %v2230_v34 = vpop.permute.xlu0 %2229 }
 0x504   : > { %7354 = vrcp.f32 %v2175_v29  ;;  %v2235_v43 = vsel %vm2109_vm1, %v2230_v34, 0 }
 0x507   : > { %v2227_v44 = vpop.permute.xlu1 %2226 }
 0x50d   : > { %v7353_v30 = vpop.eup %7352 }
 0x50e   : > { %v2178_v32 = vmul.f32 %v7353_v30, %v7349_v24  ;;  %v2099_v24 = vpop.f32.mrf.mxu0 }
 0x511   : > { %v7355_v31 = vpop.eup %7354 }
 0x512   : > { %v2179_v33 = vmul.f32 %v7355_v31, %v7351_v26  ;;  %v1486_v26 = vrot.slane %v8872_v37, %v1485_v22 }
 0x514   : > { %v2180_v42 = vpack.c.bf16 %v2179_v33, %v2178_v32 }
 0x516   : > { %6696 = vmatmul.mubr.msk.bf16.vlgmr.msra.gmra.mxu1 %vm2157_vm2, %v2180_v42 }
 0x517   : > { %6700 = vmatpush3.bf16.xpose.msra.mxu1 %v2235_v43  ;;  %6701 = vmatprep.mubr.msk.bf16.mxu1 %vm8175_vm0, %v8174_v35 }
 0x518   : > { %6705 = vmatprep.subr.bf16.mxu1 %v8174_v35 }
 0x51e   : > { %6702 = vmatmul.mubr.msk.bf16.vlgmr.msra.gmra.mxu1 %vm2109_vm1, %v2227_v44 }
 0x51f   : > { %6707 = vmatprep.mubr.msk.bf16.mxu1 %vm8175_vm0, %v8174_v35 }
 0x5d6   : > { %v8931_v45 = vpop.f32.mrf.mxu1 }
 0x5d8   : > { %v6697_v47 = vpop.f32.mrf.mxu1 }
 0x5da   : > { %v8933_v48 = vpop.f32.mrf.mxu1 }
 0x5dc   : > { %v6698_v49 = vpop.f32.mrf.mxu1 }
 0x5de   : > { %v2271_v50 = vpop.f32.mrf.mxu1 }
 0x5df   : > { %v2272_v51 = vadd.f32 %v2271_v50, %v8908_v4 }
 0x5e0   : > { %v6703_v52 = vpop.f32.mrf.mxu1 }
 0x5e1   : > { %v2278_v53 = vsel %vm2157_vm2, %v2272_v51, -inf }
 0x5e2   : > { %2279 = vmax.xlane.f32.xlu1 %v2278_v53  ;;  %v2274_v5 = vpop.f32.mrf.mxu1 }
 0x5e3   : > { %v2275_v6 = vadd.f32 %v2274_v5, %v8914_v12 }
 0x5e4   : > { %v6704_v56 = vpop.f32.mrf.mxu1 }
 0x5e5   : > { %v2281_v58 = vsel %vm2157_vm2, %v2275_v6, -inf }
 0x5e6   : > { %2282 = vmax.xlane.f32.xlu0 %v2281_v58 }
 0x66b   : > { %v2280_v59 = vpop.xlane.xlu1 %2279 }
 0x66c   : > { %v2284_v60 = vsub.f32 %v2272_v51, %v2280_v59 }
 0x66e   : > { %v2286_v7 = vmul.f32 1.442695, %v2284_v60 }
 0x66f   : > { %v2283_v62 = vpop.xlane.xlu0 %2282 }
 0x670   : > { %7356 = vpow2.f32 %v2286_v7  ;;  %v2285_v63 = vsub.f32 %v2275_v6, %v2283_v62 }
 0x672   : > { %v2288_v0 = vmul.f32 1.442695, %v2285_v63 }
 0x674   : > { %7358 = vpow2.f32 %v2288_v0 }
 0x67d   : > { %v7357_v1 = vpop.eup %7356 }
 0x67e   : > { %v2290_v8 = vsel %vm2157_vm2, %v7357_v1, 0.0 }
 0x67f   : > { %2291 = vadd.xlane.f32.xlu0 %v2290_v8 }
 0x681   : > { %v7359_v9 = vpop.eup %7358 }
 0x682   : > { %v2293_v10 = vsel %vm2157_vm2, %v7359_v9, 0.0 }
 0x683   : > { %2294 = vadd.xlane.f32.xlu1 %v2293_v10 }
 0x695   : > { %2302 = vrot.lane.b32.xlu0 %v8899_v2, %s8176_s4  ;;  %v1478_v2 = vrot.slane %v8872_v37, %v8949_v17 }
 0x697   : > { %v2057_v18 = vadd.f32 %v8903_v3, %v1478_v2  ;;  %v2053_v55 = vadd.f32 %v8876_v46, %v1478_v2  ;;  %v2100_v46 = vadd.f32 %v2099_v24, %v1486_v26  ;;  %v2096_v3 = vadd.f32 %v8897_v11, %v1486_v26 }
 0x699   : > { %2465 = vrot.lane.b32.xlu0 %v2349_v13, %s8176_s4  ;;  %v2105_v19 = vpack.c.bf16 %v2057_v18, %v2053_v55  ;;  %v8965_v27 = vpack.c.bf16 %v2100_v46, %v2096_v3 }
 0x69b   : > { %v2354_v25 = vsel %vm2109_vm1, %v2105_v19, 0 }
 0x708   : > { %v2292_v14 = vpop.xlane.xlu0 %2291 }
 0x709   : > { %7360 = vrcp.f32 %v2292_v14 }
 0x70c   : > { %v2295_v15 = vpop.xlane.xlu1 %2294  ;;  %v2303_v16 = vpop.permute.xlu0 %2302 }
 0x70d   : > { %7362 = vrcp.f32 %v2295_v15  ;;  %6706 = vmatpush3.bf16.msra.mxu1 %v2303_v16 }
 0x70e   : > { %6711 = vmatprep.subr.bf16.mxu1 %v8174_v35 }
 0x716   : > { %v7361_v54 = vpop.eup %7360 }
 0x717   : > { %v2298_v20 = vmul.f32 %v7361_v54, %v7357_v1 }
 0x71a   : > { %v7363_v57 = vpop.eup %7362 }
 0x71b   : > { %v2299_v21 = vmul.f32 %v7363_v57, %v7359_v9 }
 0x71d   : > { %v2300_v23 = vpack.c.bf16 %v2299_v21, %v2298_v20 }
 0x71f   : > { %6708 = vmatmul.mubr.msk.bf16.vlgmr.msra.gmra.mxu1 %vm2157_vm2, %v2300_v23 }
 0x720   : > { %6712 = vmatpush3.bf16.xpose.msra.mxu1 %v2354_v25  ;;  %6713 = vmatprep.mubr.msk.bf16.mxu1 %vm8175_vm0, %v8174_v35 }
 0x721   : > { %6717 = vmatprep.subr.bf16.mxu1 %v8174_v35 }
 0x727   : > { %6714 = vmatmul.mubr.msk.bf16.vlgmr.msra.gmra.mxu1 %vm2109_vm1, %v2349_v13  ;;  %v2466_v13 = vpop.permute.xlu0 %2465 }
 0x728   : > { %6718 = vmatpush3.bf16.msra.mxu1 %v8965_v27  ;;  %6719 = vmatprep.mubr.msk.bf16.mxu1 %vm8175_vm0, %v8174_v35 }
 0x729   : > { %6723 = vmatprep.subr.bf16.mxu1 %v8174_v35 }
 0x7df   : > { %v8972_v37 = vpop.f32.mrf.mxu1 }
 0x7e1   : > { %v6709_v28 = vpop.f32.mrf.mxu1 }
 0x7e3   : > { %v8974_v29 = vpop.f32.mrf.mxu1 }
 0x7e4   : > { %v6955_v30 = vpack.i.bf16 %v8974_v29, %v8972_v37 }
 0x7e5   : > { %v6710_v11 = vpop.f32.mrf.mxu1 }
 0x7e7   : > { %v2390_v31 = vpop.f32.mrf.mxu1 }
 0x7e8   : > { %v2391_v32 = vadd.f32 %v2390_v31, %v8908_v4 }
 0x7e9   : > { %v6715_v33 = vpop.f32.mrf.mxu1 }
 0x7ea   : > { %v2397_v34 = vsel %vm2157_vm2, %v2391_v32, -inf }
 0x7eb   : > { %2398 = vmax.xlane.f32.xlu1 %v2397_v34  ;;  %v2393_v42 = vpop.f32.mrf.mxu1 }
 0x7ec   : > { %v2394_v43 = vadd.f32 %v2393_v42, %v8914_v12 }
 0x7ed   : > { %v6716_v44 = vpop.f32.mrf.mxu1 }
 0x7ee   : > { %v2400_v47 = vsel %vm2157_vm2, %v2394_v43, -inf }
 0x7ef   : > { %2401 = vmax.xlane.f32.xlu1 %v2400_v47 }
 0x874   : > { %v2399_v49 = vpop.xlane.xlu1 %2398 }
 0x875   : > { %v2403_v50 = vsub.f32 %v2391_v32, %v2399_v49  ;;  %v7106_v49 = vld [vmem:[%s8648_s15 + $0x74] ss:$8 sps:$4 sm:$0xff]  }
 0x876   : > { %2814 = vmatprep.subr.bf16.mxu0 %v7106_v49  ;;  %v2981_v49 = vld [vmem:[%s8672_s1 + $0x180] sm:$0xff] }
 0x877   : > { %v2405_v51 = vmul.f32 1.442695, %v2403_v50  ;;  %v7109_v50 = vld [vmem:[%s8648_s15 + $0x64] ss:$8 sps:$4 sm:$0xff]  }
 0x878   : > { %v2402_v52 = vpop.xlane.xlu1 %2401 }
 0x879   : > { %7364 = vpow2.f32 %v2405_v51  ;;  %v2404_v53 = vsub.f32 %v2394_v43, %v2402_v52  ;;  %v7107_v51 = vld [vmem:[%s8648_s15 + $0x60] ss:$8 sps:$4 sm:$0xff]   ;;  %v7112_v52 = vld [vmem:[%s8648_s15 + $0x54] ss:$8 sps:$4 sm:$0xff]  }
 0x87b   : > { %v2407_v5 = vmul.f32 1.442695, %v2404_v53  ;;  %v7110_v53 = vld [vmem:[%s8648_s15 + $0x50] ss:$8 sps:$4 sm:$0xff]  }
 0x87d   : > { %7366 = vpow2.f32 %v2407_v5  ;;  %v7115_v5 = vld [vmem:[%s8648_s15 + $0x44] ss:$8 sps:$4 sm:$0xff]  }
 0x886   : > { %v7365_v6 = vpop.eup %7364 }
 0x887   : > { %v2409_v56 = vsel %vm2157_vm2, %v7365_v6, 0.0 }
 0x888   : > { %2410 = vadd.xlane.f32.xlu1 %v2409_v56  ;;  %v7118_v56 = vld [vmem:[%s8648_s15 + $0x34] ss:$8 sps:$4 sm:$0xff]  }
 0x88a   : > { %v7367_v58 = vpop.eup %7366 }
 0x88b   : > { %v2412_v59 = vsel %vm2157_vm2, %v7367_v58, 0.0 }
 0x88c   : > { %2413 = vadd.xlane.f32.xlu1 %v2412_v59  ;;  %v7121_v59 = vld [vmem:[%s8648_s15 + $0x24] ss:$8 sps:$4 sm:$0xff]  }
 0x89d   : > { %2468 = vrot.lane.b32.xlu1 %v2105_v19, %s8176_s4 }
 0x911   : > { %v2411_v60 = vpop.xlane.xlu1 %2410 }
 0x912   : > { %7368 = vrcp.f32 %v2411_v60  ;;  %v7119_v60 = vld [vmem:[%s8648_s15 + $0x20] ss:$8 sps:$4 sm:$0xff]  }
 0x915   : > { %v2414_v7 = vpop.xlane.xlu1 %2413 }
 0x916   : > { %7370 = vrcp.f32 %v2414_v7  ;;  %v7124_v7 = vld [vmem:[%s8648_s15 + $0x14] ss:$8 sps:$4 sm:$0xff]  }
 0x919   : > { %v2469_v8 = vpop.permute.xlu1 %2468 }
 0x91a   : > { %v2474_v10 = vsel %vm2109_vm1, %v2469_v8, 0  ;;  %v7128_v8 = vld [vmem:[%s8648_s15 + $0xf0] ss:$8 sps:$4 sm:$0xff]  }
 0x91f   : > { %v7369_v62 = vpop.eup %7368 }
 0x920   : > { %v2417_v0 = vmul.f32 %v7369_v62, %v7365_v6  ;;  %v7113_v6 = vld [vmem:[%s8648_s15 + $0x40] ss:$8 sps:$4 sm:$0xff]   ;;  %v7122_v62 = vld [vmem:[%s8648_s15 + $0x10] ss:$8 sps:$4 sm:$0xff]  }
 0x923   : > { %v7371_v63 = vpop.eup %7370 }
 0x924   : > { %v2418_v1 = vmul.f32 %v7371_v63, %v7367_v58  ;;  %v7116_v58 = vld [vmem:[%s8648_s15 + $0x30] ss:$8 sps:$4 sm:$0xff]   ;;  %v7127_v63 = vld [vmem:[%s8648_s15 + $0x4] ss:$8 sps:$4 sm:$0xff]  }
 0x926   : > { %v2419_v9 = vpack.c.bf16 %v2418_v1, %v2417_v0  ;;  %v7125_v0 = vld [vmem:[%s8648_s15] ss:$8 sps:$4 sm:$0xff]   ;;  %v7130_v1 = vld [vmem:[%s8648_s15 + $0xf4] ss:$8 sps:$4 sm:$0xff]  }
 0x928   : > { %6720 = vmatmul.mubr.msk.bf16.vlgmr.msra.gmra.mxu1 %vm2157_vm2, %v2419_v9  ;;  %v7133_v9 = vld [vmem:[%s8648_s15 + $0xe4] ss:$8 sps:$4 sm:$0xff]  }
 0x929   : > { %6724 = vmatpush3.bf16.xpose.msra.mxu1 %v2474_v10  ;;  %6725 = vmatprep.mubr.msk.bf16.mxu1 %vm8175_vm0, %v8174_v35  ;;  %v7131_v10 = vld [vmem:[%s8648_s15 + $0xe0] ss:$8 sps:$4 sm:$0xff]  }
 0x92a   : > { %6729 = vmatprep.subr.bf16.mxu1 %v8174_v35 }
 0x930   : > { %6726 = vmatmul.mubr.msk.bf16.vlgmr.msra.gmra.mxu1 %vm2109_vm1, %v2466_v13  ;;  %v7136_v13 = vld [vmem:[%s8648_s15 + $0xd4] ss:$8 sps:$4 sm:$0xff]  }
 0x931   : > { %6731 = vmatprep.mubr.msk.bf16.mxu1 %vm8175_vm0, %v8174_v35 }
 0x9e8   : > { %v8993_v14 = vpop.f32.mrf.mxu1 }
 0x9ea   : > { %v6721_v15 = vpop.f32.mrf.mxu1 }
 0x9eb   : > { %v7134_v15 = vld [vmem:[%s8648_s15 + $0xd0] ss:$8 sps:$4 sm:$0xff]  }
 0x9ec   : > { %v8995_v16 = vpop.f32.mrf.mxu1 }
 0x9ee   : > { %v6722_v2 = vpop.f32.mrf.mxu1 }
 0x9ef   : > { %v7139_v2 = vld [vmem:[%s8648_s15 + $0xc4] ss:$8 sps:$4 sm:$0xff]  }
 0x9f0   : > { %v2510_v18 = vpop.f32.mrf.mxu1 }
 0x9f1   : > { %v2511_v54 = vadd.f32 %v2510_v18, %v8908_v4  ;;  %v7137_v18 = vld [vmem:[%s8648_s15 + $0xc0] ss:$8 sps:$4 sm:$0xff]  }
 0x9f2   : > { %v6727_v55 = vpop.f32.mrf.mxu1 }
 0x9f3   : > { %v2517_v57 = vsel %vm2157_vm2, %v2511_v54, -inf  ;;  %v7140_v55 = vld [vmem:[%s8648_s15 + $0xb0] ss:$8 sps:$4 sm:$0xff]  }
 0x9f4   : > { %2518 = vmax.xlane.f32.xlu0 %v2517_v57  ;;  %v2513_v19 = vpop.f32.mrf.mxu1  ;;  %v7145_v57 = vld [vmem:[%s8648_s15 + $0xa4] ss:$8 sps:$4 sm:$0xff]  }
 0x9f5   : > { %v2514_v20 = vadd.f32 %v2513_v19, %v8914_v12  ;;  %v7143_v19 = vld [vmem:[%s8648_s15 + $0xa0] ss:$8 sps:$4 sm:$0xff]  }
 0x9f6   : > { %v6728_v21 = vpop.f32.mrf.mxu1 }
 0x9f7   : > { %v2520_v23 = vsel %vm2157_vm2, %v2514_v20, -inf  ;;  %v7148_v21 = vld [vmem:[%s8648_s15 + $0x94] ss:$8 sps:$4 sm:$0xff]  }
 0x9f8   : > { %2521 = vmax.xlane.f32.xlu1 %v2520_v23  ;;  %v7151_v23 = vld [vmem:[%s8648_s15 + $0x84] ss:$8 sps:$4 sm:$0xff]  }
 0xa7d   : > { %v2519_v35 = vpop.xlane.xlu0 %2518 }
 0xa7e   : > { %v2523_v24 = vsub.f32 %v2511_v54, %v2519_v35  ;;  %v7142_v54 = vld [vmem:[%s8648_s15 + $0xb4] ss:$8 sps:$4 sm:$0xff]   ;;  %v7149_v35 = vld [vmem:[%s8648_s15 + $0x80] ss:$8 sps:$4 sm:$0xff]  }
 0xa80   : > { %v2525_v25 = vmul.f32 1.442695, %v2523_v24 }
 0xa81   : > { %v2522_v26 = vpop.xlane.xlu1 %2521 }
 0xa82   : > { %7372 = vpow2.f32 %v2525_v25  ;;  %v2524_v46 = vsub.f32 %v2514_v20, %v2522_v26  ;;  %v7146_v20 = vld [vmem:[%s8648_s15 + $0x90] ss:$8 sps:$4 sm:$0xff]  }
 0xa84   : > { %v2527_v3 = vmul.f32 1.442695, %v2524_v46 }
 0xa86   : > { %7374 = vpow2.f32 %v2527_v3 }
 0xa8f   : > { %v7373_v4 = vpop.eup %7372 }
 0xa90   : > { %v2529_v28 = vsel %vm2157_vm2, %v7373_v4, 0.0 }
 0xa91   : > { %2530 = vadd.xlane.f32.xlu0 %v2529_v28 }
 0xa93   : > { %v7375_v11 = vpop.eup %7374 }
 0xa94   : > { %v2532_v12 = vsel %vm2157_vm2, %v7375_v11, 0.0 }
 0xa95   : > { %2533 = vadd.xlane.f32.xlu0 %v2532_v12 }
 0xaab   : > { %2541 = vrot.lane.b32.xlu0 %v8965_v27, %s8176_s4  ;;  %v7104_v27 = vld [vmem:[%s8648_s15 + $0x70] ss:$8 sps:$4 sm:$0xff]   ;;  %s9683_s15 = scalar_lea.vmem [#allocation9], %s8646_s27 }
 0xaac   : > { %2815 = vmatpush1.bf16.msra.mxu0 %v7104_v27  ;;  %v2994_v27 = vld [vmem:[%s8672_s1 + $0x1e8] sm:$0xff] }
 0xaad   : > { %2816 = vmatprep.subr.bf16.mxu0 %v7109_v50  ;;  %v2985_v50 = vld [vmem:[%s8672_s1 + $0x1a0] sm:$0xff] }
 0xab0   : > { %2817 = vmatpush1.bf16.msra.mxu0 %v7107_v51 }
 0xab1   : > { %2818 = vmatprep.subr.bf16.mxu0 %v7112_v52  ;;  %v6377_v52 = vcombine.high %v2981_v49, %v2985_v50 }
 0xab4   : > { %2819 = vmatpush1.bf16.msra.mxu0 %v7110_v53  ;;  %v2982_v53 = vld [vmem:[%s8672_s1 + $0x188] sm:$0xff] }
 0xab5   : > { %2820 = vmatprep.subr.bf16.mxu0 %v7115_v5  ;;  %v2986_v5 = vld [vmem:[%s8672_s1 + $0x1a8] sm:$0xff] }
 0xab8   : > { %2821 = vmatpush1.bf16.msra.mxu0 %v7113_v6  ;;  %v6379_v6 = vcombine.high %v2982_v53, %v2986_v5 }
 0xab9   : > { %2822 = vmatprep.subr.bf16.mxu0 %v7118_v56  ;;  %v2977_v56 = vld [vmem:[%s8672_s1 + $0x160] sm:$0xff] }
 0xabc   : > { %2823 = vmatpush1.bf16.msra.mxu0 %v7116_v58  ;;  %v2974_v58 = vld [vmem:[%s8672_s1 + $0x148] sm:$0xff] }
 0xabd   : > { %2824 = vmatprep.subr.bf16.mxu0 %v7121_v59  ;;  %v2978_v59 = vld [vmem:[%s8672_s1 + $0x168] sm:$0xff] }
 0xac0   : > { %2825 = vmatpush1.bf16.msra.mxu0 %v7119_v60  ;;  %v6376_v60 = vcombine.low %v2981_v49, %v2985_v50 }
 0xac1   : > { %2826 = vmatprep.subr.bf16.mxu0 %v7124_v7  ;;  %v6378_v7 = vcombine.low %v2982_v53, %v2986_v5 }
 0xac4   : > { %2827 = vmatpush1.bf16.msra.mxu0 %v7122_v62 }
 0xac5   : > { %2828 = vmatprep.subr.bf16.mxu0 %v7127_v63  ;;  %v6371_v63 = vcombine.high %v2974_v58, %v2978_v59 }
 0xac8   : > { %2829 = vmatpush1.bf16.msra.mxu0 %v7125_v0  ;;  %v2965_v0 = vld [vmem:[%s8672_s1 + $0x100] sm:$0xff] }
 0xac9   : > { %2830 = vmatprep.subr.bf16.mxu0 %v7130_v1  ;;  %v2969_v1 = vld [vmem:[%s8672_s1 + $0x120] sm:$0xff] }
 0xacc   : > { %2831 = vmatpush2.bf16.msra.mxu0 %v7128_v8  ;;  %v2966_v8 = vld [vmem:[%s8672_s1 + $0x108] sm:$0xff] }
 0xacd   : > { %2832 = vmatprep.subr.bf16.mxu0 %v7133_v9  ;;  %v2970_v9 = vld [vmem:[%s8672_s1 + $0x128] sm:$0xff] }
 0xad0   : > { %2833 = vmatpush2.bf16.msra.mxu0 %v7131_v10 }
 0xad1   : > { %2834 = vmatprep.subr.bf16.mxu0 %v7136_v13  ;;  %v6370_v13 = vcombine.low %v2974_v58, %v2978_v59  ;;  %v7418_v59 = vld [vmem:[#allocation2 + $0x18] sm:$0xff] }
 0xad4   : > { %2835 = vmatpush2.bf16.msra.mxu0 %v7134_v15  ;;  %v6361_v15 = vcombine.high %v2965_v0, %v2969_v1 }
 0xad5   : > { %2836 = vmatprep.subr.bf16.mxu0 %v7139_v2  ;;  %v6363_v2 = vcombine.high %v2966_v8, %v2970_v9 }
 0xad8   : > { %2837 = vmatpush2.bf16.msra.mxu0 %v7137_v18  ;;  %v2957_v18 = vld [vmem:[%s8672_s1 + $0xc0] sm:$0xff] }
 0xad9   : > { %2838 = vmatprep.subr.bf16.mxu0 %v7142_v54  ;;  %v2961_v54 = vld [vmem:[%s8672_s1 + $0xe0] sm:$0xff] }
 0xadc   : > { %2839 = vmatpush2.bf16.msra.mxu0 %v7140_v55  ;;  %v2958_v55 = vld [vmem:[%s8672_s1 + $0xc8] sm:$0xff] }
 0xadd   : > { %2840 = vmatprep.subr.bf16.mxu0 %v7145_v57  ;;  %v2962_v57 = vld [vmem:[%s8672_s1 + $0xe8] sm:$0xff] }
 0xae0   : > { %2841 = vmatpush2.bf16.msra.mxu0 %v7143_v19  ;;  %v6360_v19 = vcombine.low %v2965_v0, %v2969_v1 }
 0xae1   : > { %2842 = vmatprep.subr.bf16.mxu0 %v7148_v21  ;;  %v6353_v21 = vcombine.high %v2957_v18, %v2961_v54 }
 0xae4   : > { %2843 = vmatpush2.bf16.msra.mxu0 %v7146_v20  ;;  %v6362_v20 = vcombine.low %v2966_v8, %v2970_v9 }
 0xae5   : > { %2844 = vmatprep.subr.bf16.mxu0 %v7151_v23  ;;  %v6355_v23 = vcombine.high %v2958_v55, %v2962_v57 }
 0xae8   : > { %2845 = vmatpush2.bf16.msra.mxu0 %v7149_v35  ;;  %v2949_v35 = vld [vmem:[%s8672_s1 + $0x80] sm:$0xff] }
 0xb1a   : > { %v2531_v31 = vpop.xlane.xlu0 %2530 }
 0xb1b   : > { %7376 = vrcp.f32 %v2531_v31 }
 0xb1e   : > { %v2534_v32 = vpop.xlane.xlu0 %2533 }
 0xb1f   : > { %7378 = vrcp.f32 %v2534_v32 }
 0xb22   : > { %v2542_v33 = vpop.permute.xlu0 %2541 }
 0xb23   : > { %6730 = vmatpush3.bf16.msra.mxu1 %v2542_v33 }
 0xb28   : > { %v7377_v34 = vpop.eup %7376 }
 0xb29   : > { %v2537_v43 = vmul.f32 %v7377_v34, %v7373_v4 }
 0xb2c   : > { %v7379_v42 = vpop.eup %7378 }
 0xb2d   : > { %v2538_v44 = vmul.f32 %v7379_v42, %v7375_v11  ;;  %v2989_v42 = vld [vmem:[%s8672_s1 + $0x1c0] sm:$0xff] }
 0xb2f   : > { %v2539_v47 = vpack.c.bf16 %v2538_v44, %v2537_v43  ;;  %v2990_v43 = vld [vmem:[%s8672_s1 + $0x1c8] sm:$0xff] }
 0xb30   : > { %v6386_v51 = vcombine.low %v2990_v43, %v2994_v27 }
 0xb31   : > { %6732 = vmatmul.mubr.msk.bf16.vlgmr.msra.gmra.mxu1 %vm2157_vm2, %v2539_v47 }
 0xbf1   : > { %v2581_v24 = vpop.f32.mrf.mxu1 }
 0xbf3   : > { %v6733_v25 = vpop.f32.mrf.mxu1 }
 0xbf4   : > { %v2950_v25 = vld [vmem:[%s8672_s1 + $0x88] sm:$0xff] }
 0xbf5   : > { %v2584_v26 = vpop.f32.mrf.mxu1 }
 0xbf6   : > { %v6950_v46 = vpack.i.bf16 %v2584_v26, %v2581_v24  ;;  %v2953_v24 = vld [vmem:[%s8672_s1 + $0xa0] sm:$0xff]  ;;  %v2954_v26 = vld [vmem:[%s8672_s1 + $0xa8] sm:$0xff] }
 0xbf7   : > { %v6734_v3 = vpop.f32.mrf.mxu1 }
 0xbf8   : > { %6951 = vrot.lane.b32.xlu1 %v6950_v46, %s8176_s4  ;;  %v6352_v46 = vcombine.low %v2957_v18, %v2961_v54  ;;  %v6354_v3 = vcombine.low %v2958_v55, %v2962_v57  ;;  %v2938_v54 = vld [vmem:[%s8672_s1 + $0x28] sm:$0xff] }
 0xbfc   : > { %6956 = vrot.lane.b32.xlu1 %v6955_v30, %s8176_s4 }
 0xc6a   : > { %v6952_v4 = vpop.permute.xlu1 %6951 }
 0xc6b   : > { %v6954_v28 = vunpack.i.h.bf16 %v6952_v4  ;;  %v6953_v11 = vunpack.i.l.bf16 %v6952_v4  ;;  %v6345_v4 = vcombine.high %v2949_v35, %v2953_v24 }
 0xc6d   : > { %v2606_v12 = vsel %vm2109_vm1, %v8993_v14, %v6953_v11  ;;  %v2607_v31 = vsel %vm2109_vm1, %v8995_v16, %v6954_v28  ;;  %v2993_v16 = vld [vmem:[%s8672_s1 + $0x1e0] sm:$0xff]  ;;  %v6347_v28 = vcombine.high %v2950_v25, %v2954_v26 }
 0xc6e   : > { %v6957_v32 = vpop.permute.xlu1 %6956  ;;  %v2609_v33 = vpack.c.bf16 %v2607_v31, %v2606_v12  ;;  %v6384_v44 = vcombine.low %v2989_v42, %v2993_v16  ;;  %v6385_v47 = vcombine.high %v2989_v42, %v2993_v16  ;;  %v2941_v11 = vld [vmem:[%s8672_s1 + $0x40] sm:$0xff]  ;;  %v2942_v31 = vld [vmem:[%s8672_s1 + $0x48] sm:$0xff] }
 0xc6f   : > { %v6959_v34 = vunpack.i.h.bf16 %v6957_v32  ;;  %v6958_v37 = vunpack.i.l.bf16 %v6957_v32  ;;  %v2945_v12 = vld [vmem:[%s8672_s1 + $0x60] sm:$0xff]  ;;  %v2946_v32 = vld [vmem:[%s8672_s1 + $0x68] sm:$0xff] }
 0xc70   : > { %2846 = vmatprep.mubr.bf16.mxu0 %v2609_v33  ;;  %3743 = vmatprep.subr.bf16.mxu1 %v6385_v47  ;;  %v6344_v33 = vcombine.low %v2949_v35, %v2953_v24  ;;  %v2642_v42 = vld [vmem:[%s9683_s15] sm:$0x3] }
 0xc71   : > { %v2605_v29 = vsel %vm2109_vm1, %v8933_v48, %v6959_v34  ;;  %v2604_v30 = vsel %vm2109_vm1, %v8931_v45, %v6958_v37  ;;  %v6387_v48 = vcombine.high %v2990_v43, %v2994_v27  ;;  %v2973_v45 = vld [vmem:[%s8672_s1 + $0x140] sm:$0xff]  ;;  %3744 = vmatpush1.bf16.msra.mxu1 %v6384_v44  ;;  %v6346_v34 = vcombine.low %v2950_v25, %v2954_v26  ;;  %v3058_v24 = vld [vmem:[%s8672_s1 + $0x3e8] sm:$0xff] }
 0xc72   : > { %v2608_v14 = vpack.c.bf16 %v2605_v29, %v2604_v30  ;;  %3745 = vmatprep.subr.bf16.mxu1 %v6377_v52  ;;  %v6369_v62 = vcombine.high %v2973_v45, %v2977_v56  ;;  %v6368_v10 = vcombine.low %v2973_v45, %v2977_v56  ;;  %v6337_v37 = vcombine.high %v2941_v11, %v2945_v12  ;;  %v7417_v52 = vld [vmem:[#allocation2] sm:$0xff] }
 0xc73   : > { %3786 = vmatprep.subr.bf16.mxu0 %v6387_v48  ;;  %v6339_v29 = vcombine.high %v2942_v31, %v2946_v32  ;;  %v6336_v30 = vcombine.low %v2941_v11, %v2945_v12  ;;  %v2647_v16 = vrot.slane %v2642_v42, %v8815_v41  ;;  %v2651_v43 = vrot.slane %v2642_v42, %v8812_v40  ;;  %v3050_v12 = vld [vmem:[%s8672_s1 + $0x3a8] sm:$0xff] }
 0xc74   : > { %2847 = vmatmul.mubr.bf16.vlgmr.msra.gmra.mxu0 %v2608_v14  ;;  %v6338_v14 = vcombine.low %v2942_v31, %v2946_v32 }
 0xc75   : > { %3787 = vmatpush1.bf16.msra.mxu0 %v6386_v51  ;;  %3746 = vmatpush1.bf16.msra.mxu1 %v6376_v60  ;;  %v7416_v51 = vld [vmem:[#allocation2 + $0x10] sm:$0xff] }
 0xc76   : > { %3788 = vmatprep.subr.bf16.mxu0 %v6379_v6  ;;  %3747 = vmatprep.subr.bf16.mxu1 %v6369_v62 }
 0xc79   : > { %3789 = vmatpush1.bf16.msra.mxu0 %v6378_v7  ;;  %3748 = vmatpush1.bf16.msra.mxu1 %v6368_v10  ;;  %v7419_v7 = vld [vmem:[#allocation2 + $0x8] sm:$0xff] }
 0xc7a   : > { %3790 = vmatprep.subr.bf16.mxu0 %v6371_v63  ;;  %3749 = vmatprep.subr.bf16.mxu1 %v6361_v15  ;;  %v2937_v15 = vld [vmem:[%s8672_s1 + $0x20] sm:$0xff] }
 0xc7d   : > { %3791 = vmatpush1.bf16.msra.mxu0 %v6370_v13  ;;  %3750 = vmatpush1.bf16.msra.mxu1 %v6360_v19  ;;  %v2933_v13 = vld [vmem:[%s8672_s1] sm:$0xff] }
 0xc7e   : > { %3792 = vmatprep.subr.bf16.mxu0 %v6363_v2  ;;  %3751 = vmatprep.subr.bf16.mxu1 %v6353_v21  ;;  %v2934_v2 = vld [vmem:[%s8672_s1 + $0x8] sm:$0xff]  ;;  %v6329_v18 = vcombine.high %v2933_v13, %v2937_v15  ;;  %v6328_v55 = vcombine.low %v2933_v13, %v2937_v15  ;;  %v3057_v21 = vld [vmem:[%s8672_s1 + $0x3e0] sm:$0xff] }
 0xc7f   : > { %v6330_v57 = vcombine.low %v2934_v2, %v2938_v54  ;;  %v6331_v19 = vcombine.high %v2934_v2, %v2938_v54  ;;  %v3005_v2 = vld [vmem:[%s8672_s1 + $0x240] sm:$0xff]  ;;  %v3006_v54 = vld [vmem:[%s8672_s1 + $0x248] sm:$0xff] }
 0xc81   : > { %3793 = vmatpush1.bf16.msra.mxu0 %v6362_v20  ;;  %3752 = vmatpush1.bf16.msra.mxu1 %v6352_v46  ;;  %v3053_v20 = vld [vmem:[%s8672_s1 + $0x3c0] sm:$0xff] }
 0xc82   : > { %3794 = vmatprep.subr.bf16.mxu0 %v6355_v23  ;;  %3753 = vmatprep.subr.bf16.mxu1 %v6345_v4  ;;  %v3054_v23 = vld [vmem:[%s8672_s1 + $0x3c8] sm:$0xff]  ;;  %v6449_v35 = vcombine.high %v3053_v20, %v3057_v21  ;;  %v6448_v25 = vcombine.low %v3053_v20, %v3057_v21  ;;  %v3049_v4 = vld [vmem:[%s8672_s1 + $0x3a0] sm:$0xff] }
 0xc83   : > { %v6450_v26 = vcombine.low %v3054_v23, %v3058_v24  ;;  %v6451_v46 = vcombine.high %v3054_v23, %v3058_v24  ;;  %v2997_v23 = vld [vmem:[%s8672_s1 + $0x200] sm:$0xff]  ;;  %v2998_v24 = vld [vmem:[%s8672_s1 + $0x208] sm:$0xff] }
 0xc85   : > { %3795 = vmatpush1.bf16.msra.mxu0 %v6354_v3  ;;  %3754 = vmatpush1.bf16.msra.mxu1 %v6344_v33  ;;  %v3045_v3 = vld [vmem:[%s8672_s1 + $0x380] sm:$0xff] }
 0xc86   : > { %3796 = vmatprep.subr.bf16.mxu0 %v6347_v28  ;;  %3755 = vmatprep.subr.bf16.mxu1 %v6337_v37  ;;  %v3046_v28 = vld [vmem:[%s8672_s1 + $0x388] sm:$0xff]  ;;  %v6441_v11 = vcombine.high %v3045_v3, %v3049_v4  ;;  %v6440_v31 = vcombine.low %v3045_v3, %v3049_v4  ;;  %v3041_v37 = vld [vmem:[%s8672_s1 + $0x360] sm:$0xff] }
 0xc87   : > { %v6442_v32 = vcombine.low %v3046_v28, %v3050_v12  ;;  %v6443_v33 = vcombine.high %v3046_v28, %v3050_v12  ;;  %v9140_v12 = vld [vmem:[%s8672_s1 + $0x1d0] sm:$0xff] }
 0xc89   : > { %3797 = vmatpush1.bf16.msra.mxu0 %v6346_v34  ;;  %3756 = vmatpush1.bf16.msra.mxu1 %v6336_v30  ;;  %v3037_v34 = vld [vmem:[%s8672_s1 + $0x340] sm:$0xff] }
 0xc8a   : > { %3798 = vmatprep.subr.bf16.mxu0 %v6339_v29  ;;  %3757 = vmatprep.subr.bf16.mxu1 %v6329_v18  ;;  %v3038_v29 = vld [vmem:[%s8672_s1 + $0x348] sm:$0xff]  ;;  %v6433_v30 = vcombine.high %v3037_v34, %v3041_v37  ;;  %v6432_v42 = vcombine.low %v3037_v34, %v3041_v37  ;;  %v3009_v18 = vld [vmem:[%s8672_s1 + $0x260] sm:$0xff]  ;;  %v9151_v34 = vld [vmem:[%s8672_s1 + $0x1f8] sm:$0xff] }
 0xc8b   : > { %v6401_v20 = vcombine.high %v3005_v2, %v3009_v18 }
 0xc8d   : > { %3799 = vmatpush1.bf16.msra.mxu0 %v6338_v14  ;;  %3758 = vmatpush1.bf16.msra.mxu1 %v6328_v55  ;;  %v3042_v14 = vld [vmem:[%s8672_s1 + $0x368] sm:$0xff] }
 0xc8e   : > { %3800 = vmatprep.subr.bf16.mxu0 %v6331_v19  ;;  %3759 = vmatprep.subr.bf16.mxu1 %v6449_v35  ;;  %v3010_v55 = vld [vmem:[%s8672_s1 + $0x268] sm:$0xff]  ;;  %v3001_v35 = vld [vmem:[%s8672_s1 + $0x220] sm:$0xff] }
 0xc8f   : > { %v6403_v21 = vcombine.high %v3006_v54, %v3010_v55  ;;  %v6393_v3 = vcombine.high %v2997_v23, %v3001_v35  ;;  %v6392_v28 = vcombine.low %v2997_v23, %v3001_v35 }
 0xc91   : > { %3801 = vmatpush1.bf16.msra.mxu0 %v6330_v57  ;;  %3760 = vmatpush2.bf16.msra.mxu1 %v6448_v25  ;;  %v3002_v25 = vld [vmem:[%s8672_s1 + $0x228] sm:$0xff] }
 0xc92   : > { %3802 = vmatprep.subr.bf16.mxu0 %v6451_v46  ;;  %3761 = vmatprep.subr.bf16.mxu1 %v6441_v11  ;;  %v6402_v46 = vcombine.low %v3006_v54, %v3010_v55  ;;  %v6395_v4 = vcombine.high %v2998_v24, %v3002_v25  ;;  %v6394_v11 = vcombine.low %v2998_v24, %v3002_v25 }
 0xc95   : > { %3803 = vmatpush2.bf16.msra.mxu0 %v6450_v26  ;;  %3762 = vmatpush2.bf16.msra.mxu1 %v6440_v31  ;;  %v6400_v26 = vcombine.low %v3005_v2, %v3009_v18  ;;  %v9143_v31 = vld [vmem:[%s8672_s1 + $0x1f0] sm:$0xff] }
 0xc96   : > { %3804 = vmatprep.subr.bf16.mxu0 %v6443_v33  ;;  %3763 = vmatprep.subr.bf16.mxu1 %v6433_v30  ;;  %v6389_v33 = vcombine.high %v9140_v12, %v9143_v31  ;;  %v6388_v37 = vcombine.low %v9140_v12, %v9143_v31 }
 0xc99   : > { %3805 = vmatpush2.bf16.msra.mxu0 %v6442_v32  ;;  %3764 = vmatpush2.bf16.msra.mxu1 %v6432_v42  ;;  %v9146_v32 = vld [vmem:[%s8672_s1 + $0x1d8] sm:$0xff] }
 0xc9a   : > { %v6391_v30 = vcombine.high %v9146_v32, %v9151_v34 }
 0xd34   : > { %v2848_v44 = vpop.f32.mrf.mxu0 }
 0xd35   : > { %v2849_v47 = vadd.f32 %v2848_v44, %v2647_v16  ;;  %v3029_v44 = vld [vmem:[%s8672_s1 + $0x300] sm:$0xff] }
 0xd36   : > { %v2850_v27 = vpop.f32.mrf.mxu0 }
 0xd37   : > { %v2851_v49 = vadd.f32 %v2850_v27, %v2651_v43  ;;  %v9083_v48 = vadd.f32 %v7416_v51, %v2849_v47  ;;  %v3033_v47 = vld [vmem:[%s8672_s1 + $0x320] sm:$0xff]  ;;  %v3030_v27 = vld [vmem:[%s8672_s1 + $0x308] sm:$0xff] }
 0xd38   : > { %v2852_v50 = vpop.f32.mrf.mxu0  ;;  %v3034_v51 = vld [vmem:[%s8672_s1 + $0x328] sm:$0xff] }
 0xd39   : > { %v9085_v53 = vadd.f32 %v7417_v52, %v2851_v49  ;;  %v2853_v5 = vadd.f32 %v2852_v50, %v2647_v16  ;;  %v2871_v63 = vmul.f32 %v9083_v48, %v9083_v48  ;;  %v6434_v16 = vcombine.low %v3038_v29, %v3042_v14  ;;  %v3021_v52 = vld [vmem:[%s8672_s1 + $0x2c0] sm:$0xff] }
 0xd3a   : > { %v2854_v45 = vpop.f32.mrf.mxu0  ;;  %v6424_v49 = vcombine.low %v3029_v44, %v3033_v47  ;;  %v6425_v50 = vcombine.high %v3029_v44, %v3033_v47 }
 0xd3b   : > { %v2855_v6 = vadd.f32 %v2854_v45, %v2651_v43  ;;  %v2863_v56 = vadd.f32 %v9085_v53, %v9083_v48  ;;  %v2872_v58 = vmul.f32 %v9085_v53, %v9085_v53  ;;  %v9091_v60 = vadd.f32 %v7418_v59, %v2853_v5  ;;  %v3025_v5 = vld [vmem:[%s8672_s1 + $0x2e0] sm:$0xff]  ;;  %v3026_v59 = vld [vmem:[%s8672_s1 + $0x2e8] sm:$0xff] }
 0xd3c   : > { %v6435_v43 = vcombine.high %v3038_v29, %v3042_v14  ;;  %v6426_v45 = vcombine.low %v3030_v27, %v3034_v51  ;;  %3765 = vmatprep.subr.bf16.mxu1 %v6425_v50  ;;  %v6390_v29 = vcombine.low %v9146_v32, %v9151_v34  ;;  %v2975_v32 = vld [vmem:[%s8672_s1 + $0x150] sm:$0xff] }
 0xd3d   : > { %v9093_v62 = vadd.f32 %v7419_v7, %v2855_v6  ;;  %2864 = vadd.xlane.f32.xlu0 %v2863_v56  ;;  %v2875_v1 = vadd.f32 %v2872_v58, %v2871_v63  ;;  %v2873_v9 = vmul.f32 %v9091_v60, %v9091_v60  ;;  %v6427_v6 = vcombine.high %v3030_v27, %v3034_v51  ;;  %v3022_v58 = vld [vmem:[%s8672_s1 + $0x2c8] sm:$0xff]  ;;  %v3013_v7 = vld [vmem:[%s8672_s1 + $0x280] sm:$0xff] }
 0xd3e   : > { %3806 = vmatprep.subr.bf16.mxu0 %v6435_v43  ;;  %v6417_v56 = vcombine.high %v3021_v52, %v3025_v5  ;;  %v6419_v63 = vcombine.high %v3022_v58, %v3026_v59  ;;  %3766 = vmatpush2.bf16.msra.mxu1 %v6424_v49 }
 0xd3f   : > { %v2866_v0 = vadd.f32 %v9093_v62, %v9091_v60  ;;  %v2874_v8 = vmul.f32 %v9093_v62, %v9093_v62  ;;  %3807 = vmatpush2.bf16.msra.mxu0 %v6434_v16 }
 0xd40   : > { %3808 = vmatprep.subr.bf16.mxu0 %v6427_v6  ;;  %3767 = vmatprep.subr.bf16.mxu1 %v6417_v56 }
 0xd41   : > { %2867 = vadd.xlane.f32.xlu1 %v2866_v0  ;;  %2876 = vadd.xlane.f32.xlu0 %v2875_v1  ;;  %v2878_v10 = vadd.f32 %v2874_v8, %v2873_v9  ;;  %v3017_v0 = vld [vmem:[%s8672_s1 + $0x2a0] sm:$0xff]  ;;  %v3014_v1 = vld [vmem:[%s8672_s1 + $0x288] sm:$0xff]  ;;  %v6416_v9 = vcombine.low %v3021_v52, %v3025_v5 }
 0xd42   : > { %v3018_v8 = vld [vmem:[%s8672_s1 + $0x2a8] sm:$0xff]  ;;  %v6409_v13 = vcombine.high %v3013_v7, %v3017_v0  ;;  %v6408_v57 = vcombine.low %v3013_v7, %v3017_v0 }
 0xd43   : > { %3809 = vmatpush2.bf16.msra.mxu0 %v6426_v45  ;;  %v6411_v15 = vcombine.high %v3014_v1, %v3018_v8  ;;  %3768 = vmatpush2.bf16.msra.mxu1 %v6416_v9  ;;  %v6410_v19 = vcombine.low %v3014_v1, %v3018_v8  ;;  %v2862_v1 = vld [vmem:[%s9685_s7] sm:$0x3] }
 0xd44   : > { %3810 = vmatprep.subr.bf16.mxu0 %v6419_v63  ;;  %3769 = vmatprep.subr.bf16.mxu1 %v6409_v13  ;;  %v2924_v54 = vrot.slane %v2862_v1, %v8812_v40  ;;  %v2920_v55 = vrot.slane %v2862_v1, %v8815_v41  ;;  %v2951_v1 = vld [vmem:[%s8672_s1 + $0x90] sm:$0xff] }
 0xd45   : > { %2879 = vadd.xlane.f32.xlu0 %v2878_v10  ;;  %v6418_v10 = vcombine.low %v3022_v58, %v3026_v59  ;;  %v2861_v59 = vld [vmem:[%s9684_s29] sm:$0x3] }
 0xd46   : > { %v2909_v9 = vrot.slane %v2861_v59, %v8812_v40  ;;  %v2905_v13 = vrot.slane %v2861_v59, %v8815_v41 }
 0xd47   : > { %3811 = vmatpush2.bf16.msra.mxu0 %v6418_v10  ;;  %3770 = vmatpush2.bf16.msra.mxu1 %v6408_v57 }
 0xd48   : > { %3812 = vmatprep.subr.bf16.mxu0 %v6411_v15  ;;  %3771 = vmatprep.subr.bf16.mxu1 %v6401_v20 }
 0xd4b   : > { %3813 = vmatpush2.bf16.msra.mxu0 %v6410_v19  ;;  %3772 = vmatpush2.bf16.msra.mxu1 %v6400_v26 }
 0xd4c   : > { %3814 = vmatprep.subr.bf16.mxu0 %v6403_v21  ;;  %3773 = vmatprep.subr.bf16.mxu1 %v6393_v3  ;;  %v2983_v3 = vld [vmem:[%s8672_s1 + $0x190] sm:$0xff] }
 0xd4f   : > { %3815 = vmatpush2.bf16.msra.mxu0 %v6402_v46  ;;  %3774 = vmatpush2.bf16.msra.mxu1 %v6392_v28  ;;  %v2984_v28 = vld [vmem:[%s8672_s1 + $0x198] sm:$0xff] }
 0xd50   : > { %3816 = vmatprep.subr.bf16.mxu0 %v6395_v4  ;;  %3829 = vmatprep.subr.bf16.mxu1 %v6389_v33  ;;  %v2987_v4 = vld [vmem:[%s8672_s1 + $0x1b0] sm:$0xff] }
 0xd51   : > { %v6381_v33 = vcombine.high %v2983_v3, %v2987_v4 }
 0xd53   : > { %3817 = vmatpush2.bf16.msra.mxu0 %v6394_v11  ;;  %v2988_v11 = vld [vmem:[%s8672_s1 + $0x1b8] sm:$0xff] }
 0xd54   : > { %3872 = vmatprep.subr.bf16.mxu0 %v6391_v30  ;;  %v6383_v34 = vcombine.high %v2984_v28, %v2988_v11  ;;  %v2979_v30 = vld [vmem:[%s8672_s1 + $0x170] sm:$0xff] }
 0xdc6   : > { %v2865_v14 = vpop.xlane.xlu0 %2864 }
 0xdc7   : > { %v2869_v42 = vmul.f32 0.00390625, %v2865_v14  ;;  %v2976_v14 = vld [vmem:[%s8672_s1 + $0x158] sm:$0xff] }
 0xdc9   : > { %v2883_v47 = vmul.f32 %v2869_v42, %v2869_v42  ;;  %v2893_v7 = vsub.f32 %v9083_v48, %v2869_v42  ;;  %v2894_v63 = vsub.f32 %v9085_v53, %v2869_v42  ;;  %v2980_v42 = vld [vmem:[%s8672_s1 + $0x178] sm:$0xff] }
 0xdca   : > { %v2868_v16 = vpop.xlane.xlu1 %2867  ;;  %v2877_v43 = vpop.xlane.xlu0 %2876 }
 0xdcb   : > { %v2870_v44 = vmul.f32 0.00390625, %v2868_v16  ;;  %v2881_v27 = vmul.f32 0.00390625, %v2877_v43  ;;  %v6380_v16 = vcombine.low %v2983_v3, %v2987_v4  ;;  %v6382_v43 = vcombine.low %v2984_v28, %v2988_v11 }
 0xdcd   : > { %v2885_v49 = vsub.f32 %v2881_v27, %v2883_v47  ;;  %v2884_v52 = vmul.f32 %v2870_v44, %v2870_v44  ;;  %v2895_v15 = vsub.f32 %v9091_v60, %v2870_v44  ;;  %v2896_v2 = vsub.f32 %v9093_v62, %v2870_v44  ;;  %v2967_v27 = vld [vmem:[%s8672_s1 + $0x110] sm:$0xff] }
 0xdce   : > { %v2880_v50 = vpop.xlane.xlu0 %2879  ;;  %v6373_v44 = vcombine.high %v2975_v32, %v2979_v30  ;;  %v6375_v47 = vcombine.high %v2976_v14, %v2980_v42 }
 0xdcf   : > { %v2887_v51 = vmax.f32 %v2885_v49, 0.0  ;;  %v2882_v5 = vmul.f32 0.00390625, %v2880_v50  ;;  %v2971_v49 = vld [vmem:[%s8672_s1 + $0x130] sm:$0xff]  ;;  %v2968_v50 = vld [vmem:[%s8672_s1 + $0x118] sm:$0xff] }
 0xdd0   : > { %v6364_v59 = vcombine.low %v2967_v27, %v2971_v49 }
 0xdd1   : > { %v2889_v45 = vadd.f32 1e-05, %v2887_v51  ;;  %v2886_v6 = vsub.f32 %v2882_v5, %v2884_v52  ;;  %v2972_v51 = vld [vmem:[%s8672_s1 + $0x138] sm:$0xff]  ;;  %v6365_v52 = vcombine.high %v2967_v27, %v2971_v49 }
 0xdd2   : > { %v6367_v5 = vcombine.high %v2968_v50, %v2972_v51  ;;  %v3052_v27 = vld [vmem:[%s8672_s1 + $0x3b8] sm:$0xff] }
 0xdd3   : > { %7380 = vrsqrt.f32 %v2889_v45  ;;  %v2888_v56 = vmax.f32 %v2886_v6, 0.0  ;;  %v2959_v45 = vld [vmem:[%s8672_s1 + $0xd0] sm:$0xff] }
 0xdd4   : > { %v2963_v6 = vld [vmem:[%s8672_s1 + $0xf0] sm:$0xff] }
 0xdd5   : > { %v2890_v58 = vadd.f32 1e-05, %v2888_v56  ;;  %v2960_v56 = vld [vmem:[%s8672_s1 + $0xd8] sm:$0xff] }
 0xdd7   : > { %7382 = vrsqrt.f32 %v2890_v58  ;;  %v2964_v58 = vld [vmem:[%s8672_s1 + $0xf8] sm:$0xff] }
 0xde0   : > { %v7381_v0 = vpop.eup %7380 }
 0xde1   : > { %v2898_v8 = vmul.f32 %v7381_v0, %v2894_v63  ;;  %v2897_v10 = vmul.f32 %v7381_v0, %v2893_v7  ;;  %v6366_v7 = vcombine.low %v2968_v50, %v2972_v51  ;;  %v6357_v63 = vcombine.high %v2959_v45, %v2963_v6 }
 0xde2   : > { %v6359_v0 = vcombine.high %v2960_v56, %v2964_v58 }
 0xde3   : > { %v2913_v19 = vmul.f32 %v2909_v9, %v2898_v8  ;;  %v2912_v21 = vmul.f32 %v2905_v13, %v2897_v10  ;;  %v2955_v8 = vld [vmem:[%s8672_s1 + $0xb0] sm:$0xff]  ;;  %v2956_v10 = vld [vmem:[%s8672_s1 + $0xb8] sm:$0xff] }
 0xde4   : > { %v7383_v18 = vpop.eup %7382 }
 0xde5   : > { %v2900_v57 = vmul.f32 %v7383_v18, %v2896_v2  ;;  %v2899_v20 = vmul.f32 %v7383_v18, %v2895_v15  ;;  %v2928_v24 = vadd.f32 %v2924_v54, %v2913_v19  ;;  %v2927_v26 = vadd.f32 %v2920_v55, %v2912_v21  ;;  %v2948_v19 = vld [vmem:[%s8672_s1 + $0x78] sm:$0xff] }
 0xde6   : > { %v6358_v15 = vcombine.low %v2960_v56, %v2964_v58  ;;  %v6349_v2 = vcombine.high %v2951_v1, %v2955_v8 }
 0xde7   : > { %v2915_v23 = vmul.f32 %v2909_v9, %v2900_v57  ;;  %v2914_v35 = vmul.f32 %v2905_v13, %v2899_v20  ;;  %v2952_v9 = vld [vmem:[%s8672_s1 + $0x98] sm:$0xff]  ;;  %v6356_v13 = vcombine.low %v2959_v45, %v2963_v6  ;;  %v6348_v20 = vcombine.low %v2951_v1, %v2955_v8 }
 0xde8   : > { %v6351_v18 = vcombine.high %v2952_v9, %v2956_v10  ;;  %v2944_v57 = vld [vmem:[%s8672_s1 + $0x58] sm:$0xff]  ;;  %v6350_v21 = vcombine.low %v2952_v9, %v2956_v10 }
 0xde9   : > { %v2930_v25 = vadd.f32 %v2924_v54, %v2915_v23  ;;  %v2929_v46 = vadd.f32 %v2920_v55, %v2914_v35  ;;  %v2943_v54 = vld [vmem:[%s8672_s1 + $0x50] sm:$0xff]  ;;  %v6343_v35 = vcombine.high %v2944_v57, %v2948_v19  ;;  %v6342_v4 = vcombine.low %v2944_v57, %v2948_v19  ;;  %v3044_v45 = vld [vmem:[%s8672_s1 + $0x378] sm:$0xff] }
 0xdea   : > { %v2947_v55 = vld [vmem:[%s8672_s1 + $0x70] sm:$0xff]  ;;  %v3036_v1 = vld [vmem:[%s8672_s1 + $0x338] sm:$0xff] }
 0xdeb   : > { %v2932_v12 = vpack.c.bf16 %v2930_v25, %v2928_v24  ;;  %v9175_v31 = vpack.c.bf16 %v2929_v46, %v2927_v26  ;;  %v6341_v23 = vcombine.high %v2943_v54, %v2947_v55  ;;  %v2935_v24 = vld [vmem:[%s8672_s1 + $0x10] sm:$0xff]  ;;  %v2936_v26 = vld [vmem:[%s8672_s1 + $0x18] sm:$0xff]  ;;  %v6340_v3 = vcombine.low %v2943_v54, %v2947_v55 }
 0xdec   : > { %v2939_v25 = vld [vmem:[%s8672_s1 + $0x30] sm:$0xff]  ;;  %v2940_v46 = vld [vmem:[%s8672_s1 + $0x38] sm:$0xff] }
 0xded   : > { %3775 = vmatprep.mubr.bf16.mxu1 %v2932_v12  ;;  %3818 = vmatprep.mubr.bf16.mxu0 %v2932_v12  ;;  %v6333_v28 = vcombine.high %v2935_v24, %v2939_v25  ;;  %v6335_v11 = vcombine.high %v2936_v26, %v2940_v46  ;;  %v3028_v54 = vld [vmem:[%s8672_s1 + $0x2f8] sm:$0xff] }
 0xdee   : > { %3776 = vmatmul.mubr.bf16.vlgmr.msra.gmra.mxu1 %v9175_v31  ;;  %3819 = vmatmul.mubr.bf16.vlgmr.msra.gmra.mxu0 %v9175_v31 }
 0xdef   : > { %3830 = vmatpush1.bf16.msra.mxu1 %v6388_v37  ;;  %3873 = vmatpush1.bf16.msra.mxu0 %v6390_v29  ;;  %v6372_v37 = vcombine.low %v2975_v32, %v2979_v30  ;;  %v6374_v29 = vcombine.low %v2976_v14, %v2980_v42  ;;  %v3059_v32 = vld [vmem:[%s8672_s1 + $0x3f0] sm:$0xff]  ;;  %v6332_v30 = vcombine.low %v2935_v24, %v2939_v25  ;;  %v3020_v24 = vld [vmem:[%s8672_s1 + $0x2b8] sm:$0xff] }
 0xdf0   : > { %3861 = vmatprep.mubr.bf16.mxu1 %v2932_v12  ;;  %3904 = vmatprep.mubr.bf16.mxu0 %v2932_v12  ;;  %v3055_v12 = vld [vmem:[%s8672_s1 + $0x3d0] sm:$0xff]  ;;  %v6334_v14 = vcombine.low %v2936_v26, %v2940_v46 }
 0xdf1   : > { %3831 = vmatprep.subr.bf16.mxu1 %v6381_v33  ;;  %3874 = vmatprep.subr.bf16.mxu0 %v6383_v34  ;;  %v3056_v33 = vld [vmem:[%s8672_s1 + $0x3d8] sm:$0xff]  ;;  %v6453_v42 = vcombine.high %v3055_v12, %v3059_v32  ;;  %v6452_v49 = vcombine.low %v3055_v12, %v3059_v32 }
 0xdf2   : > { %v3060_v34 = vld [vmem:[%s8672_s1 + $0x3f8] sm:$0xff] }
 0xdf3   : > { %3832 = vmatpush1.bf16.msra.mxu1 %v6380_v16  ;;  %3875 = vmatpush1.bf16.msra.mxu0 %v6382_v43  ;;  %v6455_v16 = vcombine.high %v3056_v33, %v3060_v34  ;;  %v3047_v43 = vld [vmem:[%s8672_s1 + $0x390] sm:$0xff]  ;;  %v6454_v50 = vcombine.low %v3056_v33, %v3060_v34  ;;  %v3012_v12 = vld [vmem:[%s8672_s1 + $0x278] sm:$0xff] }
 0xdf4   : > { %3833 = vmatprep.subr.bf16.mxu1 %v6373_v44  ;;  %3876 = vmatprep.subr.bf16.mxu0 %v6375_v47  ;;  %v3051_v44 = vld [vmem:[%s8672_s1 + $0x3b0] sm:$0xff]  ;;  %v3048_v47 = vld [vmem:[%s8672_s1 + $0x398] sm:$0xff] }
 0xdf5   : > { %v6445_v51 = vcombine.high %v3047_v43, %v3051_v44  ;;  %v6444_v6 = vcombine.low %v3047_v43, %v3051_v44  ;;  %v6446_v56 = vcombine.low %v3048_v47, %v3052_v27  ;;  %v3004_v43 = vld [vmem:[%s8672_s1 + $0x238] sm:$0xff] }
 0xdf7   : > { %3834 = vmatpush1.bf16.msra.mxu1 %v6372_v37  ;;  %3877 = vmatpush1.bf16.msra.mxu0 %v6374_v29  ;;  %v6447_v37 = vcombine.high %v3048_v47, %v3052_v27  ;;  %v3039_v29 = vld [vmem:[%s8672_s1 + $0x350] sm:$0xff] }
 0xdf8   : > { %3835 = vmatprep.subr.bf16.mxu1 %v6365_v52  ;;  %3878 = vmatprep.subr.bf16.mxu0 %v6367_v5  ;;  %v3043_v52 = vld [vmem:[%s8672_s1 + $0x370] sm:$0xff]  ;;  %v3040_v5 = vld [vmem:[%s8672_s1 + $0x358] sm:$0xff] }
 0xdf9   : > { %v6437_v58 = vcombine.high %v3039_v29, %v3043_v52  ;;  %v6436_v8 = vcombine.low %v3039_v29, %v3043_v52  ;;  %v6438_v9 = vcombine.low %v3040_v5, %v3044_v45  ;;  %v7157_v29 = vld [vmem:[%s8681_s9 + $0x174] ss:$8 sps:$4 sm:$0xff]   ;;  %v7152_v52 = vld [vmem:[%s8681_s9 + $0x70] ss:$8 sps:$4 sm:$0xff]  }
 0xdfb   : > { %3836 = vmatpush1.bf16.msra.mxu1 %v6364_v59  ;;  %3879 = vmatpush1.bf16.msra.mxu0 %v6366_v7  ;;  %v6439_v59 = vcombine.high %v3040_v5, %v3044_v45  ;;  %v3031_v7 = vld [vmem:[%s8672_s1 + $0x310] sm:$0xff]  ;;  %v7155_v5 = vld [vmem:[%s8681_s9 + $0x170] ss:$8 sps:$4 sm:$0xff]  }
 0xdfc   : > { %3837 = vmatprep.subr.bf16.mxu1 %v6357_v63  ;;  %3880 = vmatprep.subr.bf16.mxu0 %v6359_v0  ;;  %v3035_v63 = vld [vmem:[%s8672_s1 + $0x330] sm:$0xff]  ;;  %v3032_v0 = vld [vmem:[%s8672_s1 + $0x318] sm:$0xff] }
 0xdfd   : > { %v6429_v10 = vcombine.high %v3031_v7, %v3035_v63  ;;  %v6428_v55 = vcombine.low %v3031_v7, %v3035_v63  ;;  %v6430_v57 = vcombine.low %v3032_v0, %v3036_v1  ;;  %v7160_v45 = vld [vmem:[%s8681_s9 + $0x64] ss:$8 sps:$4 sm:$0xff]   ;;  %v7169_v7 = vld [vmem:[%s8681_s9 + $0x154] ss:$8 sps:$4 sm:$0xff]   ;;  %v7164_v63 = vld [vmem:[%s8681_s9 + $0x50] ss:$8 sps:$4 sm:$0xff]  }
 0xdff   : > { %3838 = vmatpush1.bf16.msra.mxu1 %v6356_v13  ;;  %3881 = vmatpush1.bf16.msra.mxu0 %v6358_v15  ;;  %v6431_v13 = vcombine.high %v3032_v0, %v3036_v1  ;;  %v3023_v15 = vld [vmem:[%s8672_s1 + $0x2d0] sm:$0xff]  ;;  %v7167_v0 = vld [vmem:[%s8681_s9 + $0x150] ss:$8 sps:$4 sm:$0xff]  }
 0xe00   : > { %3839 = vmatprep.subr.bf16.mxu1 %v6349_v2  ;;  %3882 = vmatprep.subr.bf16.mxu0 %v6351_v18  ;;  %v3027_v2 = vld [vmem:[%s8672_s1 + $0x2f0] sm:$0xff]  ;;  %v3024_v18 = vld [vmem:[%s8672_s1 + $0x2d8] sm:$0xff] }
 0xe01   : > { %v6421_v19 = vcombine.high %v3023_v15, %v3027_v2  ;;  %v6420_v25 = vcombine.low %v3023_v15, %v3027_v2  ;;  %v6422_v26 = vcombine.low %v3024_v18, %v3028_v54  ;;  %v7175_v1 = vld [vmem:[%s8681_s9 + $0x144] ss:$8 sps:$4 sm:$0xff]   ;;  %v7176_v15 = vld [vmem:[%s8681_s9 + $0x30] ss:$8 sps:$4 sm:$0xff]  }
 0xe02   : > { %v7179_v2 = vld [vmem:[%s8681_s9 + $0x130] ss:$8 sps:$4 sm:$0xff]  }
 0xe03   : > { %3840 = vmatpush1.bf16.msra.mxu1 %v6348_v20  ;;  %3883 = vmatpush1.bf16.msra.mxu0 %v6350_v21  ;;  %v6423_v20 = vcombine.high %v3024_v18, %v3028_v54  ;;  %v3015_v21 = vld [vmem:[%s8672_s1 + $0x290] sm:$0xff] }
 0xe04   : > { %3841 = vmatprep.subr.bf16.mxu1 %v6341_v23  ;;  %3884 = vmatprep.subr.bf16.mxu0 %v6343_v35  ;;  %v3019_v23 = vld [vmem:[%s8672_s1 + $0x2b0] sm:$0xff]  ;;  %v3016_v35 = vld [vmem:[%s8672_s1 + $0x298] sm:$0xff] }
 0xe05   : > { %v6413_v46 = vcombine.high %v3015_v21, %v3019_v23  ;;  %v6412_v32 = vcombine.low %v3015_v21, %v3019_v23  ;;  %v6414_v33 = vcombine.low %v3016_v35, %v3020_v24  ;;  %v7184_v18 = vld [vmem:[%s8681_s9 + $0x24] ss:$8 sps:$4 sm:$0xff]   ;;  %v7188_v21 = vld [vmem:[%s8681_s9 + $0x10] ss:$8 sps:$4 sm:$0xff]  }
 0xe06   : > { %v7187_v54 = vld [vmem:[%s8681_s9 + $0x124] ss:$8 sps:$4 sm:$0xff]   ;;  %v7191_v23 = vld [vmem:[%s8681_s9 + $0x110] ss:$8 sps:$4 sm:$0xff]  }
 0xe07   : > { %3842 = vmatpush1.bf16.msra.mxu1 %v6340_v3  ;;  %3885 = vmatpush1.bf16.msra.mxu0 %v6342_v4  ;;  %v6415_v3 = vcombine.high %v3016_v35, %v3020_v24  ;;  %v3007_v4 = vld [vmem:[%s8672_s1 + $0x250] sm:$0xff] }
 0xe08   : > { %3843 = vmatprep.subr.bf16.mxu1 %v6333_v28  ;;  %3886 = vmatprep.subr.bf16.mxu0 %v6335_v11  ;;  %v3011_v28 = vld [vmem:[%s8672_s1 + $0x270] sm:$0xff]  ;;  %v3008_v11 = vld [vmem:[%s8672_s1 + $0x258] sm:$0xff] }
 0xe09   : > { %v6405_v34 = vcombine.high %v3007_v4, %v3011_v28  ;;  %v6404_v44 = vcombine.low %v3007_v4, %v3011_v28  ;;  %v6406_v47 = vcombine.low %v3008_v11, %v3012_v12  ;;  %v7196_v35 = vld [vmem:[%s8681_s9 + $0x4] ss:$8 sps:$4 sm:$0xff]   ;;  %v7200_v4 = vld [vmem:[%s8681_s9 + $0xf0] ss:$8 sps:$4 sm:$0xff]  }
 0xe0a   : > { %v7199_v24 = vld [vmem:[%s8681_s9 + $0x104] ss:$8 sps:$4 sm:$0xff]   ;;  %v7203_v28 = vld [vmem:[%s8681_s9 + $0x1f0] ss:$8 sps:$4 sm:$0xff]  }
 0xe0b   : > { %3844 = vmatpush1.bf16.msra.mxu1 %v6332_v30  ;;  %3887 = vmatpush1.bf16.msra.mxu0 %v6334_v14  ;;  %v6407_v30 = vcombine.high %v3008_v11, %v3012_v12  ;;  %v2999_v14 = vld [vmem:[%s8672_s1 + $0x210] sm:$0xff] }
 0xe0c   : > { %3845 = vmatprep.subr.bf16.mxu1 %v6453_v42  ;;  %3888 = vmatprep.subr.bf16.mxu0 %v6455_v16  ;;  %v3003_v42 = vld [vmem:[%s8672_s1 + $0x230] sm:$0xff]  ;;  %v3000_v16 = vld [vmem:[%s8672_s1 + $0x218] sm:$0xff]  ;;  %s9686_s1 = scalar_lea.vmem [#allocation21], %s8646_s27  ;;  %s9687_s27 = sld [smem:[#allocation46_spill]] }
 0xe0d   : > { %v6397_v27 = vcombine.high %v2999_v14, %v3003_v42  ;;  %v7208_v11 = vld [vmem:[%s8681_s9 + $0xe4] ss:$8 sps:$4 sm:$0xff]  }
 0xe0e   : > { %v7211_v12 = vld [vmem:[%s8681_s9 + $0x1e4] ss:$8 sps:$4 sm:$0xff]  }
 0xe0f   : > { %3846 = vmatpush2.bf16.msra.mxu1 %v6452_v49  ;;  %3889 = vmatpush2.bf16.msra.mxu0 %v6454_v50  ;;  %v6399_v49 = vcombine.high %v3000_v16, %v3004_v43  ;;  %v6396_v50 = vcombine.low %v2999_v14, %v3003_v42  ;;  %v7212_v14 = vld [vmem:[%s8681_s9 + $0xd0] ss:$8 sps:$4 sm:$0xff]  }
 0xe10   : > { %3847 = vmatprep.subr.bf16.mxu1 %v6445_v51  ;;  %3890 = vmatprep.subr.bf16.mxu0 %v6447_v37  ;;  %v6398_v51 = vcombine.low %v3000_v16, %v3004_v43  ;;  %v7154_v37 = vld [vmem:[%s8681_s9 + $0x74] ss:$8 sps:$4 sm:$0xff]   ;;  %v7215_v42 = vld [vmem:[%s8681_s9 + $0x1d0] ss:$8 sps:$4 sm:$0xff]   ;;  %v7220_v16 = vld [vmem:[%s8681_s9 + $0xc4] ss:$8 sps:$4 sm:$0xff]  }
 0xe11   : > { %v7223_v43 = vld [vmem:[%s8681_s9 + $0x1c4] ss:$8 sps:$4 sm:$0xff]  }
 0xe12   : > { %p6584_p0 = scmp.ne.s32.totalorder %s9687_s27, 5 }
 0xe13   : > { %3848 = vmatpush2.bf16.msra.mxu1 %v6444_v6  ;;  %3891 = vmatpush2.bf16.msra.mxu0 %v6446_v56  ;;  %v7163_v6 = vld [vmem:[%s8681_s9 + $0x164] ss:$8 sps:$4 sm:$0xff]   ;;  %v7158_v56 = vld [vmem:[%s8681_s9 + $0x60] ss:$8 sps:$4 sm:$0xff]  }
 0xe14   : > { %3849 = vmatprep.subr.bf16.mxu1 %v6437_v58  ;;  %3892 = vmatprep.subr.bf16.mxu0 %v6439_v59  ;;  %v7161_v58 = vld [vmem:[%s8681_s9 + $0x160] ss:$8 sps:$4 sm:$0xff]   ;;  %v7166_v59 = vld [vmem:[%s8681_s9 + $0x54] ss:$8 sps:$4 sm:$0xff]  }
 0xe17   : > { %3850 = vmatpush2.bf16.msra.mxu1 %v6436_v8  ;;  %3893 = vmatpush2.bf16.msra.mxu0 %v6438_v9  ;;  %v7170_v8 = vld [vmem:[%s8681_s9 + $0x40] ss:$8 sps:$4 sm:$0xff]  }
 0xe18   : > { %3851 = vmatprep.subr.bf16.mxu1 %v6429_v10  ;;  %3894 = vmatprep.subr.bf16.mxu0 %v6431_v13  ;;  %v7173_v9 = vld [vmem:[%s8681_s9 + $0x140] ss:$8 sps:$4 sm:$0xff]   ;;  %v7178_v10 = vld [vmem:[%s8681_s9 + $0x34] ss:$8 sps:$4 sm:$0xff]  }
 0xe19   : > { %v7181_v13 = vld [vmem:[%s8681_s9 + $0x134] ss:$8 sps:$4 sm:$0xff]  }
 0xe1b   : > { %3852 = vmatpush2.bf16.msra.mxu1 %v6428_v55  ;;  %3895 = vmatpush2.bf16.msra.mxu0 %v6430_v57  ;;  %v7182_v55 = vld [vmem:[%s8681_s9 + $0x20] ss:$8 sps:$4 sm:$0xff]  }
 0xe1c   : > { %3853 = vmatprep.subr.bf16.mxu1 %v6421_v19  ;;  %3896 = vmatprep.subr.bf16.mxu0 %v6423_v20  ;;  %v7185_v57 = vld [vmem:[%s8681_s9 + $0x120] ss:$8 sps:$4 sm:$0xff]   ;;  %v7190_v19 = vld [vmem:[%s8681_s9 + $0x14] ss:$8 sps:$4 sm:$0xff]  }
 0xe1d   : > { %v7193_v20 = vld [vmem:[%s8681_s9 + $0x114] ss:$8 sps:$4 sm:$0xff]  }
 0xe1f   : > { %3854 = vmatpush2.bf16.msra.mxu1 %v6420_v25  ;;  %3897 = vmatpush2.bf16.msra.mxu0 %v6422_v26  ;;  %v7194_v25 = vld [vmem:[%s8681_s9] ss:$8 sps:$4 sm:$0xff]  }
 0xe20   : > { %3855 = vmatprep.subr.bf16.mxu1 %v6413_v46  ;;  %3898 = vmatprep.subr.bf16.mxu0 %v6415_v3  ;;  %v7197_v26 = vld [vmem:[%s8681_s9 + $0x100] ss:$8 sps:$4 sm:$0xff]   ;;  %v7202_v46 = vld [vmem:[%s8681_s9 + $0xf4] ss:$8 sps:$4 sm:$0xff]  }
 0xe21   : > { %v7205_v3 = vld [vmem:[%s8681_s9 + $0x1f4] ss:$8 sps:$4 sm:$0xff]  }
 0xe23   : > { %3856 = vmatpush2.bf16.msra.mxu1 %v6412_v32  ;;  %3899 = vmatpush2.bf16.msra.mxu0 %v6414_v33  ;;  %v7206_v32 = vld [vmem:[%s8681_s9 + $0xe0] ss:$8 sps:$4 sm:$0xff]  }
 0xe24   : > { %3857 = vmatprep.subr.bf16.mxu1 %v6405_v34  ;;  %3900 = vmatprep.subr.bf16.mxu0 %v6407_v30  ;;  %v7209_v33 = vld [vmem:[%s8681_s9 + $0x1e0] ss:$8 sps:$4 sm:$0xff]   ;;  %v7214_v34 = vld [vmem:[%s8681_s9 + $0xd4] ss:$8 sps:$4 sm:$0xff]  }
 0xe25   : > { %v7217_v30 = vld [vmem:[%s8681_s9 + $0x1d4] ss:$8 sps:$4 sm:$0xff]  }
 0xe27   : > { %3858 = vmatpush2.bf16.msra.mxu1 %v6404_v44  ;;  %3901 = vmatpush2.bf16.msra.mxu0 %v6406_v47  ;;  %v7218_v44 = vld [vmem:[%s8681_s9 + $0xc0] ss:$8 sps:$4 sm:$0xff]  }
 0xe28   : > { %3859 = vmatprep.subr.bf16.mxu1 %v6397_v27  ;;  %3902 = vmatprep.subr.bf16.mxu0 %v6399_v49  ;;  %v7221_v47 = vld [vmem:[%s8681_s9 + $0x1c0] ss:$8 sps:$4 sm:$0xff]   ;;  %v7226_v27 = vld [vmem:[%s8681_s9 + $0xb4] ss:$8 sps:$4 sm:$0xff]  }
 0xe29   : > { %v7229_v49 = vld [vmem:[%s8681_s9 + $0x1b4] ss:$8 sps:$4 sm:$0xff]  }
 0xe2b   : > { %3860 = vmatpush2.bf16.msra.mxu1 %v6396_v50  ;;  %3903 = vmatpush2.bf16.msra.mxu0 %v6398_v51  ;;  %v7224_v50 = vld [vmem:[%s8681_s9 + $0xb0] ss:$8 sps:$4 sm:$0xff]  }
 0xe2c   : > { %4847 = vmatprep.subr.bf16.mxu1 %v7154_v37  ;;  %4890 = vmatprep.subr.bf16.mxu0 %v7157_v29  ;;  %v7227_v51 = vld [vmem:[%s8681_s9 + $0x1b0] ss:$8 sps:$4 sm:$0xff]   ;;  %v7232_v37 = vld [vmem:[%s8681_s9 + $0xa4] ss:$8 sps:$4 sm:$0xff]  }
 0xe2d   : > { %v7235_v29 = vld [vmem:[%s8681_s9 + $0x1a4] ss:$8 sps:$4 sm:$0xff]  }
 0xe2e   : > { %3862 = vmatmul.mubr.bf16.vlgmr.msra.gmra.mxu1 %v9175_v31  ;;  %3905 = vmatmul.mubr.bf16.vlgmr.msra.gmra.mxu0 %v9175_v31  ;;  %v7172_v31 = vld [vmem:[%s8681_s9 + $0x44] ss:$8 sps:$4 sm:$0xff]  }
 0xe2f   : > { %4848 = vmatpush1.bf16.msra.mxu1 %v7152_v52  ;;  %4891 = vmatpush1.bf16.msra.mxu0 %v7155_v5  ;;  %v7230_v52 = vld [vmem:[%s8681_s9 + $0xa0] ss:$8 sps:$4 sm:$0xff]  }
 0xe30   : > { %4849 = vmatprep.subr.bf16.mxu1 %v7160_v45  ;;  %4892 = vmatprep.subr.bf16.mxu0 %v7163_v6  ;;  %v7233_v5 = vld [vmem:[%s8681_s9 + $0x1a0] ss:$8 sps:$4 sm:$0xff]   ;;  %v7238_v45 = vld [vmem:[%s8681_s9 + $0x94] ss:$8 sps:$4 sm:$0xff]  }
 0xe31   : > { %v7241_v6 = vld [vmem:[%s8681_s9 + $0x194] ss:$8 sps:$4 sm:$0xff]  }
 0xe33   : > { %4850 = vmatpush1.bf16.msra.mxu1 %v7158_v56  ;;  %4893 = vmatpush1.bf16.msra.mxu0 %v7161_v58  ;;  %v7236_v56 = vld [vmem:[%s8681_s9 + $0x90] ss:$8 sps:$4 sm:$0xff]  }
 0xe34   : > { %4851 = vmatprep.subr.bf16.mxu1 %v7166_v59  ;;  %4894 = vmatprep.subr.bf16.mxu0 %v7169_v7  ;;  %v7239_v58 = vld [vmem:[%s8681_s9 + $0x190] ss:$8 sps:$4 sm:$0xff]   ;;  %v7244_v59 = vld [vmem:[%s8681_s9 + $0x84] ss:$8 sps:$4 sm:$0xff]  }
 0xe35   : > { %v7247_v7 = vld [vmem:[%s8681_s9 + $0x184] ss:$8 sps:$4 sm:$0xff]  }
 0xe37   : > { %4852 = vmatpush1.bf16.msra.mxu1 %v7164_v63  ;;  %4895 = vmatpush1.bf16.msra.mxu0 %v7167_v0  ;;  %v7242_v63 = vld [vmem:[%s8681_s9 + $0x80] ss:$8 sps:$4 sm:$0xff]  }
 0xe38   : > { %4853 = vmatprep.subr.bf16.mxu1 %v7172_v31  ;;  %4896 = vmatprep.subr.bf16.mxu0 %v7175_v1  ;;  %v7245_v0 = vld [vmem:[%s8681_s9 + $0x180] ss:$8 sps:$4 sm:$0xff]   ;;  %v7250_v31 = vld [vmem:[%s8681_s9 + $0x274] ss:$8 sps:$4 sm:$0xff]  }
 0xe39   : > { %v7253_v1 = vld [vmem:[%s8681_s9 + $0x374] ss:$8 sps:$4 sm:$0xff]  }
 0xe3b   : > { %4854 = vmatpush1.bf16.msra.mxu1 %v7170_v8  ;;  %4897 = vmatpush1.bf16.msra.mxu0 %v7173_v9  ;;  %v9304_v8 = vld [vmem:[%s8675_s3] sm:$0xff] }
 0xe3c   : > { %4855 = vmatprep.subr.bf16.mxu1 %v7178_v10  ;;  %4898 = vmatprep.subr.bf16.mxu0 %v7181_v13  ;;  %v3066_v9 = vrot.slane %v9304_v8, %v8815_v41  ;;  %v3074_v10 = vrot.slane %v9304_v8, %v8869_v36  ;;  %v3070_v13 = vrot.slane %v9304_v8, %v8812_v40 }
 0xe3f   : > { %4856 = vmatpush1.bf16.msra.mxu1 %v7176_v15  ;;  %4899 = vmatpush1.bf16.msra.mxu0 %v7179_v2  ;;  %v3078_v15 = vrot.slane %v9304_v8, %v8949_v17 }
 0xe40   : > { %4857 = vmatprep.subr.bf16.mxu1 %v7184_v18  ;;  %4900 = vmatprep.subr.bf16.mxu0 %v7187_v54 }
 0xe43   : > { %4858 = vmatpush1.bf16.msra.mxu1 %v7182_v55  ;;  %4901 = vmatpush1.bf16.msra.mxu0 %v7185_v57 }
 0xe44   : > { %4859 = vmatprep.subr.bf16.mxu1 %v7190_v19  ;;  %4902 = vmatprep.subr.bf16.mxu0 %v7193_v20 }
 0xe47   : > { %4860 = vmatpush1.bf16.msra.mxu1 %v7188_v21  ;;  %4903 = vmatpush1.bf16.msra.mxu0 %v7191_v23 }
 0xe48   : > { %4861 = vmatprep.subr.bf16.mxu1 %v7196_v35  ;;  %4904 = vmatprep.subr.bf16.mxu0 %v7199_v24 }
 0xe4b   : > { %4862 = vmatpush1.bf16.msra.mxu1 %v7194_v25  ;;  %4905 = vmatpush1.bf16.msra.mxu0 %v7197_v26 }
 0xe4c   : > { %4863 = vmatprep.subr.bf16.mxu1 %v7202_v46  ;;  %4906 = vmatprep.subr.bf16.mxu0 %v7205_v3 }
 0xe4f   : > { %4864 = vmatpush2.bf16.msra.mxu1 %v7200_v4  ;;  %4907 = vmatpush2.bf16.msra.mxu0 %v7203_v28 }
 0xe50   : > { %4865 = vmatprep.subr.bf16.mxu1 %v7208_v11  ;;  %4908 = vmatprep.subr.bf16.mxu0 %v7211_v12 }
 0xe53   : > { %4866 = vmatpush2.bf16.msra.mxu1 %v7206_v32  ;;  %4909 = vmatpush2.bf16.msra.mxu0 %v7209_v33 }
 0xe54   : > { %4867 = vmatprep.subr.bf16.mxu1 %v7214_v34  ;;  %4910 = vmatprep.subr.bf16.mxu0 %v7217_v30 }
 0xe57   : > { %4868 = vmatpush2.bf16.msra.mxu1 %v7212_v14  ;;  %4911 = vmatpush2.bf16.msra.mxu0 %v7215_v42 }
 0xe58   : > { %4869 = vmatprep.subr.bf16.mxu1 %v7220_v16  ;;  %4912 = vmatprep.subr.bf16.mxu0 %v7223_v43 }
 0xe5b   : > { %4870 = vmatpush2.bf16.msra.mxu1 %v7218_v44  ;;  %4913 = vmatpush2.bf16.msra.mxu0 %v7221_v47 }
 0xe5c   : > { %4871 = vmatprep.subr.bf16.mxu1 %v7226_v27  ;;  %4914 = vmatprep.subr.bf16.mxu0 %v7229_v49 }
 0xe5f   : > { %4872 = vmatpush2.bf16.msra.mxu1 %v7224_v50  ;;  %4915 = vmatpush2.bf16.msra.mxu0 %v7227_v51 }
 0xe60   : > { %4873 = vmatprep.subr.bf16.mxu1 %v7232_v37  ;;  %4916 = vmatprep.subr.bf16.mxu0 %v7235_v29 }
 0xe63   : > { %4874 = vmatpush2.bf16.msra.mxu1 %v7230_v52  ;;  %4917 = vmatpush2.bf16.msra.mxu0 %v7233_v5 }
 0xe64   : > { %4875 = vmatprep.subr.bf16.mxu1 %v7238_v45  ;;  %4918 = vmatprep.subr.bf16.mxu0 %v7241_v6 }
 0xe67   : > { %4876 = vmatpush2.bf16.msra.mxu1 %v7236_v56  ;;  %4919 = vmatpush2.bf16.msra.mxu0 %v7239_v58 }
 0xe68   : > { %4877 = vmatprep.subr.bf16.mxu1 %v7244_v59  ;;  %4920 = vmatprep.subr.bf16.mxu0 %v7247_v7 }
 0xe6b   : > { %4878 = vmatpush2.bf16.msra.mxu1 %v7242_v63  ;;  %4921 = vmatpush2.bf16.msra.mxu0 %v7245_v0 }
 0xe6c   : > { %4933 = vmatprep.subr.bf16.mxu1 %v7250_v31  ;;  %4976 = vmatprep.subr.bf16.mxu0 %v7253_v1 }
 0xeae   : > { %v3777_v2 = vpop.f32.mrf.mxu1  ;;  %v3820_v18 = vpop.f32.mrf.mxu0 }
 0xeaf   : > { %v9314_v54 = vadd.f32 %v3777_v2, %v3066_v9  ;;  %v9316_v55 = vadd.f32 %v3820_v18, %v3074_v10 }
 0xeb0   : > { %v3779_v57 = vpop.f32.mrf.mxu1  ;;  %v3822_v19 = vpop.f32.mrf.mxu0 }
 0xeb1   : > { %v3931_v20 = vmul.f32 0.044715, %v9314_v54  ;;  %v3933_v21 = vmul.f32 0.044715, %v9316_v55  ;;  %v3780_v23 = vadd.f32 %v3779_v57, %v3070_v13  ;;  %v9320_v35 = vadd.f32 %v3822_v19, %v3078_v15 }
 0xeb2   : > { %v3781_v24 = vpop.f32.mrf.mxu1  ;;  %v3824_v25 = vpop.f32.mrf.mxu0 }
 0xeb3   : > { %v3947_v26 = vmul.f32 %v3931_v20, %v9314_v54  ;;  %v3949_v46 = vmul.f32 %v3933_v21, %v9316_v55  ;;  %v3932_v3 = vmul.f32 0.044715, %v3780_v23  ;;  %v3934_v4 = vmul.f32 0.044715, %v9320_v35 }
 0xeb4   : > { %v3782_v28 = vadd.f32 %v3781_v24, %v3066_v9  ;;  %v9325_v11 = vadd.f32 %v3824_v25, %v3074_v10  ;;  %v3783_v12 = vpop.f32.mrf.mxu1  ;;  %v3826_v32 = vpop.f32.mrf.mxu0 }
 0xeb5   : > { %v3963_v33 = vmul.f32 %v3947_v26, %v9314_v54  ;;  %v3965_v34 = vmul.f32 %v3949_v46, %v9316_v55  ;;  %v3948_v30 = vmul.f32 %v3932_v3, %v3780_v23  ;;  %v3950_v14 = vmul.f32 %v3934_v4, %v9320_v35 }
 0xeb6   : > { %v3939_v42 = vmul.f32 0.044715, %v3782_v28  ;;  %v3941_v16 = vmul.f32 0.044715, %v9325_v11  ;;  %v3784_v43 = vadd.f32 %v3783_v12, %v3070_v13  ;;  %v3827_v44 = vadd.f32 %v3826_v32, %v3078_v15 }
 0xeb7   : > { %v3979_v47 = vadd.f32 %v3963_v33, %v9314_v54  ;;  %v3981_v27 = vadd.f32 %v3965_v34, %v9316_v55  ;;  %v3964_v49 = vmul.f32 %v3948_v30, %v3780_v23  ;;  %v3966_v50 = vmul.f32 %v3950_v14, %v9320_v35 }
 0xeb8   : > { %v3955_v51 = vmul.f32 %v3939_v42, %v3782_v28  ;;  %v3957_v37 = vmul.f32 %v3941_v16, %v9325_v11  ;;  %v3940_v29 = vmul.f32 0.044715, %v3784_v43  ;;  %v3942_v52 = vmul.f32 0.044715, %v3827_v44 }
 0xeb9   : > { %v3995_v5 = vmul.f32 0.7978846, %v3979_v47  ;;  %v3997_v45 = vmul.f32 0.7978846, %v3981_v27  ;;  %v3980_v6 = vadd.f32 %v3964_v49, %v3780_v23  ;;  %v3982_v0 = vadd.f32 %v3966_v50, %v9320_v35 }
 0xeba   : > { %v3971_v56 = vmul.f32 %v3955_v51, %v3782_v28  ;;  %v3973_v58 = vmul.f32 %v3957_v37, %v9325_v11  ;;  %v3956_v59 = vmul.f32 %v3940_v29, %v3784_v43  ;;  %v3958_v7 = vmul.f32 %v3942_v52, %v3827_v44 }
 0xebb   : > { %v3996_v63 = vmul.f32 0.7978846, %v3980_v6  ;;  %7384 = vtanh.f32 %v3995_v5  ;;  %v3998_v13 = vmul.f32 0.7978846, %v3982_v0  ;;  %v3916_v4 = vmul.f32 0.5, %v3780_v23 }
 0xebc   : > { %v3987_v31 = vadd.f32 %v3971_v56, %v3782_v28  ;;  %v3989_v1 = vadd.f32 %v3973_v58, %v9325_v11  ;;  %v3972_v9 = vmul.f32 %v3956_v59, %v3784_v43  ;;  %7386 = vtanh.f32 %v3997_v45 }
 0xebd   : > { %v3974_v10 = vmul.f32 %v3958_v7, %v3827_v44  ;;  %7388 = vtanh.f32 %v3996_v63  ;;  %v3915_v32 = vmul.f32 0.5, %v9314_v54  ;;  %v3923_v14 = vmul.f32 0.5, %v3782_v28  ;;  %v7256_v63 = vld [vmem:[%s8681_s9 + $0x264] ss:$8 sps:$4 sm:$0xff]  }
 0xebe   : > { %v4003_v15 = vmul.f32 0.7978846, %v3987_v31  ;;  %v4005_v2 = vmul.f32 0.7978846, %v3989_v1  ;;  %v3988_v18 = vadd.f32 %v3972_v9, %v3784_v43  ;;  %7390 = vtanh.f32 %v3998_v13  ;;  %v7259_v31 = vld [vmem:[%s8681_s9 + $0x364] ss:$8 sps:$4 sm:$0xff]  }
 0xebf   : > { %v3990_v57 = vadd.f32 %v3974_v10, %v3827_v44  ;;  %v3924_v27 = vmul.f32 0.5, %v3784_v43  ;;  %v3925_v50 = vmul.f32 0.5, %v9325_v11  ;;  %v3918_v37 = vmul.f32 0.5, %v9320_v35  ;;  %v7248_v11 = vld [vmem:[%s8681_s9 + $0x270] ss:$8 sps:$4 sm:$0xff]  }
 0xec0   : > { %7392 = vtanh.f32 %v4003_v15  ;;  %v4004_v19 = vmul.f32 0.7978846, %v3988_v18  ;;  %v3926_v23 = vmul.f32 0.5, %v3827_v44  ;;  %v3917_v28 = vmul.f32 0.5, %v9316_v55  ;;  %v7251_v44 = vld [vmem:[%s8681_s9 + $0x370] ss:$8 sps:$4 sm:$0xff]  }
 0xec1   : > { %7394 = vtanh.f32 %v4005_v2  ;;  %v4006_v20 = vmul.f32 0.7978846, %v3990_v57  ;;  %v7254_v55 = vld [vmem:[%s8681_s9 + $0x260] ss:$8 sps:$4 sm:$0xff]   ;;  %v7262_v9 = vld [vmem:[%s8681_s9 + $0x254] ss:$8 sps:$4 sm:$0xff]  }
 0xec2   : > { %7396 = vtanh.f32 %v4004_v19  ;;  %v7257_v1 = vld [vmem:[%s8681_s9 + $0x360] ss:$8 sps:$4 sm:$0xff]   ;;  %v7265_v10 = vld [vmem:[%s8681_s9 + $0x354] ss:$8 sps:$4 sm:$0xff]   ;;  %v7260_v13 = vld [vmem:[%s8681_s9 + $0x250] ss:$8 sps:$4 sm:$0xff]  }
 0xec3   : > { %7398 = vtanh.f32 %v4006_v20  ;;  %v7263_v15 = vld [vmem:[%s8681_s9 + $0x350] ss:$8 sps:$4 sm:$0xff]   ;;  %v7268_v2 = vld [vmem:[%s8681_s9 + $0x244] ss:$8 sps:$4 sm:$0xff]   ;;  %v7266_v57 = vld [vmem:[%s8681_s9 + $0x240] ss:$8 sps:$4 sm:$0xff]  }
 0xec4   : > { %v7271_v18 = vld [vmem:[%s8681_s9 + $0x344] ss:$8 sps:$4 sm:$0xff]   ;;  %v7269_v19 = vld [vmem:[%s8681_s9 + $0x340] ss:$8 sps:$4 sm:$0xff]   ;;  %v7274_v20 = vld [vmem:[%s8681_s9 + $0x234] ss:$8 sps:$4 sm:$0xff]  }
 0xec8   : > { %v7385_v21 = vpop.eup %7384 }
 0xec9   : > { %v7387_v24 = vpop.eup %7386  ;;  %v4027_v42 = vadd.f32 1.0, %v7385_v21  ;;  %v7277_v21 = vld [vmem:[%s8681_s9 + $0x334] ss:$8 sps:$4 sm:$0xff]  }
 0xeca   : > { %v7389_v25 = vpop.eup %7388  ;;  %v4029_v51 = vadd.f32 1.0, %v7387_v24  ;;  %v7272_v24 = vld [vmem:[%s8681_s9 + $0x230] ss:$8 sps:$4 sm:$0xff]  }
 0xecb   : > { %v7391_v26 = vpop.eup %7390  ;;  %v4028_v12 = vadd.f32 1.0, %v7389_v25  ;;  %v4043_v56 = vmul.f32 %v4027_v42, %v3915_v32  ;;  %v7275_v25 = vld [vmem:[%s8681_s9 + $0x330] ss:$8 sps:$4 sm:$0xff]   ;;  %v7286_v32 = vld [vmem:[%s8681_s9 + $0x214] ss:$8 sps:$4 sm:$0xff]  }
 0xecc   : > { %v4030_v30 = vadd.f32 1.0, %v7391_v26  ;;  %v4045_v59 = vmul.f32 %v4029_v51, %v3917_v28  ;;  %v7280_v26 = vld [vmem:[%s8681_s9 + $0x224] ss:$8 sps:$4 sm:$0xff]   ;;  %v7284_v42 = vld [vmem:[%s8681_s9 + $0x210] ss:$8 sps:$4 sm:$0xff]  }
 0xecd   : > { %v7393_v46 = vpop.eup %7392  ;;  %v4044_v52 = vmul.f32 %v4028_v12, %v3916_v4  ;;  %v7278_v4 = vld [vmem:[%s8681_s9 + $0x220] ss:$8 sps:$4 sm:$0xff]  }
 0xece   : > { %v7395_v3 = vpop.eup %7394  ;;  %v4035_v33 = vadd.f32 1.0, %v7393_v46  ;;  %v4046_v6 = vmul.f32 %v4030_v30, %v3918_v37  ;;  %v7283_v46 = vld [vmem:[%s8681_s9 + $0x324] ss:$8 sps:$4 sm:$0xff]   ;;  %v7281_v12 = vld [vmem:[%s8681_s9 + $0x320] ss:$8 sps:$4 sm:$0xff]   ;;  %v3082_v30 = vrot.slane %v9304_v8, %v1481_v61 }
 0xecf   : > { %v7397_v34 = vpop.eup %7396  ;;  %v4037_v16 = vadd.f32 1.0, %v7395_v3  ;;  %v3089_v3 = vsub.s32 6, %v8809_v39  ;;  %v7295_v61 = vld [vmem:[%s8681_s9 + $0x304] ss:$8 sps:$4 sm:$0xff]  }
 0xed0   : > { %v7399_v47 = vpop.eup %7398  ;;  %v4036_v49 = vadd.f32 1.0, %v7397_v34  ;;  %v4051_v54 = vmul.f32 %v4035_v33, %v3923_v14  ;;  %v3093_v33 = vsub.s32 7, %v8809_v39  ;;  %v7289_v34 = vld [vmem:[%s8681_s9 + $0x314] ss:$8 sps:$4 sm:$0xff]  }
 0xed1   : > { %v4038_v29 = vadd.f32 1.0, %v7399_v47  ;;  %v4053_v45 = vmul.f32 %v4037_v16, %v3925_v50  ;;  %v3090_v14 = vrot.slane %v9304_v8, %v3089_v3  ;;  %v7287_v16 = vld [vmem:[%s8681_s9 + $0x310] ss:$8 sps:$4 sm:$0xff]   ;;  %v3086_v47 = vrot.slane %v9304_v8, %v1485_v22  ;;  %v7302_v3 = vld [vmem:[%s8681_s9 + $0x2e0] ss:$8 sps:$4 sm:$0xff]  }
 0xed2   : > { %v4052_v5 = vmul.f32 %v4036_v49, %v3924_v27  ;;  %v4059_v7 = vpack.c.bf16 %v4051_v54, %v4043_v56  ;;  %v3094_v27 = vrot.slane %v9304_v8, %v3093_v33  ;;  %v7292_v49 = vld [vmem:[%s8681_s9 + $0x204] ss:$8 sps:$4 sm:$0xff]   ;;  %v7298_v56 = vld [vmem:[%s8681_s9 + $0x2f4] ss:$8 sps:$4 sm:$0xff]  }
 0xed3   : > { %v4054_v43 = vmul.f32 %v4038_v29, %v3926_v23  ;;  %v4061_v0 = vpack.c.bf16 %v4053_v45, %v4045_v59  ;;  %v7293_v45 = vld [vmem:[%s8681_s9 + $0x300] ss:$8 sps:$4 sm:$0xff]  }
 0xed4   : > { %v4060_v58 = vpack.c.bf16 %v4052_v5, %v4044_v52  ;;  %v7290_v52 = vld [vmem:[%s8681_s9 + $0x200] ss:$8 sps:$4 sm:$0xff]  }
 0xed5   : > { %v4062_v35 = vpack.c.bf16 %v4054_v43, %v4046_v6 }
 0xed6   : > { %4879 = vmatprep.mubr.bf16.mxu1 %v4060_v58  ;;  %v7301_v58 = vld [vmem:[%s8681_s9 + $0x3f4] ss:$8 sps:$4 sm:$0xff]  }
 0xed7   : > { %4922 = vmatprep.mubr.bf16.mxu0 %v4062_v35  ;;  %4880 = vmatmul.mubr.bf16.vlgmr.msra.gmra.mxu1 %v4059_v7 }
 0xed8   : > { %4923 = vmatmul.mubr.bf16.vlgmr.msra.gmra.mxu0 %v4061_v0  ;;  %4934 = vmatpush1.bf16.msra.mxu1 %v7248_v11 }
 0xed9   : > { %4977 = vmatpush1.bf16.msra.mxu0 %v7251_v44  ;;  %4935 = vmatprep.subr.bf16.mxu1 %v7256_v63 }
 0xeda   : > { %4978 = vmatprep.subr.bf16.mxu0 %v7259_v31 }
 0xedc   : > { %4936 = vmatpush1.bf16.msra.mxu1 %v7254_v55  ;;  %v7296_v55 = vld [vmem:[%s8681_s9 + $0x2f0] ss:$8 sps:$4 sm:$0xff]  }
 0xedd   : > { %4979 = vmatpush1.bf16.msra.mxu0 %v7257_v1  ;;  %4937 = vmatprep.subr.bf16.mxu1 %v7262_v9 }
 0xede   : > { %4980 = vmatprep.subr.bf16.mxu0 %v7265_v10 }
 0xee0   : > { %4938 = vmatpush1.bf16.msra.mxu1 %v7260_v13 }
 0xee1   : > { %4981 = vmatpush1.bf16.msra.mxu0 %v7263_v15  ;;  %4939 = vmatprep.subr.bf16.mxu1 %v7268_v2  ;;  %v7299_v15 = vld [vmem:[%s8681_s9 + $0x3f0] ss:$8 sps:$4 sm:$0xff]   ;;  %v7304_v2 = vld [vmem:[%s8681_s9 + $0x2e4] ss:$8 sps:$4 sm:$0xff]  }
 0xee2   : > { %4982 = vmatprep.subr.bf16.mxu0 %v7271_v18 }
 0xee4   : > { %4940 = vmatpush1.bf16.msra.mxu1 %v7266_v57 }
 0xee5   : > { %4983 = vmatpush1.bf16.msra.mxu0 %v7269_v19  ;;  %4941 = vmatprep.subr.bf16.mxu1 %v7274_v20 }
 0xee6   : > { %4984 = vmatprep.subr.bf16.mxu0 %v7277_v21  ;;  %v7307_v21 = vld [vmem:[%s8681_s9 + $0x3e4] ss:$8 sps:$4 sm:$0xff]  }
 0xee8   : > { %4942 = vmatpush1.bf16.msra.mxu1 %v7272_v24 }
 0xee9   : > { %4985 = vmatpush1.bf16.msra.mxu0 %v7275_v25  ;;  %4943 = vmatprep.subr.bf16.mxu1 %v7280_v26 }
 0xeea   : > { %4986 = vmatprep.subr.bf16.mxu0 %v7283_v46 }
 0xeec   : > { %4944 = vmatpush1.bf16.msra.mxu1 %v7278_v4 }
 0xeed   : > { %4987 = vmatpush1.bf16.msra.mxu0 %v7281_v12  ;;  %4945 = vmatprep.subr.bf16.mxu1 %v7286_v32 }
 0xeee   : > { %v3863_v50 = vpop.f32.mrf.mxu1  ;;  %v3906_v51 = vpop.f32.mrf.mxu0  ;;  %4988 = vmatprep.subr.bf16.mxu0 %v7289_v34  ;;  %v7305_v34 = vld [vmem:[%s8681_s9 + $0x3e0] ss:$8 sps:$4 sm:$0xff]  }
 0xeef   : > { %v9380_v37 = vadd.f32 %v3863_v50, %v3082_v30  ;;  %v9382_v23 = vadd.f32 %v3906_v51, %v3090_v14  ;;  %v7313_v51 = vld [vmem:[%s8681_s9 + $0x3d4] ss:$8 sps:$4 sm:$0xff]  }
 0xef0   : > { %4946 = vmatpush1.bf16.msra.mxu1 %v7284_v42  ;;  %v3865_v29 = vpop.f32.mrf.mxu1  ;;  %v3908_v54 = vpop.f32.mrf.mxu0  ;;  %v7310_v42 = vld [vmem:[%s8681_s9 + $0x2d4] ss:$8 sps:$4 sm:$0xff]  }
 0xef1   : > { %v3935_v22 = vmul.f32 0.044715, %v9380_v37  ;;  %v3937_v8 = vmul.f32 0.044715, %v9382_v23  ;;  %4989 = vmatpush1.bf16.msra.mxu0 %v7287_v16  ;;  %v9387_v5 = vadd.f32 %v3865_v29, %v3086_v47  ;;  %v9389_v28 = vadd.f32 %v3908_v54, %v3094_v27  ;;  %4947 = vmatprep.subr.bf16.mxu1 %v7292_v49 }
 0xef2   : > { %v3867_v6 = vpop.f32.mrf.mxu1  ;;  %v3910_v43 = vpop.f32.mrf.mxu0  ;;  %4990 = vmatprep.subr.bf16.mxu0 %v7295_v61 }
 0xef3   : > { %v3951_v11 = vmul.f32 %v3935_v22, %v9380_v37  ;;  %v3953_v59 = vmul.f32 %v3937_v8, %v9382_v23  ;;  %v3936_v35 = vmul.f32 0.044715, %v9387_v5  ;;  %v3938_v44 = vmul.f32 0.044715, %v9389_v28  ;;  %v7308_v8 = vld [vmem:[%s8681_s9 + $0x2d0] ss:$8 sps:$4 sm:$0xff]  }
 0xef4   : > { %v9398_v7 = vadd.f32 %v3867_v6, %v3082_v30  ;;  %v9400_v63 = vadd.f32 %v3910_v43, %v3090_v14  ;;  %4948 = vmatpush1.bf16.msra.mxu1 %v7290_v52  ;;  %v3869_v0 = vpop.f32.mrf.mxu1  ;;  %v3912_v31 = vpop.f32.mrf.mxu0  ;;  %v7311_v6 = vld [vmem:[%s8681_s9 + $0x3d0] ss:$8 sps:$4 sm:$0xff]   ;;  %v7316_v43 = vld [vmem:[%s8681_s9 + $0x2c4] ss:$8 sps:$4 sm:$0xff]  }
 0xef5   : > { %v3967_v1 = vmul.f32 %v3951_v11, %v9380_v37  ;;  %v3969_v9 = vmul.f32 %v3953_v59, %v9382_v23  ;;  %v3952_v10 = vmul.f32 %v3936_v35, %v9387_v5  ;;  %v3954_v13 = vmul.f32 %v3938_v44, %v9389_v28  ;;  %4991 = vmatpush1.bf16.msra.mxu0 %v7293_v45  ;;  %v7319_v59 = vld [vmem:[%s8681_s9 + $0x3c4] ss:$8 sps:$4 sm:$0xff]  }
 0xef6   : > { %v3943_v18 = vmul.f32 0.044715, %v9398_v7  ;;  %v3945_v57 = vmul.f32 0.044715, %v9400_v63  ;;  %v9411_v19 = vadd.f32 %v3869_v0, %v3086_v47  ;;  %v9413_v20 = vadd.f32 %v3912_v31, %v3094_v27  ;;  %4949 = vmatprep.subr.bf16.mxu1 %v7298_v56  ;;  %4992 = vmatprep.subr.bf16.mxu0 %v7301_v58  ;;  %v7314_v0 = vld [vmem:[%s8681_s9 + $0x2c0] ss:$8 sps:$4 sm:$0xff]  }
 0xef7   : > { %v3983_v24 = vadd.f32 %v3967_v1, %v9380_v37  ;;  %v3985_v25 = vadd.f32 %v3969_v9, %v9382_v23  ;;  %v3968_v26 = vmul.f32 %v3952_v10, %v9387_v5  ;;  %v3970_v46 = vmul.f32 %v3954_v13, %v9389_v28  ;;  %v7322_v1 = vld [vmem:[%s8681_s9 + $0x2b4] ss:$8 sps:$4 sm:$0xff]   ;;  %v7320_v13 = vld [vmem:[%s8681_s9 + $0x2b0] ss:$8 sps:$4 sm:$0xff]  }
 0xef8   : > { %v3959_v4 = vmul.f32 %v3943_v18, %v9398_v7  ;;  %v3961_v12 = vmul.f32 %v3945_v57, %v9400_v63  ;;  %v3944_v32 = vmul.f32 0.044715, %v9411_v19  ;;  %v3946_v33 = vmul.f32 0.044715, %v9413_v20  ;;  %4950 = vmatpush2.bf16.msra.mxu1 %v7296_v55  ;;  %v7317_v55 = vld [vmem:[%s8681_s9 + $0x3c0] ss:$8 sps:$4 sm:$0xff]  }
 0xef9   : > { %v3999_v30 = vmul.f32 0.7978846, %v3983_v24  ;;  %v4001_v14 = vmul.f32 0.7978846, %v3985_v25  ;;  %4993 = vmatpush2.bf16.msra.mxu0 %v7299_v15  ;;  %4951 = vmatprep.subr.bf16.mxu1 %v7304_v2  ;;  %v3984_v16 = vadd.f32 %v3968_v26, %v9387_v5  ;;  %v3986_v29 = vadd.f32 %v3970_v46, %v9389_v28  ;;  %v7325_v10 = vld [vmem:[%s8681_s9 + $0x3b4] ss:$8 sps:$4 sm:$0xff]  }
 0xefa   : > { %v3975_v47 = vmul.f32 %v3959_v4, %v9398_v7  ;;  %v3977_v27 = vmul.f32 %v3961_v12, %v9400_v63  ;;  %v3960_v49 = vmul.f32 %v3944_v32, %v9411_v19  ;;  %v3962_v50 = vmul.f32 %v3946_v33, %v9413_v20  ;;  %4994 = vmatprep.subr.bf16.mxu0 %v7307_v21  ;;  %v7323_v15 = vld [vmem:[%s8681_s9 + $0x3b0] ss:$8 sps:$4 sm:$0xff]   ;;  %v7328_v2 = vld [vmem:[%s8681_s9 + $0x2a4] ss:$8 sps:$4 sm:$0xff]   ;;  %v7326_v57 = vld [vmem:[%s8681_s9 + $0x2a0] ss:$8 sps:$4 sm:$0xff]  }
 0xefb   : > { %v4000_v61 = vmul.f32 0.7978846, %v3984_v16  ;;  %7400 = vtanh.f32 %v3999_v30  ;;  %v4002_v56 = vmul.f32 0.7978846, %v3986_v29  ;;  %v7331_v18 = vld [vmem:[%s8681_s9 + $0x3a4] ss:$8 sps:$4 sm:$0xff]  }
 0xefc   : > { %v3991_v54 = vadd.f32 %v3975_v47, %v9398_v7  ;;  %v3993_v52 = vadd.f32 %v3977_v27, %v9400_v63  ;;  %v3976_v22 = vmul.f32 %v3960_v49, %v9411_v19  ;;  %4952 = vmatpush2.bf16.msra.mxu1 %v7302_v3  ;;  %7402 = vtanh.f32 %v4001_v14  ;;  %v7329_v24 = vld [vmem:[%s8681_s9 + $0x3a0] ss:$8 sps:$4 sm:$0xff]   ;;  %v7334_v25 = vld [vmem:[%s8681_s9 + $0x294] ss:$8 sps:$4 sm:$0xff]   ;;  %v7332_v12 = vld [vmem:[%s8681_s9 + $0x290] ss:$8 sps:$4 sm:$0xff]  }
 0xefd   : > { %v3978_v45 = vmul.f32 %v3962_v50, %v9413_v20  ;;  %4995 = vmatpush2.bf16.msra.mxu0 %v7305_v34  ;;  %4953 = vmatprep.subr.bf16.mxu1 %v7310_v42  ;;  %7404 = vtanh.f32 %v4000_v61  ;;  %v7337_v46 = vld [vmem:[%s8681_s9 + $0x394] ss:$8 sps:$4 sm:$0xff]   ;;  %v7335_v33 = vld [vmem:[%s8681_s9 + $0x390] ss:$8 sps:$4 sm:$0xff]   ;;  %v7340_v34 = vld [vmem:[%s8681_s9 + $0x284] ss:$8 sps:$4 sm:$0xff]  }
 0xefe   : > { %v4007_v58 = vmul.f32 0.7978846, %v3991_v54  ;;  %v4009_v11 = vmul.f32 0.7978846, %v3993_v52  ;;  %4996 = vmatprep.subr.bf16.mxu0 %v7313_v51  ;;  %v3992_v35 = vadd.f32 %v3976_v22, %v9411_v19  ;;  %7406 = vtanh.f32 %v4002_v56  ;;  %v7343_v14 = vld [vmem:[%s8681_s9 + $0x384] ss:$8 sps:$4 sm:$0xff]  }
 0xeff   : > { %v3994_v44 = vadd.f32 %v3978_v45, %v9413_v20  ;;  %v3920_v42 = vmul.f32 0.5, %v9387_v5  ;;  %v3919_v47 = vmul.f32 0.5, %v9380_v37  ;;  %v3927_v51 = vmul.f32 0.5, %v9398_v7  ;;  %v7338_v52 = vld [vmem:[%s8681_s9 + $0x280] ss:$8 sps:$4 sm:$0xff]  }
 0xf00   : > { %7408 = vtanh.f32 %v4007_v58  ;;  %4954 = vmatpush2.bf16.msra.mxu1 %v7308_v8  ;;  %v4008_v31 = vmul.f32 0.7978846, %v3992_v35  ;;  %v3928_v22 = vmul.f32 0.5, %v9411_v19  ;;  %v3929_v45 = vmul.f32 0.5, %v9400_v63  ;;  %v7341_v37 = vld [vmem:[%s8681_s9 + $0x380] ss:$8 sps:$4 sm:$0xff]  }
 0xf01   : > { %7410 = vtanh.f32 %v4009_v11  ;;  %4997 = vmatpush2.bf16.msra.mxu0 %v7311_v6  ;;  %4955 = vmatprep.subr.bf16.mxu1 %v7316_v43  ;;  %v4010_v9 = vmul.f32 0.7978846, %v3994_v44  ;;  %v3922_v6 = vmul.f32 0.5, %v9389_v28  ;;  %v3930_v43 = vmul.f32 0.5, %v9413_v20 }
 0xf02   : > { %4998 = vmatprep.subr.bf16.mxu0 %v7319_v59  ;;  %7412 = vtanh.f32 %v4008_v31  ;;  %v3921_v59 = vmul.f32 0.5, %v9382_v23  ;;  %v4195_v23 = vld [vmem:[%s9686_s1] sm:$0x3] }
 0xf03   : > { %7414 = vtanh.f32 %v4010_v9 }
 0xf04   : > { %4956 = vmatpush2.bf16.msra.mxu1 %v7314_v0 }
 0xf05   : > { %4999 = vmatpush2.bf16.msra.mxu0 %v7317_v55  ;;  %4957 = vmatprep.subr.bf16.mxu1 %v7322_v1 }
 0xf06   : > { %5000 = vmatprep.subr.bf16.mxu0 %v7325_v10 }
 0xf08   : > { %4958 = vmatpush2.bf16.msra.mxu1 %v7320_v13  ;;  %v7401_v21 = vpop.eup %7400  ;;  %v4200_v13 = vrot.slane %v4195_v23, %v8815_v41 }
 0xf09   : > { %5001 = vmatpush2.bf16.msra.mxu0 %v7323_v15  ;;  %4959 = vmatprep.subr.bf16.mxu1 %v7328_v2  ;;  %v7403_v26 = vpop.eup %7402  ;;  %v4031_v61 = vadd.f32 1.0, %v7401_v21  ;;  %v4204_v2 = vrot.slane %v4195_v23, %v8812_v40 }
 0xf0a   : > { %5002 = vmatprep.subr.bf16.mxu0 %v7331_v18  ;;  %v7405_v3 = vpop.eup %7404  ;;  %v4033_v5 = vadd.f32 1.0, %v7403_v26 }
 0xf0b   : > { %v7407_v4 = vpop.eup %7406  ;;  %v4032_v16 = vadd.f32 1.0, %v7405_v3  ;;  %v4047_v63 = vmul.f32 %v4031_v61, %v3919_v47 }
 0xf0c   : > { %4960 = vmatpush2.bf16.msra.mxu1 %v7326_v57  ;;  %v4034_v50 = vadd.f32 1.0, %v7407_v4  ;;  %v4049_v31 = vmul.f32 %v4033_v5, %v3921_v59 }
 0xf0d   : > { %v7409_v32 = vpop.eup %7408  ;;  %5003 = vmatpush2.bf16.msra.mxu0 %v7329_v24  ;;  %4961 = vmatprep.subr.bf16.mxu1 %v7334_v25  ;;  %v4048_v58 = vmul.f32 %v4032_v16, %v3920_v42 }
 0xf0e   : > { %v7411_v30 = vpop.eup %7410  ;;  %5004 = vmatprep.subr.bf16.mxu0 %v7337_v46  ;;  %v4039_v27 = vadd.f32 1.0, %v7409_v32  ;;  %v4050_v19 = vmul.f32 %v4034_v50, %v3922_v6 }
 0xf0f   : > { %v7413_v49 = vpop.eup %7412  ;;  %v4041_v29 = vadd.f32 1.0, %v7411_v30 }
 0xf10   : > { %v7415_v54 = vpop.eup %7414  ;;  %4962 = vmatpush2.bf16.msra.mxu1 %v7332_v12  ;;  %v4040_v8 = vadd.f32 1.0, %v7413_v49  ;;  %v4055_v7 = vmul.f32 %v4039_v27, %v3927_v51 }
 0xf11   : > { %5005 = vmatpush2.bf16.msra.mxu0 %v7335_v33  ;;  %4963 = vmatprep.subr.bf16.mxu1 %v7340_v34  ;;  %v4042_v56 = vadd.f32 1.0, %v7415_v54  ;;  %v4057_v35 = vmul.f32 %v4041_v29, %v3929_v45 }
 0xf12   : > { %5006 = vmatprep.subr.bf16.mxu0 %v7343_v14  ;;  %v4056_v11 = vmul.f32 %v4040_v8, %v3928_v22  ;;  %v4063_v28 = vpack.c.bf16 %v4055_v7, %v4047_v63 }
 0xf13   : > { %v4058_v44 = vmul.f32 %v4042_v56, %v3930_v43  ;;  %v4065_v20 = vpack.c.bf16 %v4057_v35, %v4049_v31 }
 0xf14   : > { %4964 = vmatpush2.bf16.msra.mxu1 %v7338_v52  ;;  %v4064_v0 = vpack.c.bf16 %v4056_v11, %v4048_v58 }
 0xf15   : > { %5007 = vmatpush2.bf16.msra.mxu0 %v7341_v37  ;;  %v4066_v55 = vpack.c.bf16 %v4058_v44, %v4050_v19 }
 0xf16   : > { %4965 = vmatprep.mubr.bf16.mxu1 %v4064_v0 }
 0xf17   : > { %5008 = vmatprep.mubr.bf16.mxu0 %v4066_v55  ;;  %4966 = vmatmul.mubr.bf16.vlgmr.msra.gmra.mxu1 %v4063_v28 }
 0xf18   : > { %5009 = vmatmul.mubr.bf16.vlgmr.msra.gmra.mxu0 %v4065_v20 }
 0xf97   : > { %v4881_v1 = vpop.f32.mrf.mxu1 }
 0xf98   : > { %v4924_v9 = vpop.f32.mrf.mxu0  ;;  %v4882_v57 = vadd.f32 %v4881_v1, %v4200_v13 }
 0xf99   : > { %v4883_v10 = vpop.f32.mrf.mxu1 }
 0xf9a   : > { %v4926_v15 = vpop.f32.mrf.mxu0  ;;  %v4884_v24 = vadd.f32 %v4883_v10, %v4204_v2  ;;  %v4925_v26 = vadd.f32 %v4924_v9, %v4882_v57 }
 0xf9b   : > { %v4885_v18 = vpop.f32.mrf.mxu1 }
 0xf9c   : > { %v4928_v21 = vpop.f32.mrf.mxu0  ;;  %v4886_v46 = vadd.f32 %v4885_v18, %v4200_v13  ;;  %v4927_v12 = vadd.f32 %v4926_v15, %v4884_v24 }
 0xf9d   : > { %v4887_v25 = vpop.f32.mrf.mxu1 }
 0xf9e   : > { %v4930_v3 = vpop.f32.mrf.mxu0  ;;  %v4888_v32 = vadd.f32 %v4887_v25, %v4204_v2  ;;  %v4929_v14 = vadd.f32 %v4928_v21, %v4886_v46 }
 0xfa0   : > { %v4931_v49 = vadd.f32 %v4930_v3, %v4888_v32 }
 0xfd7   : > { %v4967_v4 = vpop.f32.mrf.mxu1 }
 0xfd8   : > { %v4968_v33 = vadd.f32 %v4967_v4, %v4925_v26  ;;  %v5010_v34 = vpop.f32.mrf.mxu0 }
 0xfd9   : > { %v4969_v30 = vpop.f32.mrf.mxu1 }
 0xfda   : > { %v5011_v42 = vadd.f32 %v5010_v34, %v4968_v33  ;;  %v4970_v16 = vadd.f32 %v4969_v30, %v4927_v12  ;;  %v5012_v47 = vpop.f32.mrf.mxu0 }
 0xfdb   : > { %v4971_v27 = vpop.f32.mrf.mxu1 }
 0xfdc   : > { %v9475_v50 = vadd.f32 %v5011_v42, %v9083_v48  ;;  %v5013_v51 = vadd.f32 %v5012_v47, %v4970_v16  ;;  %v4972_v61 = vadd.f32 %v4971_v27, %v4929_v14  ;;  %v5014_v29 = vpop.f32.mrf.mxu0 }
 0xfdd   : > { %v4973_v54 = vpop.f32.mrf.mxu1 }
 0xfde   : > { %5023 = vst [vmem:[#allocation2 + $0x10] sm:$0xff] %v9475_v50  ;;  %v9479_v52 = vadd.f32 %v5013_v51, %v9085_v53  ;;  %v5015_v22 = vadd.f32 %v5014_v29, %v4972_v61  ;;  %v4974_v8 = vadd.f32 %v4973_v54, %v4931_v49  ;;  %v5016_v45 = vpop.f32.mrf.mxu0 }
 0xfe0   : > { %5024 = vst [vmem:[#allocation2] sm:$0xff] %v9479_v52  ;;  %v9483_v5 = vadd.f32 %v5015_v22, %v9091_v60  ;;  %v5017_v37 = vadd.f32 %v5016_v45, %v4974_v8  ;;  %5030 = sbr.rel (%p6584_p0) target bundleno = 4450 (0x1162), region = 192 }
 0xfe2   : > { %5025 = vst [vmem:[#allocation2 + $0x18] sm:$0xff] %v9483_v5  ;;  %v9487_v48 = vadd.f32 %v5017_v37, %v9093_v62 }
 0xfe4   : > { %5026 = vst [vmem:[#allocation2 + $0x8] sm:$0xff] %v9487_v48 }
 0xfe5   : > { %v5033_v53 = vadd.f32 %v9479_v52, %v9475_v50  ;;  %v5041_v6 = vmul.f32 %v9475_v50, %v9475_v50  ;;  %v5042_v60 = vmul.f32 %v9479_v52, %v9479_v52  ;;  %v7421_v43 = vld [vmem:[#allocation26 + $0xe4] ss:$16 sps:$4 sm:$0xff]   ;;  %v5043_v56 = vmul.f32 %v9483_v5, %v9483_v5  ;;  %v7423_v7 = vld [vmem:[#allocation26 + $0xec] ss:$16 sps:$4 sm:$0xff]   ;;  %v7425_v59 = vld [vmem:[#allocation26 + $0xe0] ss:$16 sps:$4 sm:$0xff]  }
 0xfe6   : > { %v5044_v62 = vmul.f32 %v9487_v48, %v9487_v48  ;;  %v5036_v11 = vadd.f32 %v9487_v48, %v9483_v5  ;;  %5509 = vmatprep.subr.bf16.mxu0 %v7421_v43  ;;  %v7426_v35 = vld [vmem:[#allocation26 + $0xe8] ss:$16 sps:$4 sm:$0xff]   ;;  %5552 = vmatprep.subr.bf16.mxu1 %v7423_v7  ;;  %v7427_v19 = vld [vmem:[#allocation26 + $0xc4] ss:$16 sps:$4 sm:$0xff]   ;;  %v7429_v63 = vld [vmem:[#allocation26 + $0xcc] ss:$16 sps:$4 sm:$0xff]  }
 0xfe7   : > { %5034 = vadd.xlane.f32.xlu0 %v5033_v53  ;;  %v5045_v58 = vadd.f32 %v5042_v60, %v5041_v6  ;;  %5510 = vmatpush1.bf16.msra.mxu0 %v7425_v59  ;;  %v7431_v0 = vld [vmem:[#allocation26 + $0xc0] ss:$16 sps:$4 sm:$0xff]   ;;  %v7432_v31 = vld [vmem:[#allocation26 + $0xc8] ss:$16 sps:$4 sm:$0xff]   ;;  %v7433_v55 = vld [vmem:[#allocation26 + $0xa4] ss:$16 sps:$4 sm:$0xff]  }
 0xfe8   : > { %v5048_v44 = vadd.f32 %v5044_v62, %v5043_v56  ;;  %5553 = vmatpush1.bf16.msra.mxu1 %v7426_v35  ;;  %5511 = vmatprep.subr.bf16.mxu0 %v7427_v19  ;;  %v7435_v28 = vld [vmem:[#allocation26 + $0xac] ss:$16 sps:$4 sm:$0xff]   ;;  %v7437_v20 = vld [vmem:[#allocation26 + $0xa0] ss:$16 sps:$4 sm:$0xff]   ;;  %v7438_v1 = vld [vmem:[#allocation26 + $0xa8] ss:$16 sps:$4 sm:$0xff]  }
 0xfe9   : > { %5046 = vadd.xlane.f32.xlu1 %v5045_v58  ;;  %5554 = vmatprep.subr.bf16.mxu1 %v7429_v63  ;;  %v7439_v9 = vld [vmem:[#allocation26 + $0x84] ss:$16 sps:$4 sm:$0xff]   ;;  %v7441_v23 = vld [vmem:[#allocation26 + $0x8c] ss:$16 sps:$4 sm:$0xff]   ;;  %v7443_v10 = vld [vmem:[#allocation26 + $0x80] ss:$16 sps:$4 sm:$0xff]  }
 0xfea   : > { %v7444_v13 = vld [vmem:[#allocation26 + $0x88] ss:$16 sps:$4 sm:$0xff]   ;;  %v7445_v15 = vld [vmem:[#allocation26 + $0x64] ss:$16 sps:$4 sm:$0xff]   ;;  %v7447_v2 = vld [vmem:[#allocation26 + $0x6c] ss:$16 sps:$4 sm:$0xff]  }
 0xfeb   : > { %5037 = vadd.xlane.f32.xlu0 %v5036_v11  ;;  %5512 = vmatpush1.bf16.msra.mxu0 %v7431_v0  ;;  %v7449_v18 = vld [vmem:[#allocation26 + $0x60] ss:$16 sps:$4 sm:$0xff]   ;;  %v7450_v57 = vld [vmem:[#allocation26 + $0x68] ss:$16 sps:$4 sm:$0xff]   ;;  %v7451_v21 = vld [vmem:[#allocation26 + $0x44] ss:$16 sps:$4 sm:$0xff]  }
 0xfec   : > { %5555 = vmatpush1.bf16.msra.mxu1 %v7432_v31  ;;  %5513 = vmatprep.subr.bf16.mxu0 %v7433_v55  ;;  %v7453_v24 = vld [vmem:[#allocation26 + $0x4c] ss:$16 sps:$4 sm:$0xff]   ;;  %v7455_v25 = vld [vmem:[#allocation26 + $0x40] ss:$16 sps:$4 sm:$0xff]   ;;  %v7456_v26 = vld [vmem:[#allocation26 + $0x48] ss:$16 sps:$4 sm:$0xff]  }
 0xfed   : > { %5049 = vadd.xlane.f32.xlu1 %v5048_v44  ;;  %5556 = vmatprep.subr.bf16.mxu1 %v7435_v28  ;;  %v7457_v46 = vld [vmem:[#allocation26 + $0x24] ss:$16 sps:$4 sm:$0xff]   ;;  %v7459_v3 = vld [vmem:[#allocation26 + $0x2c] ss:$16 sps:$4 sm:$0xff]   ;;  %v7461_v4 = vld [vmem:[#allocation26 + $0x20] ss:$16 sps:$4 sm:$0xff]  }
 0xfee   : > { %v7462_v12 = vld [vmem:[#allocation26 + $0x28] ss:$16 sps:$4 sm:$0xff]   ;;  %v7463_v32 = vld [vmem:[#allocation26 + $0x4] ss:$16 sps:$4 sm:$0xff]   ;;  %v7465_v33 = vld [vmem:[#allocation26 + $0xc] ss:$16 sps:$4 sm:$0xff]  }
 0xfef   : > { %5514 = vmatpush1.bf16.msra.mxu0 %v7437_v20  ;;  %v7467_v34 = vld [vmem:[#allocation26] ss:$16 sps:$4 sm:$0xff]   ;;  %v7468_v30 = vld [vmem:[#allocation26 + $0x8] ss:$16 sps:$4 sm:$0xff]   ;;  %v7469_v14 = vld [vmem:[#allocation26 + $0x1e4] ss:$16 sps:$4 sm:$0xff]  }
 0xff0   : > { %5557 = vmatpush1.bf16.msra.mxu1 %v7438_v1  ;;  %5515 = vmatprep.subr.bf16.mxu0 %v7439_v9  ;;  %v7471_v42 = vld [vmem:[#allocation26 + $0x1ec] ss:$16 sps:$4 sm:$0xff]   ;;  %v7473_v16 = vld [vmem:[#allocation26 + $0x1e0] ss:$16 sps:$4 sm:$0xff]   ;;  %v7474_v47 = vld [vmem:[#allocation26 + $0x1e8] ss:$16 sps:$4 sm:$0xff]  }
 0xff1   : > { %5558 = vmatprep.subr.bf16.mxu1 %v7441_v23  ;;  %v7475_v27 = vld [vmem:[#allocation26 + $0x1c4] ss:$16 sps:$4 sm:$0xff]   ;;  %v7477_v49 = vld [vmem:[#allocation26 + $0x1cc] ss:$16 sps:$4 sm:$0xff]   ;;  %v7479_v51 = vld [vmem:[#allocation26 + $0x1c0] ss:$16 sps:$4 sm:$0xff]  }
 0xff2   : > { %v7480_v61 = vld [vmem:[#allocation26 + $0x1c8] ss:$16 sps:$4 sm:$0xff]   ;;  %v7481_v29 = vld [vmem:[#allocation26 + $0x1a4] ss:$16 sps:$4 sm:$0xff]   ;;  %v7483_v54 = vld [vmem:[#allocation26 + $0x1ac] ss:$16 sps:$4 sm:$0xff]  }
 0xff3   : > { %5516 = vmatpush1.bf16.msra.mxu0 %v7443_v10  ;;  %v7485_v22 = vld [vmem:[#allocation26 + $0x1a0] ss:$16 sps:$4 sm:$0xff]   ;;  %v7486_v8 = vld [vmem:[#allocation26 + $0x1a8] ss:$16 sps:$4 sm:$0xff]   ;;  %v7487_v45 = vld [vmem:[#allocation26 + $0x184] ss:$16 sps:$4 sm:$0xff]  }
 0xff4   : > { %5559 = vmatpush1.bf16.msra.mxu1 %v7444_v13  ;;  %5517 = vmatprep.subr.bf16.mxu0 %v7445_v15  ;;  %v7489_v37 = vld [vmem:[#allocation26 + $0x18c] ss:$16 sps:$4 sm:$0xff]   ;;  %v7491_v53 = vld [vmem:[#allocation26 + $0x180] ss:$16 sps:$4 sm:$0xff]   ;;  %v7492_v6 = vld [vmem:[#allocation26 + $0x188] ss:$16 sps:$4 sm:$0xff]  }
 0xff5   : > { %5560 = vmatprep.subr.bf16.mxu1 %v7447_v2  ;;  %v7493_v60 = vld [vmem:[#allocation26 + $0x164] ss:$16 sps:$4 sm:$0xff]   ;;  %v7495_v43 = vld [vmem:[#allocation26 + $0x16c] ss:$16 sps:$4 sm:$0xff]   ;;  %v7497_v56 = vld [vmem:[#allocation26 + $0x160] ss:$16 sps:$4 sm:$0xff]  }
 0xff6   : > { %v7498_v62 = vld [vmem:[#allocation26 + $0x168] ss:$16 sps:$4 sm:$0xff]   ;;  %v7499_v7 = vld [vmem:[#allocation26 + $0x144] ss:$16 sps:$4 sm:$0xff]   ;;  %v7501_v58 = vld [vmem:[#allocation26 + $0x14c] ss:$16 sps:$4 sm:$0xff]  }
 0xff7   : > { %5518 = vmatpush1.bf16.msra.mxu0 %v7449_v18  ;;  %v7503_v11 = vld [vmem:[#allocation26 + $0x140] ss:$16 sps:$4 sm:$0xff]   ;;  %v8177_v59 = vmov 0   ;;  %v7504_v35 = vld [vmem:[#allocation26 + $0x148] ss:$16 sps:$4 sm:$0xff]   ;;  %vm5702_vm3 = vcmask 130112  }
 0xff8   : > { %5561 = vmatpush1.bf16.msra.mxu1 %v7450_v57  ;;  %5519 = vmatprep.subr.bf16.mxu0 %v7451_v21  ;;  %v7505_v19 = vld [vmem:[#allocation26 + $0x124] ss:$16 sps:$4 sm:$0xff]   ;;  %v7507_v44 = vld [vmem:[#allocation26 + $0x12c] ss:$16 sps:$4 sm:$0xff]   ;;  %v7509_v63 = vld [vmem:[#allocation26 + $0x120] ss:$16 sps:$4 sm:$0xff]  }
 0xff9   : > { %5562 = vmatprep.subr.bf16.mxu1 %v7453_v24  ;;  %7420 = vset.pattern.permute.xlu0 %v8177_v59  ;;  %v7510_v0 = vld [vmem:[#allocation26 + $0x128] ss:$16 sps:$4 sm:$0xff]   ;;  %v7511_v31 = vld [vmem:[#allocation26 + $0x104] ss:$16 sps:$4 sm:$0xff]   ;;  %v7513_v55 = vld [vmem:[#allocation26 + $0x10c] ss:$16 sps:$4 sm:$0xff]  }
 0xffa   : > { %v7515_v28 = vld [vmem:[#allocation26 + $0x100] ss:$16 sps:$4 sm:$0xff]   ;;  %v7516_v20 = vld [vmem:[#allocation26 + $0x108] ss:$16 sps:$4 sm:$0xff]   ;;  %vm5705_vm4 = vcmask 122880  }
 0xffb   : > { %5520 = vmatpush1.bf16.msra.mxu0 %v7455_v25 }
 0xffc   : > { %5563 = vmatpush1.bf16.msra.mxu1 %v7456_v26  ;;  %5521 = vmatprep.subr.bf16.mxu0 %v7457_v46 }
 0xffd   : > { %5564 = vmatprep.subr.bf16.mxu1 %v7459_v3 }
 0xfff   : > { %5522 = vmatpush1.bf16.msra.mxu0 %v7461_v4 }
0x1000   : > { %5565 = vmatpush1.bf16.msra.mxu1 %v7462_v12  ;;  %5523 = vmatprep.subr.bf16.mxu0 %v7463_v32  ;;  %v5623_v12 = vld [vmem:[#allocation29] sm:$0x3]  ;;  %v5624_v32 = vld [vmem:[#allocation30] sm:$0x3] }
0x1001   : > { %5566 = vmatprep.subr.bf16.mxu1 %v7465_v33  ;;  %v5031_v33 = vld [vmem:[#allocation23] sm:$0x3] }
0x1003   : > { %5524 = vmatpush1.bf16.msra.mxu0 %v7467_v34 }
0x1004   : > { %5567 = vmatpush1.bf16.msra.mxu1 %v7468_v30  ;;  %5525 = vmatprep.subr.bf16.mxu0 %v7469_v14  ;;  %v5629_v14 = vrot.slane %v5623_v12, %v8815_v41 }
0x1005   : > { %5568 = vmatprep.subr.bf16.mxu1 %v7471_v42  ;;  %v5633_v42 = vrot.slane %v5623_v12, %v8812_v40 }
0x1007   : > { %5526 = vmatpush2.bf16.msra.mxu0 %v7473_v16 }
0x1008   : > { %5569 = vmatpush2.bf16.msra.mxu1 %v7474_v47  ;;  %5527 = vmatprep.subr.bf16.mxu0 %v7475_v27  ;;  %v5644_v47 = vrot.slane %v5624_v32, %v8815_v41  ;;  %v5648_v27 = vrot.slane %v5624_v32, %v8812_v40 }
0x1009   : > { %5570 = vmatprep.subr.bf16.mxu1 %v7477_v49  ;;  %v5655_v49 = vld [vmem:[#allocation32] sm:$0x3] }
0x100b   : > { %5528 = vmatpush2.bf16.msra.mxu0 %v7479_v51 }
0x100c   : > { %5571 = vmatpush2.bf16.msra.mxu1 %v7480_v61  ;;  %5529 = vmatprep.subr.bf16.mxu0 %v7481_v29  ;;  %v5032_v29 = vld [vmem:[#allocation24] sm:$0x3] }
0x100d   : > { %5572 = vmatprep.subr.bf16.mxu1 %v7483_v54  ;;  %v5075_v54 = vrot.slane %v5031_v33, %v8815_v41 }
0x100f   : > { %5530 = vmatpush2.bf16.msra.mxu0 %v7485_v22  ;;  %v5079_v22 = vrot.slane %v5031_v33, %v8812_v40 }
0x1010   : > { %5573 = vmatpush2.bf16.msra.mxu1 %v7486_v8  ;;  %5531 = vmatprep.subr.bf16.mxu0 %v7487_v45  ;;  %v5664_v45 = vrot.slane %v5655_v49, %v8812_v40 }
0x1011   : > { %5574 = vmatprep.subr.bf16.mxu1 %v7489_v37 }
0x1013   : > { %5532 = vmatpush2.bf16.msra.mxu0 %v7491_v53 }
0x1014   : > { %5575 = vmatpush2.bf16.msra.mxu1 %v7492_v6  ;;  %5533 = vmatprep.subr.bf16.mxu0 %v7493_v60  ;;  %v5090_v6 = vrot.slane %v5032_v29, %v8815_v41  ;;  %v5094_v60 = vrot.slane %v5032_v29, %v8812_v40 }
0x1015   : > { %5576 = vmatprep.subr.bf16.mxu1 %v7495_v43 }
0x1017   : > { %5534 = vmatpush2.bf16.msra.mxu0 %v7497_v56 }
0x1018   : > { %5577 = vmatpush2.bf16.msra.mxu1 %v7498_v62  ;;  %5535 = vmatprep.subr.bf16.mxu0 %v7499_v7 }
0x1019   : > { %5578 = vmatprep.subr.bf16.mxu1 %v7501_v58 }
0x101b   : > { %5536 = vmatpush2.bf16.msra.mxu0 %v7503_v11 }
0x101c   : > { %5579 = vmatpush2.bf16.msra.mxu1 %v7504_v35  ;;  %5537 = vmatprep.subr.bf16.mxu0 %v7505_v19 }
0x101d   : > { %5580 = vmatprep.subr.bf16.mxu1 %v7507_v44 }
0x101f   : > { %5538 = vmatpush2.bf16.msra.mxu0 %v7509_v63 }
0x1020   : > { %5581 = vmatpush2.bf16.msra.mxu1 %v7510_v0  ;;  %5539 = vmatprep.subr.bf16.mxu0 %v7511_v31 }
0x1021   : > { %5582 = vmatprep.subr.bf16.mxu1 %v7513_v55 }
0x1023   : > { %5540 = vmatpush2.bf16.msra.mxu0 %v7515_v28 }
0x1024   : > { %5583 = vmatpush2.bf16.msra.mxu1 %v7516_v20 }
0x1070   : > { %v5035_v1 = vpop.xlane.xlu0 %5034 }
0x1071   : > { %v5039_v9 = vmul.f32 0.00390625, %v5035_v1 }
0x1072   : > { %v5047_v23 = vpop.xlane.xlu1 %5046 }
0x1073   : > { %v5051_v10 = vmul.f32 0.00390625, %v5047_v23  ;;  %v5053_v13 = vmul.f32 %v5039_v9, %v5039_v9  ;;  %v5063_v34 = vsub.f32 %v9475_v50, %v5039_v9  ;;  %v5064_v30 = vsub.f32 %v9479_v52, %v5039_v9 }
0x1074   : > { %v5038_v15 = vpop.xlane.xlu0 %5037  ;;  %v5660_v52 = vrot.slane %v5655_v49, %v8815_v41 }
0x1075   : > { %v5055_v2 = vsub.f32 %v5051_v10, %v5053_v13  ;;  %v5040_v18 = vmul.f32 0.00390625, %v5038_v15 }
0x1076   : > { %v5050_v57 = vpop.xlane.xlu1 %5049 }
0x1077   : > { %v5057_v21 = vmax.f32 %v5055_v2, 0.0  ;;  %v5052_v24 = vmul.f32 0.00390625, %v5050_v57  ;;  %v5054_v25 = vmul.f32 %v5040_v18, %v5040_v18  ;;  %v5065_v37 = vsub.f32 %v9483_v5, %v5040_v18 }
0x1078   : > { %v5066_v53 = vsub.f32 %v9487_v48, %v5040_v18  ;;  %v5677_v18 = vld [vmem:[#allocation3] sm:$0x1]  ;;  %v5692_v57 = vand.u32 127, %v1334_v38  ;;  %v5167_v38 = vld [vmem:[#allocation27] sm:$0xf] }
0x1079   : > { %v5059_v26 = vadd.f32 1e-05, %v5057_v21  ;;  %v5056_v46 = vsub.f32 %v5052_v24, %v5054_v25 }
0x107a   : > { %v5697_v24 = vadd.s32 4294967288, %v5692_v57 }
0x107b   : > { %7517 = vrsqrt.f32 %v5059_v26  ;;  %v5058_v3 = vmax.f32 %v5056_v46, 0.0  ;;  %v5695_v26 = vsub.s32 %v5692_v57, %v8809_v39 }
0x107c   : > { %v5700_v46 = vsub.s32 %v5697_v24, %v8809_v39  ;;  %v5180_v39 = vrot.slane %v5167_v38, %v8869_v36 }
0x107d   : > { %v5060_v4 = vadd.f32 1e-05, %v5058_v3 }
0x107f   : > { %7519 = vrsqrt.f32 %v5060_v4 }
0x1088   : > { %v7518_v16 = vpop.eup %7517 }
0x1089   : > { %v5067_v51 = vmul.f32 %v7518_v16, %v5063_v34  ;;  %v5068_v61 = vmul.f32 %v7518_v16, %v5064_v30  ;;  %v5184_v16 = vrot.slane %v5167_v38, %v8949_v17 }
0x108b   : > { %v5636_v50 = vmul.f32 %v5629_v14, %v5067_v51  ;;  %v5637_v8 = vmul.f32 %v5633_v42, %v5068_v61  ;;  %v5083_v7 = vmul.f32 %v5079_v22, %v5068_v61  ;;  %v5082_v58 = vmul.f32 %v5075_v54, %v5067_v51 }
0x108c   : > { %v7520_v43 = vpop.eup %7519 }
0x108d   : > { %v5651_v56 = vadd.f32 %v5644_v47, %v5636_v50  ;;  %v5652_v62 = vadd.f32 %v5648_v27, %v5637_v8  ;;  %v5070_v11 = vmul.f32 %v7520_v43, %v5066_v53  ;;  %v5069_v59 = vmul.f32 %v7520_v43, %v5065_v37 }
0x108e   : > { %v5098_v55 = vadd.f32 %v5094_v60, %v5083_v7  ;;  %v5097_v48 = vadd.f32 %v5090_v6, %v5082_v58 }
0x108f   : > { %v5667_v35 = vmul.f32 %v5660_v52, %v5651_v56  ;;  %v5668_v19 = vmul.f32 %v5664_v45, %v5652_v62  ;;  %v5085_v44 = vmul.f32 %v5079_v22, %v5070_v11  ;;  %v5084_v63 = vmul.f32 %v5075_v54, %v5069_v59 }
0x1090   : > { %v5638_v0 = vmul.f32 %v5629_v14, %v5069_v59  ;;  %v5639_v31 = vmul.f32 %v5633_v42, %v5070_v11  ;;  %v5172_v14 = vrot.slane %v5167_v38, %v8815_v41  ;;  %v5176_v42 = vrot.slane %v5167_v38, %v8812_v40 }
0x1091   : > { %v5671_v5 = vadd.f32 %v5668_v19, %v5667_v35  ;;  %v5100_v28 = vadd.f32 %v5094_v60, %v5085_v44  ;;  %v5099_v20 = vadd.f32 %v5090_v6, %v5084_v63 }
0x1092   : > { %v5653_v1 = vadd.f32 %v5644_v47, %v5638_v0  ;;  %v5654_v9 = vadd.f32 %v5648_v27, %v5639_v31 }
0x1093   : > { %5672 = vadd.xlane.f32.xlu0 %v5671_v5  ;;  %v5102_v23 = vpack.c.bf16 %v5100_v28, %v5098_v55  ;;  %v5101_v10 = vpack.c.bf16 %v5099_v20, %v5097_v48 }
0x1094   : > { %v5669_v13 = vmul.f32 %v5660_v52, %v5653_v1  ;;  %v5670_v15 = vmul.f32 %v5664_v45, %v5654_v9 }
0x1095   : > { %5541 = vmatprep.mubr.bf16.mxu0 %v5102_v23  ;;  %5584 = vmatprep.mubr.bf16.mxu1 %v5102_v23 }
0x1096   : > { %v5674_v2 = vadd.f32 %v5670_v15, %v5669_v13  ;;  %5542 = vmatmul.mubr.bf16.vlgmr.msra.gmra.mxu0 %v5101_v10  ;;  %5585 = vmatmul.mubr.bf16.vlgmr.msra.gmra.mxu1 %v5101_v10 }
0x1098   : > { %5675 = vadd.xlane.f32.xlu1 %v5674_v2 }
0x10a9   : > { %5680 = vperm.xlu0 %7420, %v5677_v18  }
0x111c   : > { %v5673_v21 = vpop.xlane.xlu0 %5672 }
0x1121   : > { %v5676_v4 = vpop.xlane.xlu1 %5675 }
0x1124   : > { %v5681_v25 = vpop.permute.xlu0 %5680 }
0x1125   : > { %v5686_v3 = vrot.slane %v5681_v25, %v8815_v41 }
0x1127   : > { %v5687_v12 = vadd.f32 %v5686_v3, %v5673_v21  ;;  %v5688_v32 = vadd.f32 %v5686_v3, %v5676_v4 }
0x1129   : > { %v5696_v33 = vrot.slane %v5687_v12, %v5695_v26  ;;  %v5701_v34 = vrot.slane %v5688_v32, %v5700_v46 }
0x112b   : > { %v5703_v30 = vsel %vm5702_vm3, %v5701_v34, %v5696_v33 }
0x112c   : > { %5706 = vst.msk [vmem:[%s1271_s6] sm:$0x1] %vm5705_vm4, %v5703_v30 }
0x1156   : > { %v5543_v47 = vpop.f32.mrf.mxu0  ;;  %v5586_v27 = vpop.f32.mrf.mxu1 }
0x1157   : > { %v5544_v61 = vadd.f32 %v5543_v47, %v5172_v14  ;;  %v5587_v29 = vadd.f32 %v5586_v27, %v5180_v39 }
0x1158   : > { %v5545_v49 = vpop.f32.mrf.mxu0  ;;  %v5588_v51 = vpop.f32.mrf.mxu1 }
0x1159   : > { %v5546_v54 = vadd.f32 %v5545_v49, %v5176_v42  ;;  %v5589_v22 = vadd.f32 %v5588_v51, %v5184_v16 }
0x115a   : > { %v5547_v50 = vpop.f32.mrf.mxu0  ;;  %v5590_v41 = vpop.f32.mrf.mxu1 }
0x115b   : > { %v6667_v8 = vpack.c.bf16 %v5546_v54, %v5544_v61  ;;  %v6668_v36 = vpack.c.bf16 %v5589_v22, %v5587_v29  ;;  %v5548_v17 = vadd.f32 %v5547_v50, %v5172_v14  ;;  %v5591_v45 = vadd.f32 %v5590_v41, %v5180_v39 }
0x115c   : > { %v5549_v52 = vpop.f32.mrf.mxu0  ;;  %v5592_v40 = vpop.f32.mrf.mxu1 }
0x115d   : > { %5619 = vst [vmem:[%s8720_s19] sm:$0xff] %v6667_v8  ;;  %5620 = vst [vmem:[%s8720_s19 + $0x8] sm:$0xff] %v6668_v36  ;;  %v5550_v37 = vadd.f32 %v5549_v52, %v5176_v42  ;;  %v5593_v53 = vadd.f32 %v5592_v40, %v5184_v16 }
0x115f   : > { %v6669_v6 = vpack.c.bf16 %v5550_v37, %v5548_v17  ;;  %v6670_v60 = vpack.c.bf16 %v5593_v53, %v5591_v45 }
0x1161   : > { %5621 = vst [vmem:[%s8720_s19 + $0x10] sm:$0xff] %v6669_v6  ;;  %5622 = vst [vmem:[%s8720_s19 + $0x18] sm:$0xff] %v6670_v60 }
0x1162 PF: > { %s9689_s17 = sld [smem:[#allocation49_spill]]  ;;  %s9696_s5 = smov %s8137_s26 }
0x1163   : > { %s9690_s24 = sld [smem:[#allocation44_spill]] }
0x1164   : > { %s9691_s21 = sld [smem:[#allocation45_spill]] }
0x1165   : > { %s9692_s25 = sld [smem:[#allocation54_spill]] }
0x1166   : > { %s9693_s1 = sld [smem:[#allocation48_spill]] }
0x1167   : > { %s9694_s28 = sld [smem:[#allocation52_spill]] }
0x1168   : > { %s60_s6 = sadd.s32 1, %s9689_s17   ;;  %s9695_s2 = sld [smem:[#allocation53_spill]] }
0x1169   : > { %p57_p2 = scmp.ge.s32.totalorder %s60_s6, 14  }
0x116b   :  { %59 = sbr.rel (!%p57_p2) target bundleno = 38 (0x26), region = 332 }
0x116d   : > { %s9697_s26 = smov %s9694_s28 }
0x1170   :  { %5740 = vsyncpa [#allocation5], 1 }
0x1171   :  { %5742 = vsyncpa [#allocation5 + $0x1], 1 }
0x1172   :  { %5743 = vsyncpa [#allocation7], 1 }
0x1173   :  { %5745 = vsyncpa [#allocation7 + $0x1], 1 }
0x1174   :  { %5746 = vsyncpa [#allocation10], 1 }
0x1175   :  { %5748 = vsyncpa [#allocation10 + $0x1], 1 }
0x1176   :  { %5749 = vsyncpa [#allocation13], 1 }
0x1177   :  { %5751 = vsyncpa [#allocation13 + $0x1], 1 }
0x1178   :  { %5752 = vsyncpa [#allocation16], 1 }
0x1179   :  { %5754 = vsyncpa [#allocation16 + $0x1], 1 }
0x117a   :  { %5755 = vsyncpa [#allocation19], 1 }
0x117b   :  { %5757 = vsyncpa [#allocation19 + $0x1], 1 }
0x117c   :  { %5758 = vsyncpa [#allocation22], 1 }
0x117d   :  { %5760 = vsyncpa [#allocation22 + $0x1], 1 }
0x117e   :  { %5761 = vsyncpa [#allocation25], 1 }
0x117f   :  { %5762 = vsyncpa [#allocation28], 1 }
0x1180   :  { %5763 = vsyncpa [#allocation31], 1 }

</bundles_post_ra>
